<compile_context>
chip_gen: v6e
topology: v6e:2x2x1
jax: 0.10.0
libtpu: 0.0.40
codegen_flags: <defaults>
</compile_context>

<pallas_src>
import functools

import jax
import jax.numpy as jnp
from jax import lax
from jax.experimental import pallas as pl
from jax.experimental.pallas import tpu as pltpu


def _round_up(n, m):
    return ((n + m - 1) // m) * m


def _default_batch_block():
    """128 on v5e (128-wide MXU), 256 on v6e/v7x (256-wide MXU)."""
    try:
        kind = jax.devices()[0].device_kind.lower()
    except Exception:  # pragma: no cover - defensive
        return 128
    if "v5 lite" in kind or "v5e" in kind or "v5lite" in kind:
        return 128
    return 256


def bilstm_kernel(x_ref, wih_f_ref, whh_f_ref, b_f_ref,
                  wih_b_ref, b_b_ref, fcw_ref, fcb_ref,
                  out_ref, *scratch,
                  hidden_size, seq_len, use_scratch, rec_unroll):
    """One batch-block of the BiLSTM forward.

    x_ref:   (Bb, T, I)   batch-major input block (bf16 or f32)
    w*_ref:  transposed weights for right-multiplication (MXU dtype)
    b*_ref:  (1, 4H) f32 combined biases
    out_ref: (Bb, O_pad)  lane-dense f32 output block
    scratch: optional (T, Bb, 4H) f32 VMEM buffer (large-T path only)
    """
    H = hidden_size
    T = seq_len
    Bb = x_ref.shape[0]
    I = x_ref.shape[2]
    mxu_dtype = wih_f_ref.dtype

    # ---- Hoisted input projection + bias: one big MXU matmul ---------------
    # (Bb, T, I) -> (Bb*T, I) is layout-preserving when T % 8 == 0.
    x_flat = x_ref[...].reshape(Bb * T, I)
    proj = (jnp.dot(x_flat, wih_f_ref[...],
                    preferred_element_type=jnp.float32)
            + b_f_ref[...])                              # (Bb*T, 4H) f32
    proj = proj.reshape(Bb, T, 4 * H)

    def gate_math(gates, c):
        # Full-tile EUP passes over the whole (Bb, 4H) tile, then lane slices
        # for the state update (PyTorch gate order i, f, g, o).
        sig = jax.nn.sigmoid(gates)
        th = jnp.tanh(gates)
        i_g = sig[:, 0:H]
        f_g = sig[:, H:2 * H]
        g_g = th[:, 2 * H:3 * H]
        o_g = sig[:, 3 * H:4 * H]
        c_new = f_g * c + i_g * g_g
        h_new = o_g * jnp.tanh(c_new)
        return h_new, c_new

    h = jnp.zeros((Bb, H), jnp.float32)
    c = jnp.zeros((Bb, H), jnp.float32)

    if not use_scratch:
        # Small T*Bb: keep the projection in registers, fully unroll the
        # recurrence (T is static) so only h @ W_hh sits on the critical path.
        for t in range(T):
            gates = proj[:, t, :] + jnp.dot(
                h.astype(mxu_dtype), whh_f_ref[...],
                preferred_element_type=jnp.float32)
            h, c = gate_math(gates, c)
        h_fwd = h
    else:
        # Large T: park the projection in VMEM scratch (time-major so the loop
        # uses documented first-axis dynamic indexing) and cap the unroll to
        # bound code size / vreg pressure.  For very long sequences this
        # should instead be streamed in T-chunks to respect v7x's 64 MiB VMEM.
        xg_ref = scratch[0]
        xg_ref[...] = jnp.swapaxes(proj, 0, 1)           # (T, Bb, 4H)

        def body(t, carry):
            h_t, c_t = carry
            gates = xg_ref[t] + jnp.dot(
                h_t.astype(mxu_dtype), whh_f_ref[...],
                preferred_element_type=jnp.float32)
            return gate_math(gates, c_t)

        h_fwd, _ = lax.fori_loop(0, T, body, (h, c), unroll=rec_unroll)

    # ---- Reverse direction: one step from the zero state -------------------
    # Valid because the model consumes lstm_out[:, -1, :] only: the reverse
    # LSTM's hidden state at the last time index has processed exactly x[T-1]
    # starting from (h0, c0) = 0, so the recurrent matmul vanishes.
    gates_b = (jnp.dot(x_ref[:, T - 1, :], wih_b_ref[...],
                       preferred_element_type=jnp.float32)
               + b_b_ref[...])
    h_bwd, _ = gate_math(gates_b, jnp.zeros((Bb, H), jnp.float32))

    # ---- fc(concat([h_fwd, h_bwd])) as a split matmul, lane-dense store ----
    out_ref[...] = (
        jnp.dot(h_fwd.astype(mxu_dtype), fcw_ref[0:H, :],
                preferred_element_type=jnp.float32)
        + jnp.dot(h_bwd.astype(mxu_dtype), fcw_ref[H:2 * H, :],
                  preferred_element_type=jnp.float32)
        + fcb_ref[...])


def bilstm_forward(x, params, *, batch_block=None, mxu_dtype=jnp.bfloat16):
    B, T, I = x.shape
    H = params["w_hh_f"].shape[0]
    O = params["fc_w"].shape[1]

    if batch_block is None:
        batch_block = _default_batch_block()

    # --- block sizing: sublane-aligned, >=2 grid steps once B >= 16 ---------
    B8 = _round_up(B, 8)
    if B8 >= 16:
        B_blk = min(batch_block, _round_up(-(-B8 // 2), 8))
    else:
        B_blk = B8
    B_blk = max(8, B_blk)
    B_pad = _round_up(B, B_blk)
    O_pad = _round_up(O, 128)                     # lane-dense output

    # --- host-side prep: batch-major (no transpose), pad + MXU-dtype cast ---
    x_p = jnp.pad(x.astype(mxu_dtype), ((0, B_pad - B), (0, 0), (0, 0)))

    wih_f = params["w_ih_f"].astype(mxu_dtype)
    whh_f = params["w_hh_f"].astype(mxu_dtype)
    wih_b = params["w_ih_b"].astype(mxu_dtype)
    fc_w = jnp.pad(params["fc_w"], ((0, 0), (0, O_pad - O))).astype(mxu_dtype)
    fc_b = jnp.pad(params["fc_b"], ((0, 0), (0, O_pad - O)))
    b_f = params["b_f"]
    b_b = params["b_b"]

    use_scratch = T > 32
    rec_unroll = 8 if use_scratch else 1          # small-T path is a Python loop
    scratch_shapes = ([pltpu.VMEM((T, B_blk, 4 * H), jnp.float32)]
                      if use_scratch else [])

    # --- VMEM budget (double-buffered blocks + scratch), capped for v7x -----
    isz = jnp.dtype(mxu_dtype).itemsize
    est = (2 * B_blk * T * I * isz                      # x block
           + 2 * B_blk * O_pad * 4                      # out block
           + (T * B_blk * 4 * H * 4 if use_scratch else 0)
           + 2 * (4 * H * (2 * I + H) * isz + 2 * H * O_pad * isz
                  + 2 * 4 * H * 4 + O_pad * 4))
    vmem_limit = int(min(64 * 1024 * 1024, max(32 * 1024 * 1024, 2 * est)))

    kernel = functools.partial(bilstm_kernel, hidden_size=H, seq_len=T,
                               use_scratch=use_scratch, rec_unroll=rec_unroll)

    def full_spec(arr):
        nd = arr.ndim
        return pl.BlockSpec(arr.shape, lambda b, _nd=nd: (0,) * _nd)

    out = pl.pallas_call(
        kernel,
        out_shape=jax.ShapeDtypeStruct((B_pad, O_pad), jnp.float32),
        grid=(B_pad // B_blk,),
        in_specs=[
            pl.BlockSpec((B_blk, T, I), lambda b: (b, 0, 0)),    # x batch-major
            full_spec(wih_f), full_spec(whh_f), full_spec(b_f),
            full_spec(wih_b), full_spec(b_b),
            full_spec(fc_w), full_spec(fc_b),
        ],
        out_specs=pl.BlockSpec((B_blk, O_pad), lambda b: (b, 0)),
        scratch_shapes=scratch_shapes,
        compiler_params=pltpu.CompilerParams(
            dimension_semantics=("parallel",),
            vmem_limit_bytes=vmem_limit),
    )(x_p, wih_f, whh_f, b_f, wih_b, b_b, fc_w, fc_b)

    return out[:B, :O]


def init_params(key, input_size, hidden_size, output_size):
    """Deterministic synthetic parameters with PyTorch's U(-1/sqrt(H), 1/sqrt(H)) init."""
    H = hidden_size
    bound = 1.0 / float(jnp.sqrt(jnp.float32(H)))
    keys = jax.random.split(key, 10)

    def u(k_, shape):
        return jax.random.uniform(k_, shape, jnp.float32, -bound, bound)

    # PyTorch-shaped tensors, then transposed for x @ W usage in the kernel.
    w_ih_f = u(keys[0], (4 * H, input_size))
    w_hh_f = u(keys[1], (4 * H, H))
    b_ih_f = u(keys[2], (4 * H,))
    b_hh_f = u(keys[3], (4 * H,))
    w_ih_b = u(keys[4], (4 * H, input_size))
    w_hh_b = u(keys[5], (4 * H, H))
    b_ih_b = u(keys[6], (4 * H,))
    b_hh_b = u(keys[7], (4 * H,))
    fc_w = u(keys[8], (output_size, 2 * H))
    fc_b = u(keys[9], (output_size,))

    return {
        "w_ih_f": w_ih_f.T, "w_hh_f": w_hh_f.T, "b_f": (b_ih_f + b_hh_f)[None, :],
        "w_ih_b": w_ih_b.T, "w_hh_b": w_hh_b.T, "b_b": (b_ih_b + b_hh_b)[None, :],
        "fc_w": fc_w.T, "fc_b": fc_b[None, :],
    }


def reference_forward(x, params):
    """Pure-JAX f32 reference with exact PyTorch bidirectional-LSTM semantics."""
    B, T, _ = x.shape
    H = params["w_hh_f"].shape[0]

    def make_step(wih, whh, b):
        def step(carry, x_t):
            h, c = carry
            gates = x_t @ wih + h @ whh + b[0]
            i = jax.nn.sigmoid(gates[:, 0:H])
            f = jax.nn.sigmoid(gates[:, H:2 * H])
            g = jnp.tanh(gates[:, 2 * H:3 * H])
            o = jax.nn.sigmoid(gates[:, 3 * H:4 * H])
            c = f * c + i * g
            h = o * jnp.tanh(c)
            return (h, c), h
        return step

    x_tm = jnp.transpose(x, (1, 0, 2))
    init = (jnp.zeros((B, H), jnp.float32), jnp.zeros((B, H), jnp.float32))
    _, out_f = lax.scan(make_step(params["w_ih_f"], params["w_hh_f"], params["b_f"]),
                        init, x_tm)
    _, out_b = lax.scan(make_step(params["w_ih_b"], params["w_hh_b"], params["b_b"]),
                        init, x_tm[::-1])
    out_b = out_b[::-1]                                   # align reverse outputs to time index
    last = jnp.concatenate([out_f[-1], out_b[-1]], axis=-1)   # lstm_out[:, -1, :]
    return last @ params["fc_w"] + params["fc_b"]


if __name__ == "__main__":
    # Small shapes consistent with the module's forward:
    # x: (batch=2, seq=8, input_size=16), hidden_size=32, output_size=4.
    B, T, I, H, O = 2, 8, 16, 32, 4

    key = jax.random.PRNGKey(0)
    pkey, xkey = jax.random.split(key)
    params = init_params(pkey, I, H, O)
    x = jax.random.normal(xkey, (B, T, I), jnp.float32)

    ref = reference_forward(x, params)

    # Default (bf16 MXU operands, f32 accumulation/state) — looser tolerance.
    out = jax.block_until_ready(bilstm_forward(x, params))
    assert out.shape == (B, O), out.shape
    assert jnp.allclose(out, ref, atol=2e-2, rtol=2e-2), (out, ref)

    # f32 operands — bit-exact-ish check of the kernel structure itself.
    out_f32 = jax.block_until_ready(
        bilstm_forward(x, params, mxu_dtype=jnp.float32))
    assert jnp.allclose(out_f32, ref, atol=1e-4, rtol=1e-4), (out_f32, ref)

    print("KERNEL_OK")
</pallas_src>

<mosaic_0001>
module attributes {stable_mosaic.version = 11 : i64} {
  func.func @bilstm_kernel(%arg0: i32, %arg1: memref<8x8x16xbf16, #tpu.memory_space<vmem>>, %arg2: memref<16x128xbf16, #tpu.memory_space<vmem>>, %arg3: memref<32x128xbf16, #tpu.memory_space<vmem>>, %arg4: memref<1x128xf32, #tpu.memory_space<vmem>>, %arg5: memref<16x128xbf16, #tpu.memory_space<vmem>>, %arg6: memref<1x128xf32, #tpu.memory_space<vmem>>, %arg7: memref<64x128xbf16, #tpu.memory_space<vmem>>, %arg8: memref<1x128xf32, #tpu.memory_space<vmem>>, %arg9: memref<8x128xf32, #tpu.memory_space<vmem>>) attributes {dimension_semantics = [#tpu.dimension_semantics<parallel>], iteration_bounds = array<i64: 1>, scalar_prefetch = 0 : i64, scratch_operands = 0 : i64, tpu.core_type = #tpu.core_type<tc>, window_params = [{transform_indices = @transform_0, window_bounds = array<i64: 8, 8, 16>}, {pipeline_mode = #tpu.pipeline_mode<synchronous>, transform_indices = @transform_1, window_bounds = array<i64: 16, 128>}, {pipeline_mode = #tpu.pipeline_mode<synchronous>, transform_indices = @transform_2, window_bounds = array<i64: 32, 128>}, {pipeline_mode = #tpu.pipeline_mode<synchronous>, transform_indices = @transform_3, window_bounds = array<i64: 1, 128>}, {pipeline_mode = #tpu.pipeline_mode<synchronous>, transform_indices = @transform_4, window_bounds = array<i64: 16, 128>}, {pipeline_mode = #tpu.pipeline_mode<synchronous>, transform_indices = @transform_5, window_bounds = array<i64: 1, 128>}, {pipeline_mode = #tpu.pipeline_mode<synchronous>, transform_indices = @transform_6, window_bounds = array<i64: 64, 128>}, {pipeline_mode = #tpu.pipeline_mode<synchronous>, transform_indices = @transform_7, window_bounds = array<i64: 1, 128>}, {transform_indices = @transform_8, window_bounds = array<i64: 8, 128>}]} {
    %c0 = arith.constant 0 : index
    %c0_0 = arith.constant 0 : index
    %c0_1 = arith.constant 0 : index
    %0 = vector.load %arg1[%c0, %c0_0, %c0_1] : memref<8x8x16xbf16, #tpu.memory_space<vmem>>, vector<8x8x16xbf16>
    %1 = vector.shape_cast %0 : vector<8x8x16xbf16> to vector<64x16xbf16>
    %c0_2 = arith.constant 0 : index
    %c0_3 = arith.constant 0 : index
    %2 = vector.load %arg2[%c0_2, %c0_3] : memref<16x128xbf16, #tpu.memory_space<vmem>>, vector<16x128xbf16>
    %cst = arith.constant dense<0.000000e+00> : vector<64x128xf32>
    %3 = tpu.matmul %1, %2, %cst {dimension_numbers = #tpu.dot_dimension_numbers<[1], [0], [0], [1], [0, 0, 1, 1], [], []>} : vector<64x16xbf16>, vector<16x128xbf16>, vector<64x128xf32> -> vector<64x128xf32>
    %c0_4 = arith.constant 0 : index
    %c0_5 = arith.constant 0 : index
    %4 = vector.load %arg4[%c0_4, %c0_5] : memref<1x128xf32, #tpu.memory_space<vmem>>, vector<1x128xf32>
    %5 = vector.broadcast %4 : vector<1x128xf32> to vector<64x128xf32>
    %6 = arith.addf %3, %5 : vector<64x128xf32>
    %7 = vector.shape_cast %6 : vector<64x128xf32> to vector<8x8x128xf32>
    %cst_6 = arith.constant 0.000000e+00 : f32
    %8 = vector.broadcast %cst_6 : f32 to vector<8x32xf32>
    %cst_7 = arith.constant 0.000000e+00 : f32
    %9 = vector.broadcast %cst_7 : f32 to vector<8x32xf32>
    %10 = vector.extract_strided_slice %7 {offsets = [0, 0, 0], sizes = [8, 1, 128], strides = [1, 1, 1]} : vector<8x8x128xf32> to vector<8x1x128xf32>
    %11 = vector.shape_cast %10 : vector<8x1x128xf32> to vector<8x128xf32>
    %12 = arith.truncf %8 : vector<8x32xf32> to vector<8x32xbf16>
    %c0_8 = arith.constant 0 : index
    %c0_9 = arith.constant 0 : index
    %13 = vector.load %arg3[%c0_8, %c0_9] : memref<32x128xbf16, #tpu.memory_space<vmem>>, vector<32x128xbf16>
    %cst_10 = arith.constant dense<0.000000e+00> : vector<8x128xf32>
    %14 = tpu.matmul %12, %13, %cst_10 {dimension_numbers = #tpu.dot_dimension_numbers<[1], [0], [0], [1], [0, 0, 1, 1], [], []>} : vector<8x32xbf16>, vector<32x128xbf16>, vector<8x128xf32> -> vector<8x128xf32>
    %15 = arith.addf %11, %14 : vector<8x128xf32>
    %16 = arith.negf %15 : vector<8x128xf32>
    %17 = math.exp %16 : vector<8x128xf32>
    %cst_11 = arith.constant 1.000000e+00 : f32
    %18 = vector.broadcast %cst_11 : f32 to vector<8x128xf32>
    %19 = arith.addf %18, %17 : vector<8x128xf32>
    %20 = arith.divf %18, %19 : vector<8x128xf32>
    %21 = math.tanh %15 : vector<8x128xf32>
    %22 = vector.extract_strided_slice %20 {offsets = [0, 0], sizes = [8, 32], strides = [1, 1]} : vector<8x128xf32> to vector<8x32xf32>
    %23 = vector.extract_strided_slice %20 {offsets = [0, 32], sizes = [8, 32], strides = [1, 1]} : vector<8x128xf32> to vector<8x32xf32>
    %24 = vector.extract_strided_slice %21 {offsets = [0, 64], sizes = [8, 32], strides = [1, 1]} : vector<8x128xf32> to vector<8x32xf32>
    %25 = vector.extract_strided_slice %20 {offsets = [0, 96], sizes = [8, 32], strides = [1, 1]} : vector<8x128xf32> to vector<8x32xf32>
    %26 = arith.mulf %23, %9 : vector<8x32xf32>
    %27 = arith.mulf %22, %24 : vector<8x32xf32>
    %28 = arith.addf %26, %27 : vector<8x32xf32>
    %29 = math.tanh %28 : vector<8x32xf32>
    %30 = arith.mulf %25, %29 : vector<8x32xf32>
    %31 = vector.extract_strided_slice %7 {offsets = [0, 1, 0], sizes = [8, 1, 128], strides = [1, 1, 1]} : vector<8x8x128xf32> to vector<8x1x128xf32>
    %32 = vector.shape_cast %31 : vector<8x1x128xf32> to vector<8x128xf32>
    %33 = arith.truncf %30 : vector<8x32xf32> to vector<8x32xbf16>
    %c0_12 = arith.constant 0 : index
    %c0_13 = arith.constant 0 : index
    %34 = vector.load %arg3[%c0_12, %c0_13] : memref<32x128xbf16, #tpu.memory_space<vmem>>, vector<32x128xbf16>
    %cst_14 = arith.constant dense<0.000000e+00> : vector<8x128xf32>
    %35 = tpu.matmul %33, %34, %cst_14 {dimension_numbers = #tpu.dot_dimension_numbers<[1], [0], [0], [1], [0, 0, 1, 1], [], []>} : vector<8x32xbf16>, vector<32x128xbf16>, vector<8x128xf32> -> vector<8x128xf32>
    %36 = arith.addf %32, %35 : vector<8x128xf32>
    %37 = arith.negf %36 : vector<8x128xf32>
    %38 = math.exp %37 : vector<8x128xf32>
    %cst_15 = arith.constant 1.000000e+00 : f32
    %39 = vector.broadcast %cst_15 : f32 to vector<8x128xf32>
    %40 = arith.addf %39, %38 : vector<8x128xf32>
    %41 = arith.divf %39, %40 : vector<8x128xf32>
    %42 = math.tanh %36 : vector<8x128xf32>
    %43 = vector.extract_strided_slice %41 {offsets = [0, 0], sizes = [8, 32], strides = [1, 1]} : vector<8x128xf32> to vector<8x32xf32>
    %44 = vector.extract_strided_slice %41 {offsets = [0, 32], sizes = [8, 32], strides = [1, 1]} : vector<8x128xf32> to vector<8x32xf32>
    %45 = vector.extract_strided_slice %42 {offsets = [0, 64], sizes = [8, 32], strides = [1, 1]} : vector<8x128xf32> to vector<8x32xf32>
    %46 = vector.extract_strided_slice %41 {offsets = [0, 96], sizes = [8, 32], strides = [1, 1]} : vector<8x128xf32> to vector<8x32xf32>
    %47 = arith.mulf %44, %28 : vector<8x32xf32>
    %48 = arith.mulf %43, %45 : vector<8x32xf32>
    %49 = arith.addf %47, %48 : vector<8x32xf32>
    %50 = math.tanh %49 : vector<8x32xf32>
    %51 = arith.mulf %46, %50 : vector<8x32xf32>
    %52 = vector.extract_strided_slice %7 {offsets = [0, 2, 0], sizes = [8, 1, 128], strides = [1, 1, 1]} : vector<8x8x128xf32> to vector<8x1x128xf32>
    %53 = vector.shape_cast %52 : vector<8x1x128xf32> to vector<8x128xf32>
    %54 = arith.truncf %51 : vector<8x32xf32> to vector<8x32xbf16>
    %c0_16 = arith.constant 0 : index
    %c0_17 = arith.constant 0 : index
    %55 = vector.load %arg3[%c0_16, %c0_17] : memref<32x128xbf16, #tpu.memory_space<vmem>>, vector<32x128xbf16>
    %cst_18 = arith.constant dense<0.000000e+00> : vector<8x128xf32>
    %56 = tpu.matmul %54, %55, %cst_18 {dimension_numbers = #tpu.dot_dimension_numbers<[1], [0], [0], [1], [0, 0, 1, 1], [], []>} : vector<8x32xbf16>, vector<32x128xbf16>, vector<8x128xf32> -> vector<8x128xf32>
    %57 = arith.addf %53, %56 : vector<8x128xf32>
    %58 = arith.negf %57 : vector<8x128xf32>
    %59 = math.exp %58 : vector<8x128xf32>
    %cst_19 = arith.constant 1.000000e+00 : f32
    %60 = vector.broadcast %cst_19 : f32 to vector<8x128xf32>
    %61 = arith.addf %60, %59 : vector<8x128xf32>
    %62 = arith.divf %60, %61 : vector<8x128xf32>
    %63 = math.tanh %57 : vector<8x128xf32>
    %64 = vector.extract_strided_slice %62 {offsets = [0, 0], sizes = [8, 32], strides = [1, 1]} : vector<8x128xf32> to vector<8x32xf32>
    %65 = vector.extract_strided_slice %62 {offsets = [0, 32], sizes = [8, 32], strides = [1, 1]} : vector<8x128xf32> to vector<8x32xf32>
    %66 = vector.extract_strided_slice %63 {offsets = [0, 64], sizes = [8, 32], strides = [1, 1]} : vector<8x128xf32> to vector<8x32xf32>
    %67 = vector.extract_strided_slice %62 {offsets = [0, 96], sizes = [8, 32], strides = [1, 1]} : vector<8x128xf32> to vector<8x32xf32>
    %68 = arith.mulf %65, %49 : vector<8x32xf32>
    %69 = arith.mulf %64, %66 : vector<8x32xf32>
    %70 = arith.addf %68, %69 : vector<8x32xf32>
    %71 = math.tanh %70 : vector<8x32xf32>
    %72 = arith.mulf %67, %71 : vector<8x32xf32>
    %73 = vector.extract_strided_slice %7 {offsets = [0, 3, 0], sizes = [8, 1, 128], strides = [1, 1, 1]} : vector<8x8x128xf32> to vector<8x1x128xf32>
    %74 = vector.shape_cast %73 : vector<8x1x128xf32> to vector<8x128xf32>
    %75 = arith.truncf %72 : vector<8x32xf32> to vector<8x32xbf16>
    %c0_20 = arith.constant 0 : index
    %c0_21 = arith.constant 0 : index
    %76 = vector.load %arg3[%c0_20, %c0_21] : memref<32x128xbf16, #tpu.memory_space<vmem>>, vector<32x128xbf16>
    %cst_22 = arith.constant dense<0.000000e+00> : vector<8x128xf32>
    %77 = tpu.matmul %75, %76, %cst_22 {dimension_numbers = #tpu.dot_dimension_numbers<[1], [0], [0], [1], [0, 0, 1, 1], [], []>} : vector<8x32xbf16>, vector<32x128xbf16>, vector<8x128xf32> -> vector<8x128xf32>
    %78 = arith.addf %74, %77 : vector<8x128xf32>
    %79 = arith.negf %78 : vector<8x128xf32>
    %80 = math.exp %79 : vector<8x128xf32>
    %cst_23 = arith.constant 1.000000e+00 : f32
    %81 = vector.broadcast %cst_23 : f32 to vector<8x128xf32>
    %82 = arith.addf %81, %80 : vector<8x128xf32>
    %83 = arith.divf %81, %82 : vector<8x128xf32>
    %84 = math.tanh %78 : vector<8x128xf32>
    %85 = vector.extract_strided_slice %83 {offsets = [0, 0], sizes = [8, 32], strides = [1, 1]} : vector<8x128xf32> to vector<8x32xf32>
    %86 = vector.extract_strided_slice %83 {offsets = [0, 32], sizes = [8, 32], strides = [1, 1]} : vector<8x128xf32> to vector<8x32xf32>
    %87 = vector.extract_strided_slice %84 {offsets = [0, 64], sizes = [8, 32], strides = [1, 1]} : vector<8x128xf32> to vector<8x32xf32>
    %88 = vector.extract_strided_slice %83 {offsets = [0, 96], sizes = [8, 32], strides = [1, 1]} : vector<8x128xf32> to vector<8x32xf32>
    %89 = arith.mulf %86, %70 : vector<8x32xf32>
    %90 = arith.mulf %85, %87 : vector<8x32xf32>
    %91 = arith.addf %89, %90 : vector<8x32xf32>
    %92 = math.tanh %91 : vector<8x32xf32>
    %93 = arith.mulf %88, %92 : vector<8x32xf32>
    %94 = vector.extract_strided_slice %7 {offsets = [0, 4, 0], sizes = [8, 1, 128], strides = [1, 1, 1]} : vector<8x8x128xf32> to vector<8x1x128xf32>
    %95 = vector.shape_cast %94 : vector<8x1x128xf32> to vector<8x128xf32>
    %96 = arith.truncf %93 : vector<8x32xf32> to vector<8x32xbf16>
    %c0_24 = arith.constant 0 : index
    %c0_25 = arith.constant 0 : index
    %97 = vector.load %arg3[%c0_24, %c0_25] : memref<32x128xbf16, #tpu.memory_space<vmem>>, vector<32x128xbf16>
    %cst_26 = arith.constant dense<0.000000e+00> : vector<8x128xf32>
    %98 = tpu.matmul %96, %97, %cst_26 {dimension_numbers = #tpu.dot_dimension_numbers<[1], [0], [0], [1], [0, 0, 1, 1], [], []>} : vector<8x32xbf16>, vector<32x128xbf16>, vector<8x128xf32> -> vector<8x128xf32>
    %99 = arith.addf %95, %98 : vector<8x128xf32>
    %100 = arith.negf %99 : vector<8x128xf32>
    %101 = math.exp %100 : vector<8x128xf32>
    %cst_27 = arith.constant 1.000000e+00 : f32
    %102 = vector.broadcast %cst_27 : f32 to vector<8x128xf32>
    %103 = arith.addf %102, %101 : vector<8x128xf32>
    %104 = arith.divf %102, %103 : vector<8x128xf32>
    %105 = math.tanh %99 : vector<8x128xf32>
    %106 = vector.extract_strided_slice %104 {offsets = [0, 0], sizes = [8, 32], strides = [1, 1]} : vector<8x128xf32> to vector<8x32xf32>
    %107 = vector.extract_strided_slice %104 {offsets = [0, 32], sizes = [8, 32], strides = [1, 1]} : vector<8x128xf32> to vector<8x32xf32>
    %108 = vector.extract_strided_slice %105 {offsets = [0, 64], sizes = [8, 32], strides = [1, 1]} : vector<8x128xf32> to vector<8x32xf32>
    %109 = vector.extract_strided_slice %104 {offsets = [0, 96], sizes = [8, 32], strides = [1, 1]} : vector<8x128xf32> to vector<8x32xf32>
    %110 = arith.mulf %107, %91 : vector<8x32xf32>
    %111 = arith.mulf %106, %108 : vector<8x32xf32>
    %112 = arith.addf %110, %111 : vector<8x32xf32>
    %113 = math.tanh %112 : vector<8x32xf32>
    %114 = arith.mulf %109, %113 : vector<8x32xf32>
    %115 = vector.extract_strided_slice %7 {offsets = [0, 5, 0], sizes = [8, 1, 128], strides = [1, 1, 1]} : vector<8x8x128xf32> to vector<8x1x128xf32>
    %116 = vector.shape_cast %115 : vector<8x1x128xf32> to vector<8x128xf32>
    %117 = arith.truncf %114 : vector<8x32xf32> to vector<8x32xbf16>
    %c0_28 = arith.constant 0 : index
    %c0_29 = arith.constant 0 : index
    %118 = vector.load %arg3[%c0_28, %c0_29] : memref<32x128xbf16, #tpu.memory_space<vmem>>, vector<32x128xbf16>
    %cst_30 = arith.constant dense<0.000000e+00> : vector<8x128xf32>
    %119 = tpu.matmul %117, %118, %cst_30 {dimension_numbers = #tpu.dot_dimension_numbers<[1], [0], [0], [1], [0, 0, 1, 1], [], []>} : vector<8x32xbf16>, vector<32x128xbf16>, vector<8x128xf32> -> vector<8x128xf32>
    %120 = arith.addf %116, %119 : vector<8x128xf32>
    %121 = arith.negf %120 : vector<8x128xf32>
    %122 = math.exp %121 : vector<8x128xf32>
    %cst_31 = arith.constant 1.000000e+00 : f32
    %123 = vector.broadcast %cst_31 : f32 to vector<8x128xf32>
    %124 = arith.addf %123, %122 : vector<8x128xf32>
    %125 = arith.divf %123, %124 : vector<8x128xf32>
    %126 = math.tanh %120 : vector<8x128xf32>
    %127 = vector.extract_strided_slice %125 {offsets = [0, 0], sizes = [8, 32], strides = [1, 1]} : vector<8x128xf32> to vector<8x32xf32>
    %128 = vector.extract_strided_slice %125 {offsets = [0, 32], sizes = [8, 32], strides = [1, 1]} : vector<8x128xf32> to vector<8x32xf32>
    %129 = vector.extract_strided_slice %126 {offsets = [0, 64], sizes = [8, 32], strides = [1, 1]} : vector<8x128xf32> to vector<8x32xf32>
    %130 = vector.extract_strided_slice %125 {offsets = [0, 96], sizes = [8, 32], strides = [1, 1]} : vector<8x128xf32> to vector<8x32xf32>
    %131 = arith.mulf %128, %112 : vector<8x32xf32>
    %132 = arith.mulf %127, %129 : vector<8x32xf32>
    %133 = arith.addf %131, %132 : vector<8x32xf32>
    %134 = math.tanh %133 : vector<8x32xf32>
    %135 = arith.mulf %130, %134 : vector<8x32xf32>
    %136 = vector.extract_strided_slice %7 {offsets = [0, 6, 0], sizes = [8, 1, 128], strides = [1, 1, 1]} : vector<8x8x128xf32> to vector<8x1x128xf32>
    %137 = vector.shape_cast %136 : vector<8x1x128xf32> to vector<8x128xf32>
    %138 = arith.truncf %135 : vector<8x32xf32> to vector<8x32xbf16>
    %c0_32 = arith.constant 0 : index
    %c0_33 = arith.constant 0 : index
    %139 = vector.load %arg3[%c0_32, %c0_33] : memref<32x128xbf16, #tpu.memory_space<vmem>>, vector<32x128xbf16>
    %cst_34 = arith.constant dense<0.000000e+00> : vector<8x128xf32>
    %140 = tpu.matmul %138, %139, %cst_34 {dimension_numbers = #tpu.dot_dimension_numbers<[1], [0], [0], [1], [0, 0, 1, 1], [], []>} : vector<8x32xbf16>, vector<32x128xbf16>, vector<8x128xf32> -> vector<8x128xf32>
    %141 = arith.addf %137, %140 : vector<8x128xf32>
    %142 = arith.negf %141 : vector<8x128xf32>
    %143 = math.exp %142 : vector<8x128xf32>
    %cst_35 = arith.constant 1.000000e+00 : f32
    %144 = vector.broadcast %cst_35 : f32 to vector<8x128xf32>
    %145 = arith.addf %144, %143 : vector<8x128xf32>
    %146 = arith.divf %144, %145 : vector<8x128xf32>
    %147 = math.tanh %141 : vector<8x128xf32>
    %148 = vector.extract_strided_slice %146 {offsets = [0, 0], sizes = [8, 32], strides = [1, 1]} : vector<8x128xf32> to vector<8x32xf32>
    %149 = vector.extract_strided_slice %146 {offsets = [0, 32], sizes = [8, 32], strides = [1, 1]} : vector<8x128xf32> to vector<8x32xf32>
    %150 = vector.extract_strided_slice %147 {offsets = [0, 64], sizes = [8, 32], strides = [1, 1]} : vector<8x128xf32> to vector<8x32xf32>
    %151 = vector.extract_strided_slice %146 {offsets = [0, 96], sizes = [8, 32], strides = [1, 1]} : vector<8x128xf32> to vector<8x32xf32>
    %152 = arith.mulf %149, %133 : vector<8x32xf32>
    %153 = arith.mulf %148, %150 : vector<8x32xf32>
    %154 = arith.addf %152, %153 : vector<8x32xf32>
    %155 = math.tanh %154 : vector<8x32xf32>
    %156 = arith.mulf %151, %155 : vector<8x32xf32>
    %157 = vector.extract_strided_slice %7 {offsets = [0, 7, 0], sizes = [8, 1, 128], strides = [1, 1, 1]} : vector<8x8x128xf32> to vector<8x1x128xf32>
    %158 = vector.shape_cast %157 : vector<8x1x128xf32> to vector<8x128xf32>
    %159 = arith.truncf %156 : vector<8x32xf32> to vector<8x32xbf16>
    %c0_36 = arith.constant 0 : index
    %c0_37 = arith.constant 0 : index
    %160 = vector.load %arg3[%c0_36, %c0_37] : memref<32x128xbf16, #tpu.memory_space<vmem>>, vector<32x128xbf16>
    %cst_38 = arith.constant dense<0.000000e+00> : vector<8x128xf32>
    %161 = tpu.matmul %159, %160, %cst_38 {dimension_numbers = #tpu.dot_dimension_numbers<[1], [0], [0], [1], [0, 0, 1, 1], [], []>} : vector<8x32xbf16>, vector<32x128xbf16>, vector<8x128xf32> -> vector<8x128xf32>
    %162 = arith.addf %158, %161 : vector<8x128xf32>
    %163 = arith.negf %162 : vector<8x128xf32>
    %164 = math.exp %163 : vector<8x128xf32>
    %cst_39 = arith.constant 1.000000e+00 : f32
    %165 = vector.broadcast %cst_39 : f32 to vector<8x128xf32>
    %166 = arith.addf %165, %164 : vector<8x128xf32>
    %167 = arith.divf %165, %166 : vector<8x128xf32>
    %168 = math.tanh %162 : vector<8x128xf32>
    %169 = vector.extract_strided_slice %167 {offsets = [0, 0], sizes = [8, 32], strides = [1, 1]} : vector<8x128xf32> to vector<8x32xf32>
    %170 = vector.extract_strided_slice %167 {offsets = [0, 32], sizes = [8, 32], strides = [1, 1]} : vector<8x128xf32> to vector<8x32xf32>
    %171 = vector.extract_strided_slice %168 {offsets = [0, 64], sizes = [8, 32], strides = [1, 1]} : vector<8x128xf32> to vector<8x32xf32>
    %172 = vector.extract_strided_slice %167 {offsets = [0, 96], sizes = [8, 32], strides = [1, 1]} : vector<8x128xf32> to vector<8x32xf32>
    %173 = arith.mulf %170, %154 : vector<8x32xf32>
    %174 = arith.mulf %169, %171 : vector<8x32xf32>
    %175 = arith.addf %173, %174 : vector<8x32xf32>
    %176 = math.tanh %175 : vector<8x32xf32>
    %177 = arith.mulf %172, %176 : vector<8x32xf32>
    %c0_40 = arith.constant 0 : index
    %c7 = arith.constant 7 : index
    %c0_41 = arith.constant 0 : index
    %178 = vector.load %arg1[%c0_40, %c7, %c0_41] : memref<8x8x16xbf16, #tpu.memory_space<vmem>>, vector<8x1x16xbf16>
    %179 = vector.shape_cast %178 : vector<8x1x16xbf16> to vector<8x16xbf16>
    %c0_42 = arith.constant 0 : index
    %c0_43 = arith.constant 0 : index
    %180 = vector.load %arg5[%c0_42, %c0_43] : memref<16x128xbf16, #tpu.memory_space<vmem>>, vector<16x128xbf16>
    %cst_44 = arith.constant dense<0.000000e+00> : vector<8x128xf32>
    %181 = tpu.matmul %179, %180, %cst_44 {dimension_numbers = #tpu.dot_dimension_numbers<[1], [0], [0], [1], [0, 0, 1, 1], [], []>} : vector<8x16xbf16>, vector<16x128xbf16>, vector<8x128xf32> -> vector<8x128xf32>
    %c0_45 = arith.constant 0 : index
    %c0_46 = arith.constant 0 : index
    %182 = vector.load %arg6[%c0_45, %c0_46] : memref<1x128xf32, #tpu.memory_space<vmem>>, vector<1x128xf32>
    %183 = vector.broadcast %182 : vector<1x128xf32> to vector<8x128xf32>
    %184 = arith.addf %181, %183 : vector<8x128xf32>
    %cst_47 = arith.constant 0.000000e+00 : f32
    %185 = vector.broadcast %cst_47 : f32 to vector<8x32xf32>
    %186 = arith.negf %184 : vector<8x128xf32>
    %187 = math.exp %186 : vector<8x128xf32>
    %cst_48 = arith.constant 1.000000e+00 : f32
    %188 = vector.broadcast %cst_48 : f32 to vector<8x128xf32>
    %189 = arith.addf %188, %187 : vector<8x128xf32>
    %190 = arith.divf %188, %189 : vector<8x128xf32>
    %191 = math.tanh %184 : vector<8x128xf32>
    %192 = vector.extract_strided_slice %190 {offsets = [0, 0], sizes = [8, 32], strides = [1, 1]} : vector<8x128xf32> to vector<8x32xf32>
    %193 = vector.extract_strided_slice %190 {offsets = [0, 32], sizes = [8, 32], strides = [1, 1]} : vector<8x128xf32> to vector<8x32xf32>
    %194 = vector.extract_strided_slice %191 {offsets = [0, 64], sizes = [8, 32], strides = [1, 1]} : vector<8x128xf32> to vector<8x32xf32>
    %195 = vector.extract_strided_slice %190 {offsets = [0, 96], sizes = [8, 32], strides = [1, 1]} : vector<8x128xf32> to vector<8x32xf32>
    %196 = arith.mulf %193, %185 : vector<8x32xf32>
    %197 = arith.mulf %192, %194 : vector<8x32xf32>
    %198 = arith.addf %196, %197 : vector<8x32xf32>
    %199 = math.tanh %198 : vector<8x32xf32>
    %200 = arith.mulf %195, %199 : vector<8x32xf32>
    %201 = arith.truncf %177 : vector<8x32xf32> to vector<8x32xbf16>
    %c0_49 = arith.constant 0 : index
    %c0_50 = arith.constant 0 : index
    %202 = vector.load %arg7[%c0_49, %c0_50] : memref<64x128xbf16, #tpu.memory_space<vmem>>, vector<32x128xbf16>
    %cst_51 = arith.constant dense<0.000000e+00> : vector<8x128xf32>
    %203 = tpu.matmul %201, %202, %cst_51 {dimension_numbers = #tpu.dot_dimension_numbers<[1], [0], [0], [1], [0, 0, 1, 1], [], []>} : vector<8x32xbf16>, vector<32x128xbf16>, vector<8x128xf32> -> vector<8x128xf32>
    %204 = arith.truncf %200 : vector<8x32xf32> to vector<8x32xbf16>
    %c32 = arith.constant 32 : index
    %c0_52 = arith.constant 0 : index
    %205 = vector.load %arg7[%c32, %c0_52] : memref<64x128xbf16, #tpu.memory_space<vmem>>, vector<32x128xbf16>
    %cst_53 = arith.constant dense<0.000000e+00> : vector<8x128xf32>
    %206 = tpu.matmul %204, %205, %cst_53 {dimension_numbers = #tpu.dot_dimension_numbers<[1], [0], [0], [1], [0, 0, 1, 1], [], []>} : vector<8x32xbf16>, vector<32x128xbf16>, vector<8x128xf32> -> vector<8x128xf32>
    %207 = arith.addf %203, %206 : vector<8x128xf32>
    %c0_54 = arith.constant 0 : index
    %c0_55 = arith.constant 0 : index
    %208 = vector.load %arg8[%c0_54, %c0_55] : memref<1x128xf32, #tpu.memory_space<vmem>>, vector<1x128xf32>
    %209 = vector.broadcast %208 : vector<1x128xf32> to vector<8x128xf32>
    %210 = arith.addf %207, %209 : vector<8x128xf32>
    %c0_56 = arith.constant 0 : index
    %c0_57 = arith.constant 0 : index
    %211 = vector.load %arg9[%c0_56, %c0_57] : memref<8x128xf32, #tpu.memory_space<vmem>>, vector<8x128xf32>
    tpu.vector_store %arg9[%c0_56, %c0_57], %210 {strides = array<i32>} : memref<8x128xf32, #tpu.memory_space<vmem>>, vector<8x128xf32>,
    return
  }
  func.func @transform_0(%arg0: i32) -> (i32, i32, i32) {
    %c0_i32 = arith.constant 0 : i32
    %c0_i32_0 = arith.constant 0 : i32
    %c0_i32_1 = arith.constant 0 : i32
    return %arg0, %c0_i32, %c0_i32_0 : i32, i32, i32
  }
  func.func @transform_1(%arg0: i32) -> (i32, i32) {
    %c0_i32 = arith.constant 0 : i32
    %c0_i32_0 = arith.constant 0 : i32
    %c0_i32_1 = arith.constant 0 : i32
    return %c0_i32, %c0_i32_0 : i32, i32
  }
  func.func @transform_2(%arg0: i32) -> (i32, i32) {
    %c0_i32 = arith.constant 0 : i32
    %c0_i32_0 = arith.constant 0 : i32
    %c0_i32_1 = arith.constant 0 : i32
    return %c0_i32, %c0_i32_0 : i32, i32
  }
  func.func @transform_3(%arg0: i32) -> (i32, i32) {
    %c0_i32 = arith.constant 0 : i32
    %c0_i32_0 = arith.constant 0 : i32
    %c0_i32_1 = arith.constant 0 : i32
    return %c0_i32, %c0_i32_0 : i32, i32
  }
  func.func @transform_4(%arg0: i32) -> (i32, i32) {
    %c0_i32 = arith.constant 0 : i32
    %c0_i32_0 = arith.constant 0 : i32
    %c0_i32_1 = arith.constant 0 : i32
    return %c0_i32, %c0_i32_0 : i32, i32
  }
  func.func @transform_5(%arg0: i32) -> (i32, i32) {
    %c0_i32 = arith.constant 0 : i32
    %c0_i32_0 = arith.constant 0 : i32
    %c0_i32_1 = arith.constant 0 : i32
    return %c0_i32, %c0_i32_0 : i32, i32
  }
  func.func @transform_6(%arg0: i32) -> (i32, i32) {
    %c0_i32 = arith.constant 0 : i32
    %c0_i32_0 = arith.constant 0 : i32
    %c0_i32_1 = arith.constant 0 : i32
    return %c0_i32, %c0_i32_0 : i32, i32
  }
  func.func @transform_7(%arg0: i32) -> (i32, i32) {
    %c0_i32 = arith.constant 0 : i32
    %c0_i32_0 = arith.constant 0 : i32
    %c0_i32_1 = arith.constant 0 : i32
    return %c0_i32, %c0_i32_0 : i32, i32
  }
  func.func @transform_8(%arg0: i32) -> (i32, i32) {
    %c0_i32 = arith.constant 0 : i32
    %c0_i32_0 = arith.constant 0 : i32
    return %arg0, %c0_i32 : i32, i32
  }
}

</mosaic_0001>

<bundles_post_ra>
// kernel: tpu_custom_call.1
= control target key start
LH: loop header
LB: loop body
LE: loop exit
PB: predicated region body
PF: predicated region fallthrough
CT: control target
= control target key end

     0   :  { %13 = vsyncpa [#allocation3], 0  ;;  %s5090_s0 = inlined_call_operand.hbm [shape: bf16[8,8,16], index: 0, kind: input, shape index: {}]   ;;  %s5091_s1 = inlined_call_operand.hbm [shape: bf16[16,128], index: 1, kind: input, shape index: {}]   ;;  %s5092_s2 = inlined_call_operand.hbm [shape: bf16[32,128], index: 2, kind: input, shape index: {}]   ;;  %s5093_s3 = inlined_call_operand.vmem [shape: f32[1,128], index: 3, kind: input, shape index: {}]   ;;  %s5094_s4 = inlined_call_operand.hbm [shape: bf16[16,128], index: 4, kind: input, shape index: {}]   ;;  %s5095_s5 = inlined_call_operand.vmem [shape: f32[1,128], index: 5, kind: input, shape index: {}]   ;;  %s5096_s6 = inlined_call_operand.hbm [shape: bf16[64,128], index: 6, kind: input, shape index: {}]   ;;  %s5097_s7 = inlined_call_operand.vmem [shape: f32[1,128], index: 7, kind: input, shape index: {}]   ;;  %s5098_s8 = inlined_call_operand.hbm [shape: f32[8,128], index: 8, kind: output, shape index: {}]  }
   0x1   :  { %14 = vsyncpa [#allocation6], 0 }
   0x2   :  { %15 = vsyncpa [#allocation9], 0 }
   0x3   :  { %16 = vsyncpa [#allocation4], 0  ;;  %s4015_s27 = smov [#allocation5]   ;;  %s4016_s29 = smov [#allocation8]  }
   0x4   :  { %s34_s28 = sshll.u32 %s4015_s27, 4  ;;  %s60_s30 = sshll.u32 %s4016_s29, 4  ;;  %s35_s28 = int_to_ptr.vmem [resolvable:$true] %s34_s28  ;;  %s61_s30 = int_to_ptr.vmem [resolvable:$true] %s60_s30 }
   0x5   :  { %s3895_s9 = scalar_lea.vmem %s35_s28, 128  ;;  %p3900_p1 = scmp.lt.s32.totalorder %s35_s28, %s35_s28 }
   0x6   :  { %p3896_p0 = scmp.ne.s32.totalorder %s35_s28, %s3895_s9  ;;  %p3901_p2 = scmp.lt.s32.totalorder %s3895_s9, %s3895_s9 }
   0x8   :  { %p3902_p3 = por %p3901_p2, %p3900_p1 }
   0xa   :  { %p3903_p4 = pnand %p3902_p3, %p3896_p0 }
   0xc   :  { %3906 = shalt.err (!%p3903_p4)
}
   0xd   :  { %s4017_s10 = smov 64   ;;  %s4018_s11 = smov 4  }
   0xe   :  { %40 = dma.hbm_to_vmem [thread:$0]  %s5091_s1, 128, %s35_s28, [#allocation6], %s4017_s10, %s4017_s10, %s4018_s11  }
   0xf   :  { %s3915_s14 = scalar_lea.vmem %s61_s30, 128  ;;  %p3920_p6 = scmp.lt.s32.totalorder %s61_s30, %s61_s30 }
  0x10   :  { %p3916_p5 = scmp.ne.s32.totalorder %s61_s30, %s3915_s14  ;;  %p3921_p7 = scmp.lt.s32.totalorder %s3915_s14, %s3915_s14 }
  0x12   :  { %p3922_p8 = por %p3921_p7, %p3920_p6 }
  0x14   :  { %p3923_p9 = pnand %p3922_p8, %p3916_p5 }
  0x16   :  { %3926 = shalt.err (!%p3923_p9)
}
  0x17   :  { %66 = dma.hbm_to_vmem [thread:$0]  %s5094_s4, 128, %s61_s30, [#allocation9], %s4017_s10, %s4017_s10, %s4018_s11  }
  0x18   :  { %s4019_s17 = smov [#allocation2]   ;;  %s4020_s19 = smov [#allocation7]  }
  0x19   :  { %s22_s18 = sshll.u32 %s4019_s17, 4  ;;  %s46_s20 = sshll.u32 %s4020_s19, 4  ;;  %s23_s18 = int_to_ptr.vmem [resolvable:$true] %s22_s18  ;;  %s47_s20 = int_to_ptr.vmem [resolvable:$true] %s46_s20 }
  0x1a   :  { %s3935_s1 = scalar_lea.vmem %s23_s18, 512  ;;  %p3940_p11 = scmp.lt.s32.totalorder %s23_s18, %s23_s18 }
  0x1b   :  { %p3936_p10 = scmp.ne.s32.totalorder %s23_s18, %s3935_s1  ;;  %p3941_p12 = scmp.lt.s32.totalorder %s3935_s1, %s3935_s1 }
  0x1d   :  { %p3942_p13 = por %p3941_p12, %p3940_p11 }
  0x1f   :  { %p3943_p0 = pnand %p3942_p13, %p3936_p10 }
  0x21   :  { %3946 = shalt.err (!%p3943_p0)
}
  0x22   :  { %28 = dma.hbm_to_vmem [thread:$0]  %s5090_s0, 512, %s23_s18, [#allocation3], %s4017_s10, %s4017_s10, %s4018_s11  }
  0x23   :  { %s3955_s4 = scalar_lea.vmem %s47_s20, 256  ;;  %p3960_p2 = scmp.lt.s32.totalorder %s47_s20, %s47_s20 }
  0x24   :  { %p3956_p1 = scmp.ne.s32.totalorder %s47_s20, %s3955_s4  ;;  %p3961_p3 = scmp.lt.s32.totalorder %s3955_s4, %s3955_s4 }
  0x26   :  { %p3962_p4 = por %p3961_p3, %p3960_p2 }
  0x28   :  { %p3963_p5 = pnand %p3962_p4, %p3956_p1 }
  0x2a   :  { %3966 = shalt.err (!%p3963_p5)
}
  0x2b   :  { %52 = dma.hbm_to_vmem [thread:$0]  %s5092_s2, 256, %s47_s20, [#allocation6], %s4017_s10, %s4017_s10, %s4018_s11  }
  0x2c   :  { %s4021_s25 = smov [#allocation10]  }
  0x2d   :  { %s74_s26 = sshll.u32 %s4021_s25, 4  ;;  %s75_s26 = int_to_ptr.vmem [resolvable:$true] %s74_s26 }
  0x2e   :  { %s3975_s27 = scalar_lea.vmem %s75_s26, 512  ;;  %p3980_p7 = scmp.lt.s32.totalorder %s75_s26, %s75_s26 }
  0x2f   :  { %p3976_p6 = scmp.ne.s32.totalorder %s75_s26, %s3975_s27  ;;  %p3981_p8 = scmp.lt.s32.totalorder %s3975_s27, %s3975_s27 }
  0x31   :  { %p3982_p9 = por %p3981_p8, %p3980_p7 }
  0x33   :  { %p3983_p10 = pnand %p3982_p9, %p3976_p6 }
  0x35   :  { %3986 = shalt.err (!%p3983_p10)
}
  0x36   :  { %80 = dma.hbm_to_vmem [thread:$0]  %s5096_s6, 512, %s75_s26, [#allocation9], %s4017_s10, %s4017_s10, %s4018_s11  }
  0x37   :  { %4007 = dma.done.wait [#allocation3], 512  }
  0x38   :  { %4008 = vsyncadd [#allocation3], 4294966784 }
  0x39   :  { %4009 = dma.done.wait [#allocation6], 384  }
  0x3a   :  { %4010 = vsyncadd [#allocation6], 4294966912 }
  0x3b   :  { %4011 = dma.done.wait [#allocation9], 640  }
  0x3c   :  { %4012 = vsyncadd [#allocation9], 4294966656  ;;  %v4022_v0 = vmov 0.0   ;;  %vm4023_vm0 = vmmov 0   ;;  %v3344_v1 = vld [vmem:[#allocation5] sm:$0xff]   ;;  %v4105_v2 = vld [vmem:[#allocation7 + $0x8] sm:$0xff]  }
  0x3d   :  { %3246 = vmatprep.subr.bf16.mxu1 %v4022_v0  ;;  %3250 = vmatprep.mubr.msk.bf16.mxu1 %vm4023_vm0, %v4022_v0  ;;  %vm142_vm1 = vcmask 130048   ;;  %v3346_v3 = vld [vmem:[#allocation2] sm:$0xff]   ;;  %v3347_v4 = vld [vmem:[#allocation2 + $0x8] sm:$0xff]   ;;  %v3349_v6 = vld [vmem:[#allocation2 + $0x10] sm:$0xff]   ;;  %v4024_v8 = vmov 0   ;;  %vm521_vm2 = vcmask 1041409  }
  0x3e   :  { %3236 = vmatprep.subr.bf16.mxu0 %v3344_v1  ;;  %3247 = vmatpush3.bf16.msra.mxu1 %v4105_v2  ;;  %v4110_v5 = vld [vmem:[#allocation7] sm:$0xff]   ;;  %v3350_v7 = vld [vmem:[#allocation2 + $0x18] sm:$0xff]   ;;  %v3097_v10 = vld [vmem:[%s5093_s3] ss:$0 sm:$0xff]  ;;  %s4025_s3 = smov 32   ;;  %vm524_vm3 = vcmask 1042434  }
  0x3f   :  { %3237 = vmatpush3.bf16.msra.mxu0 %v3344_v1  ;;  %3238 = vmatprep.mubr.msk.bf16.mxu0 %vm142_vm1, %v3346_v3  ;;  %vm527_vm4 = vcmask 1043459   ;;  %vm530_vm5 = vcmask 1044484   ;;  %vm533_vm6 = vcmask 1045509   ;;  %vm536_vm7 = vcmask 1046534  }
  0x40   :  { %3248 = vmatprep.subr.bf16.mxu1 %v4022_v0  ;;  %3262 = vmatprep.subr.bf16.mxu0 %v4022_v0  ;;  %vm539_vm8 = vcmask 1047559   ;;  %vm236_vm9 = vcmask 261120  }
  0x42   :  { %3239 = vmatmul.mubr.msk.bf16.vlgmr.msra.gmra.mxu0 %vm142_vm1, %v3347_v4  ;;  %3249 = vmatpush3.bf16.msra.mxu1 %v4110_v5 }
  0x43   :  { %3242 = vmatprep.mubr.msk.bf16.mxu0 %vm142_vm1, %v3349_v6  ;;  %3254 = vmatprep.subr.bf16.mxu1 %v4022_v0 }
  0x44   :  { %3263 = vmatpush3.bf16.msra.mxu0 %v4105_v2 }
  0x45   :  { %3264 = vmatprep.subr.bf16.mxu0 %v4022_v0  ;;  %3251 = vmatmul.mubr.bf16.vlgmr.msra.gmra.mxu1 %v4024_v8 }
  0x46   :  { %3255 = vmatpush3.bf16.msra.mxu1 %v4105_v2  ;;  %3258 = vmatprep.mubr.msk.bf16.mxu1 %vm4023_vm0, %v4022_v0 }
  0x47   :  { %3256 = vmatprep.subr.bf16.mxu1 %v4022_v0 }
  0x48   :  { %3265 = vmatpush3.bf16.msra.mxu0 %v4110_v5 }
  0x49   :  { %3278 = vmatprep.subr.bf16.mxu0 %v4022_v0 }
  0x4a   :  { %3243 = vmatmul.mubr.msk.bf16.gmra.mxu0 %vm142_vm1, %v3350_v7  ;;  %3257 = vmatpush3.bf16.msra.mxu1 %v4110_v5 }
  0x4b   :  { %3266 = vmatprep.mubr.msk.bf16.mxu0 %vm4023_vm0, %v4022_v0  ;;  %3270 = vmatprep.subr.bf16.mxu1 %v4022_v0 }
 0x102   :  { %v3240_v9 = vpop.f32.mrf.mxu0 }
 0x103   :  { %v4135_v13 = vadd.f32 %v3240_v9, %v3097_v10 }
 0x104   :  { %v189_v11 = vpop.f32.mrf.mxu0 }
 0x105   :  { %v4133_v12 = vadd.f32 %v3097_v10, %v189_v11  ;;  %v274_v14 = vpop.f32.mrf.mxu1 }
 0x106   :  { %v3241_v15 = vpop.f32.mrf.mxu0  ;;  %v282_v18 = vrot.slane %v274_v14, 2  ;;  %v283_v19 = vrot.slane %v274_v14, 3  ;;  %v281_v22 = vrot.slane %v274_v14, 1  ;;  %v284_v32 = vrot.slane %v274_v14, 4 }
 0x107   :  { %v4137_v16 = vadd.f32 %v3241_v15, %v3097_v10  ;;  %v296_v17 = vadd.f32 %v274_v14, %v4133_v12  ;;  %v3252_v20 = vpop.f32.mrf.mxu1  ;;  %v285_v39 = vrot.slane %v274_v14, 5  ;;  %v286_v40 = vrot.slane %v274_v14, 6 }
 0x108   :  { %v192_v21 = vpop.f32.mrf.mxu0  ;;  %v298_v24 = vadd.f32 %v282_v18, %v4135_v13  ;;  %v287_v42 = vrot.slane %v274_v14, 7 }
 0x109   :  { %v4140_v23 = vadd.f32 %v3097_v10, %v192_v21  ;;  %3364 = vtanh.f32 %v296_v17  ;;  %v277_v25 = vpop.f32.mrf.mxu1  ;;  %v299_v27 = vadd.f32 %v283_v19, %v4137_v16  ;;  %v3109_v53 = vmul.f32 -1.442695, %v296_v17 }
 0x10a   :  { %v3244_v26 = vpop.f32.mrf.mxu0  ;;  %3366 = vtanh.f32 %v298_v24  ;;  %v3111_v54 = vmul.f32 -1.442695, %v298_v24 }
 0x10b   :  { %v3253_v28 = vpop.f32.mrf.mxu1  ;;  %v297_v30 = vadd.f32 %v281_v22, %v4140_v23  ;;  %3368 = vtanh.f32 %v299_v27  ;;  %v4148_v35 = vadd.f32 %v3244_v26, %v3097_v10  ;;  %v3112_v55 = vmul.f32 -1.442695, %v299_v27 }
 0x10c   :  { %v205_v29 = vpop.f32.mrf.mxu0 }
 0x10d   :  { %v4145_v31 = vadd.f32 %v3097_v10, %v205_v29  ;;  %3370 = vtanh.f32 %v297_v30  ;;  %v302_v43 = vadd.f32 %v286_v40, %v4148_v35  ;;  %v3110_v56 = vmul.f32 -1.442695, %v297_v30 }
 0x10e   :  { %v3245_v33 = vpop.f32.mrf.mxu0 }
 0x10f   :  { %v300_v34 = vadd.f32 %v284_v32, %v4145_v31  ;;  %v4150_v37 = vadd.f32 %v3245_v33, %v3097_v10  ;;  %v3115_v59 = vmul.f32 -1.442695, %v302_v43 }
 0x110   :  { %v208_v36 = vpop.f32.mrf.mxu0 }
 0x111   :  { %v4152_v38 = vadd.f32 %v3097_v10, %v208_v36  ;;  %3372 = vtanh.f32 %v300_v34  ;;  %v303_v44 = vadd.f32 %v287_v42, %v4150_v37  ;;  %v3113_v57 = vmul.f32 -1.442695, %v300_v34 }
 0x113   :  { %v301_v41 = vadd.f32 %v285_v39, %v4152_v38  ;;  %v3116_v60 = vmul.f32 -1.442695, %v303_v44 }
 0x115   :  { %3374 = vtanh.f32 %v301_v41  ;;  %v3114_v58 = vmul.f32 -1.442695, %v301_v41 }
 0x116   :  { %v3365_v45 = vpop.eup %3364  ;;  %3376 = vtanh.f32 %v302_v43 }
 0x117   :  { %376 = vrot.lane.b32.xlu1 %v3365_v45, %s4017_s10  ;;  %v3367_v46 = vpop.eup %3366  ;;  %3378 = vtanh.f32 %v303_v44 }
 0x118   :  { %380 = vrot.lane.b32.xlu0 %v3367_v46, %s4017_s10  ;;  %v3369_v47 = vpop.eup %3368  ;;  %3380 = vpow2.f32 %v3109_v53 }
 0x119   :  { %3382 = vpow2.f32 %v3111_v54 }
 0x11a   :  { %v3371_v48 = vpop.eup %3370  ;;  %3384 = vpow2.f32 %v3112_v55 }
 0x11b   :  { %382 = vrot.lane.b32.xlu1 %v3369_v47, %s4017_s10  ;;  %3386 = vpow2.f32 %v3110_v56 }
 0x11c   :  { %378 = vrot.lane.b32.xlu0 %v3371_v48, %s4017_s10  ;;  %3388 = vpow2.f32 %v3113_v57 }
 0x11d   :  { %3390 = vpow2.f32 %v3114_v58 }
 0x11e   :  { %v3373_v49 = vpop.eup %3372  ;;  %3392 = vpow2.f32 %v3115_v59 }
 0x11f   :  { %3394 = vpow2.f32 %v3116_v60 }
 0x120   :  { %384 = vrot.lane.b32.xlu0 %v3373_v49, %s4017_s10 }
 0x122   :  { %v3375_v50 = vpop.eup %3374 }
 0x123   :  { %386 = vrot.lane.b32.xlu1 %v3375_v50, %s4017_s10  ;;  %v3377_v51 = vpop.eup %3376 }
 0x124   :  { %v3379_v52 = vpop.eup %3378  ;;  %388 = vrot.lane.b32.xlu0 %v3377_v51, %s4017_s10 }
 0x125   :  { %v3381_v61 = vpop.eup %3380 }
 0x126   :  { %v3383_v62 = vpop.eup %3382  ;;  %v328_v63 = vadd.f32 1.0, %v3381_v61 }
 0x127   :  { %390 = vrot.lane.b32.xlu1 %v3379_v52, %s4017_s10  ;;  %v3385_v1 = vpop.eup %3384  ;;  %v330_v3 = vadd.f32 1.0, %v3383_v62 }
 0x128   :  { %v3387_v4 = vpop.eup %3386  ;;  %3396 = vrcp.f32 %v328_v63  ;;  %v331_v6 = vadd.f32 1.0, %v3385_v1 }
 0x129   :  { %3398 = vrcp.f32 %v330_v3  ;;  %v329_v7 = vadd.f32 1.0, %v3387_v4  ;;  %v3389_v8 = vpop.eup %3388 }
 0x12a   :  { %v3391_v9 = vpop.eup %3390  ;;  %3400 = vrcp.f32 %v331_v6  ;;  %v332_v10 = vadd.f32 1.0, %v3389_v8 }
 0x12b   :  { %3402 = vrcp.f32 %v329_v7  ;;  %v3393_v11 = vpop.eup %3392  ;;  %v333_v14 = vadd.f32 1.0, %v3391_v9 }
 0x12c   :  { %v3395_v15 = vpop.eup %3394  ;;  %3404 = vrcp.f32 %v332_v10  ;;  %v334_v17 = vadd.f32 1.0, %v3393_v11 }
 0x12d   :  { %3406 = vrcp.f32 %v333_v14  ;;  %v335_v18 = vadd.f32 1.0, %v3395_v15 }
 0x12e   :  { %3408 = vrcp.f32 %v334_v17 }
 0x12f   :  { %3410 = vrcp.f32 %v335_v18 }
 0x135   :  { %v4165_v19 = vpop.eup %3396 }
 0x136   :  { %v4168_v22 = vpop.eup %3398  ;;  %v360_v48 = vmul.f32 0.0, %v4165_v19 }
 0x137   :  { %v4172_v26 = vpop.eup %3400  ;;  %v362_v51 = vmul.f32 0.0, %v4168_v22 }
 0x138   :  { %v4175_v28 = vpop.eup %3402  ;;  %v363_v54 = vmul.f32 0.0, %v4172_v26 }
 0x139   :  { %v4181_v33 = vpop.eup %3404  ;;  %v361_v55 = vmul.f32 0.0, %v4175_v28 }
 0x13a   :  { %v4183_v36 = vpop.eup %3406  ;;  %v364_v60 = vmul.f32 0.0, %v4181_v33 }
 0x13b   :  { %v4188_v42 = vpop.eup %3408  ;;  %v365_v62 = vmul.f32 0.0, %v4183_v36 }
 0x13c   :  { %v4191_v44 = vpop.eup %3410  ;;  %v366_v4 = vmul.f32 0.0, %v4188_v42 }
 0x13d   :  { %v367_v7 = vmul.f32 0.0, %v4191_v44 }
 0x189   :  { %v377_v20 = vpop.permute.xlu1 %376 }
 0x18a   :  { %v400_v21 = vmul.f32 %v4165_v19, %v377_v20  ;;  %v381_v24 = vpop.permute.xlu0 %380 }
 0x18b   :  { %v402_v25 = vmul.f32 %v4168_v22, %v381_v24 }
 0x18c   :  { %416 = vrot.lane.b32.xlu0 %v400_v21, %s4025_s3 }
 0x18d   :  { %420 = vrot.lane.b32.xlu1 %v402_v25, %s4025_s3  ;;  %v383_v27 = vpop.permute.xlu1 %382 }
 0x18e   :  { %v403_v29 = vmul.f32 %v4172_v26, %v383_v27  ;;  %v379_v30 = vpop.permute.xlu0 %378 }
 0x18f   :  { %v401_v32 = vmul.f32 %v4175_v28, %v379_v30 }
 0x191   :  { %422 = vrot.lane.b32.xlu1 %v403_v29, %s4025_s3  ;;  %418 = vrot.lane.b32.xlu0 %v401_v32, %s4025_s3 }
 0x192   :  { %v385_v34 = vpop.permute.xlu0 %384 }
 0x193   :  { %v404_v39 = vmul.f32 %v4181_v33, %v385_v34 }
 0x195   :  { %v387_v40 = vpop.permute.xlu1 %386  ;;  %424 = vrot.lane.b32.xlu0 %v404_v39, %s4025_s3 }
 0x196   :  { %v405_v41 = vmul.f32 %v4183_v36, %v387_v40  ;;  %v389_v43 = vpop.permute.xlu0 %388 }
 0x197   :  { %v406_v45 = vmul.f32 %v4188_v42, %v389_v43 }
 0x198   :  { %426 = vrot.lane.b32.xlu1 %v405_v41, %s4025_s3 }
 0x199   :  { %v391_v46 = vpop.permute.xlu1 %390  ;;  %428 = vrot.lane.b32.xlu0 %v406_v45, %s4025_s3 }
 0x19a   :  { %v407_v47 = vmul.f32 %v4191_v44, %v391_v46 }
 0x19c   :  { %430 = vrot.lane.b32.xlu1 %v407_v47, %s4025_s3 }
 0x1fe   :  { %v417_v49 = vpop.permute.xlu0 %416 }
 0x1ff   :  { %v4198_v50 = vadd.f32 %v417_v49, %v360_v48  ;;  %v421_v52 = vpop.permute.xlu1 %420 }
 0x200   :  { %v4202_v53 = vadd.f32 %v421_v52, %v362_v51 }
 0x201   :  { %3412 = vtanh.f32 %v4198_v50 }
 0x202   :  { %3414 = vtanh.f32 %v4202_v53 }
 0x203   :  { %v423_v56 = vpop.permute.xlu1 %422  ;;  %v419_v57 = vpop.permute.xlu0 %418 }
 0x204   :  { %v4207_v58 = vadd.f32 %v423_v56, %v363_v54  ;;  %v4209_v59 = vadd.f32 %v419_v57, %v361_v55 }
 0x206   :  { %3416 = vtanh.f32 %v4207_v58 }
 0x207   :  { %3418 = vtanh.f32 %v4209_v59  ;;  %v425_v61 = vpop.permute.xlu0 %424 }
 0x208   :  { %v4215_v63 = vadd.f32 %v425_v61, %v364_v60 }
 0x20a   :  { %v427_v1 = vpop.permute.xlu1 %426  ;;  %3420 = vtanh.f32 %v4215_v63 }
 0x20b   :  { %v4217_v3 = vadd.f32 %v427_v1, %v365_v62  ;;  %v429_v6 = vpop.permute.xlu0 %428 }
 0x20c   :  { %v4223_v9 = vadd.f32 %v429_v6, %v366_v4 }
 0x20d   :  { %3422 = vtanh.f32 %v4217_v3 }
 0x20e   :  { %v3413_v8 = vpop.eup %3412  ;;  %v431_v10 = vpop.permute.xlu1 %430  ;;  %3424 = vtanh.f32 %v4223_v9 }
 0x20f   :  { %v4225_v11 = vadd.f32 %v431_v10, %v367_v7  ;;  %464 = vrot.lane.b32.xlu0 %v3413_v8, %s4017_s10  ;;  %v3415_v14 = vpop.eup %3414 }
 0x210   :  { %468 = vrot.lane.b32.xlu1 %v3415_v14, %s4017_s10 }
 0x211   :  { %3426 = vtanh.f32 %v4225_v11 }
 0x213   :  { %v3417_v15 = vpop.eup %3416 }
 0x214   :  { %v3419_v17 = vpop.eup %3418  ;;  %470 = vrot.lane.b32.xlu1 %v3417_v15, %s4017_s10 }
 0x215   :  { %466 = vrot.lane.b32.xlu0 %v3419_v17, %s4017_s10 }
 0x217   :  { %v3421_v18 = vpop.eup %3420 }
 0x219   :  { %472 = vrot.lane.b32.xlu0 %v3421_v18, %s4017_s10 }
 0x21a   :  { %v3423_v20 = vpop.eup %3422 }
 0x21b   :  { %474 = vrot.lane.b32.xlu1 %v3423_v20, %s4017_s10  ;;  %v3425_v21 = vpop.eup %3424 }
 0x21d   :  { %476 = vrot.lane.b32.xlu0 %v3425_v21, %s4017_s10 }
 0x21e   :  { %v3427_v24 = vpop.eup %3426 }
 0x21f   :  { %478 = vrot.lane.b32.xlu1 %v3427_v24, %s4017_s10 }
 0x281   :  { %v465_v25 = vpop.permute.xlu0 %464 }
 0x282   :  { %v469_v27 = vpop.permute.xlu1 %468  ;;  %v488_v30 = vmul.f32 %v4165_v19, %v465_v25 }
 0x283   :  { %v490_v29 = vmul.f32 %v4168_v22, %v469_v27 }
 0x284   :  { %v496_v45 = vpack.c.bf16 %v488_v30, %v488_v30 }
 0x285   :  { %v498_v34 = vpack.c.bf16 %v490_v29, %v490_v29 }
 0x286   :  { %v471_v32 = vpop.permute.xlu1 %470  ;;  %v512_v19 = vunpack.c.l.b16 %v496_v45 }
 0x287   :  { %v491_v39 = vmul.f32 %v4172_v26, %v471_v32  ;;  %v467_v40 = vpop.permute.xlu0 %466  ;;  %v514_v47 = vunpack.c.l.b16 %v498_v34 }
 0x288   :  { %v489_v41 = vmul.f32 %v4175_v28, %v467_v40 }
 0x289   :  { %v499_v43 = vpack.c.bf16 %v491_v39, %v491_v39  ;;  %v523_v57 = vrot.slane %v514_v47, 6 }
 0x28a   :  { %v497_v46 = vpack.c.bf16 %v489_v41, %v489_v41 }
 0x28b   :  { %v515_v48 = vunpack.c.l.b16 %v499_v43  ;;  %v473_v49 = vpop.permute.xlu0 %472 }
 0x28c   :  { %v513_v52 = vunpack.c.l.b16 %v497_v46  ;;  %v492_v54 = vmul.f32 %v4181_v33, %v473_v49 }
 0x28d   :  { %v475_v51 = vpop.permute.xlu1 %474  ;;  %v526_v28 = vrot.slane %v515_v48, 5 }
 0x28e   :  { %v493_v22 = vmul.f32 %v4183_v36, %v475_v51  ;;  %v520_v55 = vrot.slane %v513_v52, 7  ;;  %v500_v26 = vpack.c.bf16 %v492_v54, %v492_v54 }
 0x28f   :  { %v477_v60 = vpop.permute.xlu0 %476 }
 0x290   :  { %v501_v56 = vpack.c.bf16 %v493_v22, %v493_v22  ;;  %v522_v62 = vsel %vm521_vm2, %v520_v55, %v512_v19  ;;  %v516_v1 = vunpack.c.l.b16 %v500_v26  ;;  %v494_v6 = vmul.f32 %v4188_v42, %v477_v60 }
 0x291   :  { %v479_v61 = vpop.permute.xlu1 %478  ;;  %v525_v33 = vsel %vm524_vm3, %v523_v57, %v522_v62 }
 0x292   :  { %v517_v4 = vunpack.c.l.b16 %v501_v56  ;;  %v495_v36 = vmul.f32 %v4191_v44, %v479_v61  ;;  %v528_v7 = vsel %vm527_vm4, %v526_v28, %v525_v33  ;;  %v529_v8 = vrot.slane %v516_v1, 4 }
 0x293   :  { %v502_v14 = vpack.c.bf16 %v494_v6, %v494_v6 }
 0x294   :  { %v532_v10 = vrot.slane %v517_v4, 3  ;;  %v503_v15 = vpack.c.bf16 %v495_v36, %v495_v36  ;;  %v531_v17 = vsel %vm530_vm5, %v529_v8, %v528_v7 }
 0x295   :  { %v518_v18 = vunpack.c.l.b16 %v502_v14 }
 0x296   :  { %v534_v20 = vsel %vm533_vm6, %v532_v10, %v531_v17  ;;  %v519_v21 = vunpack.c.l.b16 %v503_v15 }
 0x297   :  { %v535_v42 = vrot.slane %v518_v18, 2 }
 0x298   :  { %v538_v24 = vrot.slane %v519_v21, 1 }
 0x299   :  { %v537_v25 = vsel %vm536_vm7, %v535_v42, %v534_v20 }
 0x29a   :  { %v540_v44 = vsel %vm539_vm8, %v538_v24, %v537_v25 }
 0x29b   :  { %v541_v27 = vpack.c.b16 %v540_v44, %v540_v44 }
 0x29d   :  { %542 = vrot.lane.b32.xlu0 %v541_v27, %s4025_s3 }
 0x30f   :  { %v543_v29 = vpop.permute.xlu0 %542 }
 0x310   :  { %3259 = vmatmul.mubr.msk.bf16.vlgmr.msra.gmra.mxu1 %vm236_vm9, %v543_v29 }
 0x311   :  { %3271 = vmatpush3.bf16.msra.mxu1 %v4105_v2  ;;  %3274 = vmatprep.mubr.msk.bf16.mxu1 %vm4023_vm0, %v4022_v0 }
 0x312   :  { %3272 = vmatprep.subr.bf16.mxu1 %v4022_v0 }
 0x315   :  { %3273 = vmatpush3.bf16.msra.mxu1 %v4110_v5 }
 0x316   :  { %3286 = vmatprep.subr.bf16.mxu1 %v4022_v0 }
 0x3d0   :  { %v581_v30 = vpop.f32.mrf.mxu1 }
 0x3d1   :  { %v604_v32 = vadd.f32 %v581_v30, %v4140_v23  ;;  %v589_v34 = vrot.slane %v581_v30, 1  ;;  %v588_v39 = vrot.slane %v581_v30, 7  ;;  %v590_v43 = vrot.slane %v581_v30, 2 }
 0x3d2   :  { %v3260_v40 = vpop.f32.mrf.mxu1  ;;  %v591_v46 = vrot.slane %v581_v30, 3  ;;  %v592_v49 = vrot.slane %v581_v30, 4  ;;  %v593_v52 = vrot.slane %v581_v30, 5  ;;  %v594_v22 = vrot.slane %v581_v30, 6 }
 0x3d3   :  { %3428 = vtanh.f32 %v604_v32  ;;  %v605_v41 = vadd.f32 %v589_v34, %v4135_v13  ;;  %v603_v45 = vadd.f32 %v588_v39, %v4133_v12  ;;  %v606_v48 = vadd.f32 %v590_v43, %v4137_v16 }
 0x3d4   :  { %v584_v2 = vpop.f32.mrf.mxu1  ;;  %v607_v51 = vadd.f32 %v591_v46, %v4145_v31  ;;  %v608_v54 = vadd.f32 %v592_v49, %v4152_v38  ;;  %v609_v19 = vadd.f32 %v593_v52, %v4148_v35  ;;  %v610_v55 = vadd.f32 %v594_v22, %v4150_v37 }
 0x3d5   :  { %3430 = vtanh.f32 %v605_v41  ;;  %v3119_v4 = vmul.f32 -1.442695, %v604_v32  ;;  %v3120_v6 = vmul.f32 -1.442695, %v605_v41  ;;  %v3118_v33 = vmul.f32 -1.442695, %v603_v45 }
 0x3d6   :  { %v3261_v47 = vpop.f32.mrf.mxu1  ;;  %3432 = vtanh.f32 %v603_v45  ;;  %v3121_v36 = vmul.f32 -1.442695, %v606_v48  ;;  %v3122_v7 = vmul.f32 -1.442695, %v607_v51  ;;  %v3123_v8 = vmul.f32 -1.442695, %v608_v54 }
 0x3d7   :  { %3434 = vtanh.f32 %v606_v48  ;;  %v3124_v10 = vmul.f32 -1.442695, %v609_v19  ;;  %v3125_v14 = vmul.f32 -1.442695, %v610_v55 }
 0x3d8   :  { %3436 = vtanh.f32 %v607_v51 }
 0x3d9   :  { %3438 = vtanh.f32 %v608_v54 }
 0x3da   :  { %3440 = vtanh.f32 %v609_v19 }
 0x3db   :  { %3442 = vtanh.f32 %v610_v55 }
 0x3dc   :  { %3444 = vpow2.f32 %v3119_v4 }
 0x3dd   :  { %3446 = vpow2.f32 %v3120_v6 }
 0x3de   :  { %3448 = vpow2.f32 %v3118_v33  ;;  %v676_v33 = vrot.slane %v4209_v59, 7  ;;  %v678_v59 = vrot.slane %v4207_v58, 7  ;;  %v681_v58 = vrot.slane %v4223_v9, 7 }
 0x3df   :  { %3450 = vpow2.f32 %v3121_v36 }
 0x3e0   :  { %v3429_v26 = vpop.eup %3428  ;;  %3452 = vpow2.f32 %v3122_v7  ;;  %v677_v7 = vrot.slane %v4202_v53, 7 }
 0x3e1   :  { %709 = vrot.lane.b32.xlu1 %v3429_v26, %s4017_s10  ;;  %3454 = vpow2.f32 %v3123_v8 }
 0x3e2   :  { %v3431_v56 = vpop.eup %3430  ;;  %3456 = vpow2.f32 %v3124_v10 }
 0x3e3   :  { %711 = vrot.lane.b32.xlu0 %v3431_v56, %s4017_s10  ;;  %v3433_v57 = vpop.eup %3432  ;;  %3458 = vpow2.f32 %v3125_v14  ;;  %v675_v14 = vrot.slane %v4198_v50, 7 }
 0x3e4   :  { %v3435_v28 = vpop.eup %3434 }
 0x3e5   :  { %707 = vrot.lane.b32.xlu1 %v3433_v57, %s4017_s10  ;;  %v3437_v60 = vpop.eup %3436 }
 0x3e6   :  { %v3439_v61 = vpop.eup %3438 }
 0x3e7   :  { %713 = vrot.lane.b32.xlu0 %v3435_v28, %s4017_s10  ;;  %v3441_v62 = vpop.eup %3440 }
 0x3e8   :  { %v3443_v1 = vpop.eup %3442 }
 0x3e9   :  { %715 = vrot.lane.b32.xlu1 %v3437_v60, %s4017_s10  ;;  %v3445_v15 = vpop.eup %3444 }
 0x3ea   :  { %v3447_v17 = vpop.eup %3446  ;;  %v636_v18 = vadd.f32 1.0, %v3445_v15 }
 0x3eb   :  { %717 = vrot.lane.b32.xlu0 %v3439_v61, %s4017_s10  ;;  %v3449_v20 = vpop.eup %3448  ;;  %v637_v21 = vadd.f32 1.0, %v3447_v17 }
 0x3ec   :  { %3460 = vrcp.f32 %v636_v18  ;;  %v3451_v42 = vpop.eup %3450  ;;  %v635_v24 = vadd.f32 1.0, %v3449_v20 }
 0x3ed   :  { %719 = vrot.lane.b32.xlu1 %v3441_v62, %s4017_s10  ;;  %v3453_v25 = vpop.eup %3452  ;;  %3462 = vrcp.f32 %v637_v21  ;;  %v638_v44 = vadd.f32 1.0, %v3451_v42  ;;  %v679_v42 = vrot.slane %v4215_v63, 7 }
 0x3ee   :  { %v3455_v27 = vpop.eup %3454  ;;  %3464 = vrcp.f32 %v635_v24  ;;  %v639_v29 = vadd.f32 1.0, %v3453_v25  ;;  %v680_v25 = vrot.slane %v4217_v3, 7 }
 0x3ef   :  { %721 = vrot.lane.b32.xlu0 %v3443_v1, %s4017_s10  ;;  %v3457_v30 = vpop.eup %3456  ;;  %3466 = vrcp.f32 %v638_v44  ;;  %v640_v32 = vadd.f32 1.0, %v3455_v27 }
 0x3f0   :  { %v3459_v34 = vpop.eup %3458  ;;  %3468 = vrcp.f32 %v639_v29  ;;  %v641_v39 = vadd.f32 1.0, %v3457_v30 }
 0x3f1   :  { %3470 = vrcp.f32 %v640_v32  ;;  %v642_v40 = vadd.f32 1.0, %v3459_v34  ;;  %v682_v34 = vrot.slane %v4225_v11, 7 }
 0x3f2   :  { %3472 = vrcp.f32 %v641_v39 }
 0x3f3   :  { %3474 = vrcp.f32 %v642_v40 }
 0x3f9   :  { %v4276_v41 = vpop.eup %3460 }
 0x3fa   :  { %v4279_v45 = vpop.eup %3462  ;;  %v692_v36 = vmul.f32 %v4276_v41, %v676_v33 }
 0x3fb   :  { %v4283_v48 = vpop.eup %3464  ;;  %v693_v15 = vmul.f32 %v4279_v45, %v677_v7 }
 0x3fc   :  { %v4287_v52 = vpop.eup %3466  ;;  %v691_v20 = vmul.f32 %v4283_v48, %v675_v14 }
 0x3fd   :  { %v4291_v19 = vpop.eup %3468  ;;  %v694_v50 = vmul.f32 %v4287_v52, %v678_v59 }
 0x3fe   :  { %v4295_v56 = vpop.eup %3470  ;;  %v695_v27 = vmul.f32 %v4291_v19, %v679_v42 }
 0x3ff   :  { %v4299_v60 = vpop.eup %3472  ;;  %v696_v63 = vmul.f32 %v4295_v56, %v680_v25 }
 0x400   :  { %v4303_v1 = vpop.eup %3474  ;;  %v697_v3 = vmul.f32 %v4299_v60, %v681_v58 }
 0x401   :  { %v698_v9 = vmul.f32 %v4303_v1, %v682_v34 }
 0x453   :  { %v710_v43 = vpop.permute.xlu1 %709 }
 0x454   :  { %v732_v2 = vmul.f32 %v4276_v41, %v710_v43 }
 0x455   :  { %v712_v46 = vpop.permute.xlu0 %711 }
 0x456   :  { %749 = vrot.lane.b32.xlu1 %v732_v2, %s4025_s3  ;;  %v733_v47 = vmul.f32 %v4279_v45, %v712_v46 }
 0x457   :  { %v708_v49 = vpop.permute.xlu1 %707 }
 0x458   :  { %v731_v51 = vmul.f32 %v4283_v48, %v708_v49  ;;  %751 = vrot.lane.b32.xlu0 %v733_v47, %s4025_s3 }
 0x459   :  { %v714_v54 = vpop.permute.xlu0 %713 }
 0x45a   :  { %747 = vrot.lane.b32.xlu1 %v731_v51, %s4025_s3  ;;  %v734_v22 = vmul.f32 %v4287_v52, %v714_v54 }
 0x45b   :  { %v716_v55 = vpop.permute.xlu1 %715 }
 0x45c   :  { %v735_v26 = vmul.f32 %v4291_v19, %v716_v55  ;;  %753 = vrot.lane.b32.xlu0 %v734_v22, %s4025_s3 }
 0x45d   :  { %v718_v57 = vpop.permute.xlu0 %717 }
 0x45e   :  { %v736_v28 = vmul.f32 %v4295_v56, %v718_v57  ;;  %755 = vrot.lane.b32.xlu1 %v735_v26, %s4025_s3 }
 0x45f   :  { %v720_v61 = vpop.permute.xlu1 %719 }
 0x460   :  { %v737_v62 = vmul.f32 %v4299_v60, %v720_v61  ;;  %757 = vrot.lane.b32.xlu0 %v736_v28, %s4025_s3 }
 0x461   :  { %v722_v4 = vpop.permute.xlu0 %721 }
 0x462   :  { %v738_v6 = vmul.f32 %v4303_v1, %v722_v4  ;;  %759 = vrot.lane.b32.xlu1 %v737_v62, %s4025_s3 }
 0x464   :  { %761 = vrot.lane.b32.xlu0 %v738_v6, %s4025_s3 }
 0x4c8   :  { %v750_v8 = vpop.permute.xlu1 %749 }
 0x4c9   :  { %v4311_v10 = vadd.f32 %v750_v8, %v692_v36 }
 0x4ca   :  { %v752_v17 = vpop.permute.xlu0 %751 }
 0x4cb   :  { %3476 = vtanh.f32 %v4311_v10  ;;  %v4316_v18 = vadd.f32 %v752_v17, %v693_v15 }
 0x4cc   :  { %v748_v21 = vpop.permute.xlu1 %747 }
 0x4cd   :  { %3478 = vtanh.f32 %v4316_v18  ;;  %v4321_v53 = vadd.f32 %v748_v21, %v691_v20 }
 0x4ce   :  { %v754_v24 = vpop.permute.xlu0 %753 }
 0x4cf   :  { %3480 = vtanh.f32 %v4321_v53  ;;  %v4327_v44 = vadd.f32 %v754_v24, %v694_v50 }
 0x4d0   :  { %v756_v29 = vpop.permute.xlu1 %755 }
 0x4d1   :  { %3482 = vtanh.f32 %v4327_v44  ;;  %v4332_v30 = vadd.f32 %v756_v29, %v695_v27 }
 0x4d2   :  { %v758_v32 = vpop.permute.xlu0 %757 }
 0x4d3   :  { %3484 = vtanh.f32 %v4332_v30  ;;  %v4337_v39 = vadd.f32 %v758_v32, %v696_v63 }
 0x4d4   :  { %v760_v40 = vpop.permute.xlu1 %759 }
 0x4d5   :  { %3486 = vtanh.f32 %v4337_v39  ;;  %v4341_v43 = vadd.f32 %v760_v40, %v697_v3 }
 0x4d6   :  { %v762_v46 = vpop.permute.xlu0 %761 }
 0x4d7   :  { %3488 = vtanh.f32 %v4341_v43  ;;  %v4345_v47 = vadd.f32 %v762_v46, %v698_v9 }
 0x4d8   :  { %v3477_v2 = vpop.eup %3476 }
 0x4d9   :  { %797 = vrot.lane.b32.xlu1 %v3477_v2, %s4017_s10  ;;  %3490 = vtanh.f32 %v4345_v47 }
 0x4da   :  { %v3479_v11 = vpop.eup %3478 }
 0x4db   :  { %799 = vrot.lane.b32.xlu0 %v3479_v11, %s4017_s10 }
 0x4dc   :  { %v3481_v49 = vpop.eup %3480 }
 0x4dd   :  { %795 = vrot.lane.b32.xlu1 %v3481_v49, %s4017_s10 }
 0x4de   :  { %v3483_v51 = vpop.eup %3482 }
 0x4df   :  { %801 = vrot.lane.b32.xlu0 %v3483_v51, %s4017_s10 }
 0x4e0   :  { %v3485_v54 = vpop.eup %3484 }
 0x4e1   :  { %803 = vrot.lane.b32.xlu1 %v3485_v54, %s4017_s10 }
 0x4e2   :  { %v3487_v22 = vpop.eup %3486 }
 0x4e3   :  { %805 = vrot.lane.b32.xlu0 %v3487_v22, %s4017_s10 }
 0x4e4   :  { %v3489_v55 = vpop.eup %3488 }
 0x4e5   :  { %807 = vrot.lane.b32.xlu1 %v3489_v55, %s4017_s10 }
 0x4e6   :  { %v3491_v26 = vpop.eup %3490 }
 0x4e7   :  { %809 = vrot.lane.b32.xlu0 %v3491_v26, %s4017_s10 }
 0x54b   :  { %v798_v57 = vpop.permute.xlu1 %797 }
 0x54c   :  { %v820_v61 = vmul.f32 %v4276_v41, %v798_v57 }
 0x54d   :  { %v800_v28 = vpop.permute.xlu0 %799 }
 0x54e   :  { %v821_v62 = vmul.f32 %v4279_v45, %v800_v28  ;;  %v828_v36 = vpack.c.bf16 %v820_v61, %v820_v61 }
 0x54f   :  { %v796_v4 = vpop.permute.xlu1 %795 }
 0x550   :  { %v829_v6 = vpack.c.bf16 %v821_v62, %v821_v62  ;;  %v819_v33 = vmul.f32 %v4283_v48, %v796_v4  ;;  %v844_v42 = vunpack.c.l.b16 %v828_v36 }
 0x551   :  { %v802_v8 = vpop.permute.xlu0 %801 }
 0x552   :  { %v827_v7 = vpack.c.bf16 %v819_v33, %v819_v33  ;;  %v845_v14 = vunpack.c.l.b16 %v829_v6  ;;  %v822_v15 = vmul.f32 %v4287_v52, %v802_v8 }
 0x553   :  { %v804_v20 = vpop.permute.xlu1 %803 }
 0x554   :  { %v843_v17 = vunpack.c.l.b16 %v827_v7  ;;  %v830_v59 = vpack.c.bf16 %v822_v15, %v822_v15  ;;  %v823_v21 = vmul.f32 %v4291_v19, %v804_v20  ;;  %v853_v24 = vrot.slane %v845_v14, 7 }
 0x555   :  { %v806_v41 = vpop.permute.xlu0 %805 }
 0x556   :  { %v851_v50 = vrot.slane %v843_v17, 1  ;;  %v846_v45 = vunpack.c.l.b16 %v830_v59  ;;  %v831_v25 = vpack.c.bf16 %v823_v21, %v823_v21  ;;  %v824_v27 = vmul.f32 %v4295_v56, %v806_v41 }
 0x557   :  { %v808_v29 = vpop.permute.xlu1 %807 }
 0x558   :  { %v852_v48 = vsel %vm521_vm2, %v844_v42, %v851_v50  ;;  %v855_v63 = vrot.slane %v846_v45, 6  ;;  %v847_v52 = vunpack.c.l.b16 %v831_v25  ;;  %v832_v32 = vpack.c.bf16 %v824_v27, %v824_v27 }
 0x559   :  { %v854_v58 = vsel %vm524_vm3, %v853_v24, %v852_v48  ;;  %v825_v34 = vmul.f32 %v4299_v60, %v808_v29  ;;  %v810_v3 = vpop.permute.xlu0 %809 }
 0x55a   :  { %v856_v19 = vsel %vm527_vm4, %v855_v63, %v854_v58  ;;  %v857_v40 = vrot.slane %v847_v52, 5  ;;  %v848_v9 = vunpack.c.l.b16 %v832_v32  ;;  %v826_v2 = vmul.f32 %v4303_v1, %v810_v3  ;;  %v4373_v1 = vld [vmem:[#allocation7 + $0x8] sm:$0xff]  }
 0x55b   :  { %v833_v46 = vpack.c.bf16 %v825_v34, %v825_v34 }
 0x55c   :  { %v858_v56 = vsel %vm530_vm5, %v857_v40, %v856_v19  ;;  %v859_v11 = vrot.slane %v848_v9, 4  ;;  %v834_v49 = vpack.c.bf16 %v826_v2, %v826_v2 }
 0x55d   :  { %v849_v51 = vunpack.c.l.b16 %v833_v46 }
 0x55e   :  { %v860_v54 = vsel %vm533_vm6, %v859_v11, %v858_v56  ;;  %v850_v22 = vunpack.c.l.b16 %v834_v49 }
 0x55f   :  { %v861_v55 = vrot.slane %v849_v51, 3 }
 0x560   :  { %v863_v26 = vrot.slane %v850_v22, 2 }
 0x561   :  { %v862_v60 = vsel %vm536_vm7, %v861_v55, %v860_v54 }
 0x562   :  { %v864_v57 = vsel %vm539_vm8, %v863_v26, %v862_v60 }
 0x563   :  { %v865_v28 = vpack.c.b16 %v864_v57, %v864_v57 }
 0x565   :  { %866 = vrot.lane.b32.xlu1 %v865_v28, %s4025_s3 }
 0x5d7   :  { %v867_v61 = vpop.permute.xlu1 %866 }
 0x5d8   :  { %3267 = vmatmul.mubr.msk.bf16.vlgmr.msra.gmra.mxu0 %vm236_vm9, %v867_v61 }
 0x5d9   :  { %3279 = vmatpush3.bf16.msra.mxu0 %v4373_v1  ;;  %3282 = vmatprep.mubr.msk.bf16.mxu0 %vm4023_vm0, %v4022_v0 }
 0x5da   :  { %3280 = vmatprep.subr.bf16.mxu0 %v4022_v0 }
 0x5dd   :  { %3281 = vmatpush3.bf16.msra.mxu0 %v4110_v5 }
 0x5de   :  { %3294 = vmatprep.subr.bf16.mxu0 %v4022_v0 }
 0x698   :  { %v905_v62 = vpop.f32.mrf.mxu0 }
 0x699   :  { %v929_v4 = vadd.f32 %v905_v62, %v4135_v13  ;;  %v912_v6 = vrot.slane %v905_v62, 6  ;;  %v913_v33 = vrot.slane %v905_v62, 7  ;;  %v914_v8 = vrot.slane %v905_v62, 1 }
 0x69a   :  { %v3268_v36 = vpop.f32.mrf.mxu0  ;;  %v916_v17 = vrot.slane %v905_v62, 3  ;;  %v915_v59 = vrot.slane %v905_v62, 2  ;;  %v918_v42 = vrot.slane %v905_v62, 5  ;;  %v917_v41 = vrot.slane %v905_v62, 4 }
 0x69b   :  { %3492 = vtanh.f32 %v929_v4  ;;  %v927_v7 = vadd.f32 %v912_v6, %v4133_v12  ;;  %v928_v15 = vadd.f32 %v913_v33, %v4140_v23  ;;  %v930_v5 = vadd.f32 %v914_v8, %v4137_v16 }
 0x69c   :  { %v908_v14 = vpop.f32.mrf.mxu0  ;;  %v932_v21 = vadd.f32 %v916_v17, %v4152_v38  ;;  %v931_v50 = vadd.f32 %v915_v59, %v4145_v31  ;;  %v934_v24 = vadd.f32 %v918_v42, %v4150_v37  ;;  %v933_v45 = vadd.f32 %v917_v41, %v4148_v35 }
 0x69d   :  { %3494 = vtanh.f32 %v927_v7  ;;  %v3129_v34 = vmul.f32 -1.442695, %v929_v4  ;;  %v3127_v3 = vmul.f32 -1.442695, %v927_v7  ;;  %v3128_v19 = vmul.f32 -1.442695, %v928_v15 }
 0x69e   :  { %v3269_v20 = vpop.f32.mrf.mxu0  ;;  %3496 = vtanh.f32 %v928_v15  ;;  %v3130_v40 = vmul.f32 -1.442695, %v930_v5  ;;  %v3132_v9 = vmul.f32 -1.442695, %v932_v21  ;;  %v3131_v2 = vmul.f32 -1.442695, %v931_v50 }
 0x69f   :  { %3498 = vtanh.f32 %v930_v5  ;;  %v3134_v46 = vmul.f32 -1.442695, %v934_v24  ;;  %v3133_v56 = vmul.f32 -1.442695, %v933_v45 }
 0x6a0   :  { %3500 = vtanh.f32 %v932_v21 }
 0x6a1   :  { %3502 = vtanh.f32 %v931_v50 }
 0x6a2   :  { %3504 = vtanh.f32 %v934_v24 }
 0x6a3   :  { %3506 = vtanh.f32 %v933_v45 }
 0x6a4   :  { %3508 = vpow2.f32 %v3129_v34 }
 0x6a5   :  { %3510 = vpow2.f32 %v3127_v3 }
 0x6a6   :  { %3512 = vpow2.f32 %v3128_v19  ;;  %v1001_v19 = vrot.slane %v4316_v18, 7  ;;  %v1002_v18 = vrot.slane %v4327_v44, 7  ;;  %v1006_v44 = vrot.slane %v4345_v47, 7 }
 0x6a7   :  { %3514 = vpow2.f32 %v3130_v40 }
 0x6a8   :  { %v3493_v25 = vpop.eup %3492  ;;  %3516 = vpow2.f32 %v3132_v9  ;;  %v999_v9 = vrot.slane %v4321_v53, 7 }
 0x6a9   :  { %1035 = vrot.lane.b32.xlu1 %v3493_v25, %s4017_s10  ;;  %3518 = vpow2.f32 %v3131_v2 }
 0x6aa   :  { %v3495_v27 = vpop.eup %3494  ;;  %3520 = vpow2.f32 %v3134_v46 }
 0x6ab   :  { %1031 = vrot.lane.b32.xlu0 %v3495_v27, %s4017_s10  ;;  %v3497_v48 = vpop.eup %3496  ;;  %3522 = vpow2.f32 %v3133_v56  ;;  %v1000_v56 = vrot.slane %v4311_v10, 7 }
 0x6ac   :  { %v3499_v29 = vpop.eup %3498 }
 0x6ad   :  { %1033 = vrot.lane.b32.xlu1 %v3497_v48, %s4017_s10  ;;  %v3501_v58 = vpop.eup %3500 }
 0x6ae   :  { %v3503_v63 = vpop.eup %3502 }
 0x6af   :  { %1037 = vrot.lane.b32.xlu0 %v3499_v29, %s4017_s10  ;;  %v3505_v52 = vpop.eup %3504 }
 0x6b0   :  { %v3507_v32 = vpop.eup %3506 }
 0x6b1   :  { %1041 = vrot.lane.b32.xlu1 %v3501_v58, %s4017_s10  ;;  %v3509_v11 = vpop.eup %3508 }
 0x6b2   :  { %v3511_v49 = vpop.eup %3510  ;;  %v961_v51 = vadd.f32 1.0, %v3509_v11 }
 0x6b3   :  { %1039 = vrot.lane.b32.xlu0 %v3503_v63, %s4017_s10  ;;  %v3513_v54 = vpop.eup %3512  ;;  %v959_v22 = vadd.f32 1.0, %v3511_v49 }
 0x6b4   :  { %3524 = vrcp.f32 %v961_v51  ;;  %v3515_v55 = vpop.eup %3514  ;;  %v960_v26 = vadd.f32 1.0, %v3513_v54 }
 0x6b5   :  { %1045 = vrot.lane.b32.xlu1 %v3505_v52, %s4017_s10  ;;  %v3517_v60 = vpop.eup %3516  ;;  %3526 = vrcp.f32 %v959_v22  ;;  %v962_v57 = vadd.f32 1.0, %v3515_v55  ;;  %v1004_v55 = vrot.slane %v4337_v39, 7 }
 0x6b6   :  { %v3519_v28 = vpop.eup %3518  ;;  %3528 = vrcp.f32 %v960_v26  ;;  %v964_v61 = vadd.f32 1.0, %v3517_v60  ;;  %v1003_v60 = vrot.slane %v4332_v30, 7 }
 0x6b7   :  { %1043 = vrot.lane.b32.xlu0 %v3507_v32, %s4017_s10  ;;  %v3521_v62 = vpop.eup %3520  ;;  %3530 = vrcp.f32 %v962_v57  ;;  %v963_v4 = vadd.f32 1.0, %v3519_v28 }
 0x6b8   :  { %v3523_v6 = vpop.eup %3522  ;;  %3532 = vrcp.f32 %v964_v61  ;;  %v966_v33 = vadd.f32 1.0, %v3521_v62 }
 0x6b9   :  { %3534 = vrcp.f32 %v963_v4  ;;  %v965_v36 = vadd.f32 1.0, %v3523_v6  ;;  %v1005_v6 = vrot.slane %v4341_v43, 7 }
 0x6ba   :  { %3536 = vrcp.f32 %v966_v33 }
 0x6bb   :  { %3538 = vrcp.f32 %v965_v36 }
 0x6c1   :  { %v4397_v7 = vpop.eup %3524 }
 0x6c2   :  { %v4400_v15 = vpop.eup %3526  ;;  %v1017_v40 = vmul.f32 %v4397_v7, %v1001_v19 }
 0x6c3   :  { %v4404_v5 = vpop.eup %3528  ;;  %v1015_v11 = vmul.f32 %v4400_v15, %v999_v9 }
 0x6c4   :  { %v4408_v42 = vpop.eup %3530  ;;  %v1016_v54 = vmul.f32 %v4404_v5, %v1000_v56 }
 0x6c5   :  { %v4412_v24 = vpop.eup %3532  ;;  %v1018_v10 = vmul.f32 %v4408_v42, %v1002_v18 }
 0x6c6   :  { %v4416_v27 = vpop.eup %3534  ;;  %v1020_v28 = vmul.f32 %v4412_v24, %v1004_v55 }
 0x6c7   :  { %v4420_v58 = vpop.eup %3536  ;;  %v1019_v39 = vmul.f32 %v4416_v27, %v1003_v60 }
 0x6c8   :  { %v4424_v32 = vpop.eup %3538  ;;  %v1022_v30 = vmul.f32 %v4420_v58, %v1006_v44 }
 0x6c9   :  { %v1021_v47 = vmul.f32 %v4424_v32, %v1005_v6 }
 0x71b   :  { %v1036_v8 = vpop.permute.xlu1 %1035 }
 0x71c   :  { %v1057_v14 = vmul.f32 %v4397_v7, %v1036_v8 }
 0x71d   :  { %v1032_v17 = vpop.permute.xlu0 %1031 }
 0x71e   :  { %1075 = vrot.lane.b32.xlu1 %v1057_v14, %s4025_s3  ;;  %v1055_v20 = vmul.f32 %v4400_v15, %v1032_v17 }
 0x71f   :  { %v1034_v59 = vpop.permute.xlu1 %1033 }
 0x720   :  { %v1056_v21 = vmul.f32 %v4404_v5, %v1034_v59  ;;  %1071 = vrot.lane.b32.xlu0 %v1055_v20, %s4025_s3 }
 0x721   :  { %v1038_v50 = vpop.permute.xlu0 %1037 }
 0x722   :  { %1073 = vrot.lane.b32.xlu1 %v1056_v21, %s4025_s3  ;;  %v1058_v41 = vmul.f32 %v4408_v42, %v1038_v50 }
 0x723   :  { %v1042_v45 = vpop.permute.xlu1 %1041 }
 0x724   :  { %v1060_v25 = vmul.f32 %v4412_v24, %v1042_v45  ;;  %1077 = vrot.lane.b32.xlu0 %v1058_v41, %s4025_s3 }
 0x725   :  { %v1040_v48 = vpop.permute.xlu0 %1039 }
 0x726   :  { %v1059_v29 = vmul.f32 %v4416_v27, %v1040_v48  ;;  %1081 = vrot.lane.b32.xlu1 %v1060_v25, %s4025_s3 }
 0x727   :  { %v1046_v63 = vpop.permute.xlu1 %1045 }
 0x728   :  { %v1062_v52 = vmul.f32 %v4420_v58, %v1046_v63  ;;  %1079 = vrot.lane.b32.xlu0 %v1059_v29, %s4025_s3 }
 0x729   :  { %v1044_v34 = vpop.permute.xlu0 %1043 }
 0x72a   :  { %v1061_v3 = vmul.f32 %v4424_v32, %v1044_v34  ;;  %1085 = vrot.lane.b32.xlu1 %v1062_v52, %s4025_s3 }
 0x72c   :  { %1083 = vrot.lane.b32.xlu0 %v1061_v3, %s4025_s3 }
 0x790   :  { %v1076_v2 = vpop.permute.xlu1 %1075 }
 0x791   :  { %v4432_v46 = vadd.f32 %v1076_v2, %v1017_v40 }
 0x792   :  { %v1072_v49 = vpop.permute.xlu0 %1071 }
 0x793   :  { %3540 = vtanh.f32 %v4432_v46  ;;  %v4437_v51 = vadd.f32 %v1072_v49, %v1015_v11 }
 0x794   :  { %v1074_v22 = vpop.permute.xlu1 %1073 }
 0x795   :  { %3542 = vtanh.f32 %v4437_v51  ;;  %v4442_v53 = vadd.f32 %v1074_v22, %v1016_v54 }
 0x796   :  { %v1078_v26 = vpop.permute.xlu0 %1077 }
 0x797   :  { %3544 = vtanh.f32 %v4442_v53  ;;  %v4448_v57 = vadd.f32 %v1078_v26, %v1018_v10 }
 0x798   :  { %v1082_v61 = vpop.permute.xlu1 %1081 }
 0x799   :  { %3546 = vtanh.f32 %v4448_v57  ;;  %v4453_v62 = vadd.f32 %v1082_v61, %v1020_v28 }
 0x79a   :  { %v1080_v4 = vpop.permute.xlu0 %1079 }
 0x79b   :  { %3548 = vtanh.f32 %v4453_v62  ;;  %v4458_v33 = vadd.f32 %v1080_v4, %v1019_v39 }
 0x79c   :  { %v1086_v36 = vpop.permute.xlu1 %1085 }
 0x79d   :  { %3550 = vtanh.f32 %v4458_v33  ;;  %v4462_v8 = vadd.f32 %v1086_v36, %v1022_v30 }
 0x79e   :  { %v1084_v17 = vpop.permute.xlu0 %1083 }
 0x79f   :  { %3552 = vtanh.f32 %v4462_v8  ;;  %v4466_v20 = vadd.f32 %v1084_v17, %v1021_v47 }
 0x7a0   :  { %v3541_v14 = vpop.eup %3540 }
 0x7a1   :  { %1123 = vrot.lane.b32.xlu1 %v3541_v14, %s4017_s10  ;;  %3554 = vtanh.f32 %v4466_v20 }
 0x7a2   :  { %v3543_v43 = vpop.eup %3542 }
 0x7a3   :  { %1119 = vrot.lane.b32.xlu0 %v3543_v43, %s4017_s10 }
 0x7a4   :  { %v3545_v59 = vpop.eup %3544 }
 0x7a5   :  { %1121 = vrot.lane.b32.xlu1 %v3545_v59, %s4017_s10 }
 0x7a6   :  { %v3547_v21 = vpop.eup %3546 }
 0x7a7   :  { %1125 = vrot.lane.b32.xlu0 %v3547_v21, %s4017_s10 }
 0x7a8   :  { %v3549_v50 = vpop.eup %3548 }
 0x7a9   :  { %1129 = vrot.lane.b32.xlu1 %v3549_v50, %s4017_s10 }
 0x7aa   :  { %v3551_v41 = vpop.eup %3550 }
 0x7ab   :  { %1127 = vrot.lane.b32.xlu0 %v3551_v41, %s4017_s10 }
 0x7ac   :  { %v3553_v45 = vpop.eup %3552 }
 0x7ad   :  { %1133 = vrot.lane.b32.xlu1 %v3553_v45, %s4017_s10 }
 0x7ae   :  { %v3555_v25 = vpop.eup %3554 }
 0x7af   :  { %1131 = vrot.lane.b32.xlu0 %v3555_v25, %s4017_s10 }
 0x813   :  { %v1124_v48 = vpop.permute.xlu1 %1123 }
 0x814   :  { %v1145_v19 = vmul.f32 %v4397_v7, %v1124_v48 }
 0x815   :  { %v1120_v29 = vpop.permute.xlu0 %1119 }
 0x816   :  { %v1143_v63 = vmul.f32 %v4400_v15, %v1120_v29  ;;  %v1153_v54 = vpack.c.bf16 %v1145_v19, %v1145_v19 }
 0x817   :  { %v1122_v52 = vpop.permute.xlu1 %1121 }
 0x818   :  { %v1151_v34 = vpack.c.bf16 %v1143_v63, %v1143_v63  ;;  %v1144_v3 = vmul.f32 %v4404_v5, %v1122_v52  ;;  %v1169_v61 = vunpack.c.l.b16 %v1153_v54  ;;  %v4498_v63 = vld [vmem:[#allocation7] sm:$0xff]  }
 0x819   :  { %v1126_v2 = vpop.permute.xlu0 %1125 }
 0x81a   :  { %v1167_v40 = vunpack.c.l.b16 %v1151_v34  ;;  %v1152_v9 = vpack.c.bf16 %v1144_v3, %v1144_v3  ;;  %v1146_v56 = vmul.f32 %v4408_v42, %v1126_v2 }
 0x81b   :  { %v1130_v49 = vpop.permute.xlu1 %1129 }
 0x81c   :  { %v1168_v11 = vunpack.c.l.b16 %v1152_v9  ;;  %v1154_v18 = vpack.c.bf16 %v1146_v56, %v1146_v56  ;;  %v1148_v22 = vmul.f32 %v4412_v24, %v1130_v49  ;;  %v1175_v55 = vrot.slane %v1167_v40, 2 }
 0x81d   :  { %v1128_v15 = vpop.permute.xlu0 %1127 }
 0x81e   :  { %v1176_v10 = vrot.slane %v1168_v11, 1  ;;  %v1170_v26 = vunpack.c.l.b16 %v1154_v18  ;;  %v1147_v60 = vmul.f32 %v4416_v27, %v1128_v15  ;;  %v1156_v7 = vpack.c.bf16 %v1148_v22, %v1148_v22 }
 0x81f   :  { %v1134_v28 = vpop.permute.xlu1 %1133 }
 0x820   :  { %v1177_v5 = vsel %vm521_vm2, %v1176_v10, %v1175_v55  ;;  %v1155_v44 = vpack.c.bf16 %v1147_v60, %v1147_v60  ;;  %v1179_v39 = vrot.slane %v1170_v26, 7  ;;  %v1150_v42 = vmul.f32 %v4420_v58, %v1134_v28 }
 0x821   :  { %v1132_v4 = vpop.permute.xlu0 %1131  ;;  %v1178_v6 = vsel %vm524_vm3, %v1169_v61, %v1177_v5  ;;  %v1172_v36 = vunpack.c.l.b16 %v1156_v7 }
 0x822   :  { %v1171_v30 = vunpack.c.l.b16 %v1155_v44  ;;  %v1149_v24 = vmul.f32 %v4424_v32, %v1132_v4  ;;  %v1158_v47 = vpack.c.bf16 %v1150_v42, %v1150_v42  ;;  %v1180_v27 = vsel %vm527_vm4, %v1179_v39, %v1178_v6 }
 0x823   :  { %v1183_v50 = vrot.slane %v1172_v36, 5 }
 0x824   :  { %v1181_v14 = vrot.slane %v1171_v30, 6  ;;  %v1157_v17 = vpack.c.bf16 %v1149_v24, %v1149_v24  ;;  %v1174_v43 = vunpack.c.l.b16 %v1158_v47 }
 0x826   :  { %v1182_v59 = vsel %vm530_vm5, %v1181_v14, %v1180_v27  ;;  %v1173_v21 = vunpack.c.l.b16 %v1157_v17  ;;  %v1187_v45 = vrot.slane %v1174_v43, 3 }
 0x827   :  { %v1184_v58 = vsel %vm533_vm6, %v1183_v50, %v1182_v59 }
 0x828   :  { %v1185_v41 = vrot.slane %v1173_v21, 4 }
 0x82a   :  { %v1186_v25 = vsel %vm536_vm7, %v1185_v41, %v1184_v58 }
 0x82b   :  { %v1188_v48 = vsel %vm539_vm8, %v1187_v45, %v1186_v25 }
 0x82c   :  { %v1189_v32 = vpack.c.b16 %v1188_v48, %v1188_v48 }
 0x82e   :  { %1190 = vrot.lane.b32.xlu0 %v1189_v32, %s4025_s3 }
 0x8a0   :  { %v1191_v29 = vpop.permute.xlu0 %1190 }
 0x8a1   :  { %3275 = vmatmul.mubr.msk.bf16.vlgmr.msra.gmra.mxu1 %vm236_vm9, %v1191_v29 }
 0x8a2   :  { %3287 = vmatpush3.bf16.msra.mxu1 %v4373_v1  ;;  %3290 = vmatprep.mubr.msk.bf16.mxu1 %vm4023_vm0, %v4022_v0 }
 0x8a3   :  { %3288 = vmatprep.subr.bf16.mxu1 %v4022_v0 }
 0x8a6   :  { %3289 = vmatpush3.bf16.msra.mxu1 %v4498_v63 }
 0x8a7   :  { %3302 = vmatprep.subr.bf16.mxu1 %v4022_v0 }
 0x961   :  { %v1229_v52 = vpop.f32.mrf.mxu1 }
 0x962   :  { %v1254_v34 = vadd.f32 %v1229_v52, %v4137_v16  ;;  %v1237_v3 = vrot.slane %v1229_v52, 6  ;;  %v1236_v19 = vrot.slane %v1229_v52, 5  ;;  %v1239_v2 = vrot.slane %v1229_v52, 1 }
 0x963   :  { %v3276_v40 = vpop.f32.mrf.mxu1  ;;  %v1238_v49 = vrot.slane %v1229_v52, 7  ;;  %v1240_v22 = vrot.slane %v1229_v52, 2  ;;  %v1241_v10 = vrot.slane %v1229_v52, 3  ;;  %v1242_v26 = vrot.slane %v1229_v52, 4 }
 0x964   :  { %3556 = vtanh.f32 %v1254_v34  ;;  %v1252_v9 = vadd.f32 %v1237_v3, %v4140_v23  ;;  %v1251_v11 = vadd.f32 %v1236_v19, %v4133_v12  ;;  %v1255_v18 = vadd.f32 %v1239_v2, %v4145_v31 }
 0x965   :  { %v1232_v56 = vpop.f32.mrf.mxu1  ;;  %v1253_v55 = vadd.f32 %v1238_v49, %v4135_v13  ;;  %v1256_v15 = vadd.f32 %v1240_v22, %v4152_v38  ;;  %v1257_v60 = vadd.f32 %v1241_v10, %v4148_v35  ;;  %v1258_v5 = vadd.f32 %v1242_v26, %v4150_v37 }
 0x966   :  { %3558 = vtanh.f32 %v1252_v9  ;;  %v3139_v30 = vmul.f32 -1.442695, %v1254_v34  ;;  %v3137_v24 = vmul.f32 -1.442695, %v1252_v9  ;;  %v3136_v36 = vmul.f32 -1.442695, %v1251_v11 }
 0x967   :  { %v3277_v54 = vpop.f32.mrf.mxu1  ;;  %3560 = vtanh.f32 %v1251_v11  ;;  %v3140_v47 = vmul.f32 -1.442695, %v1255_v18  ;;  %v3138_v14 = vmul.f32 -1.442695, %v1253_v55  ;;  %v3141_v17 = vmul.f32 -1.442695, %v1256_v15 }
 0x968   :  { %3562 = vtanh.f32 %v1255_v18  ;;  %v3142_v27 = vmul.f32 -1.442695, %v1257_v60  ;;  %v3143_v43 = vmul.f32 -1.442695, %v1258_v5 }
 0x969   :  { %3564 = vtanh.f32 %v1253_v55 }
 0x96a   :  { %3566 = vtanh.f32 %v1256_v15 }
 0x96b   :  { %3568 = vtanh.f32 %v1257_v60 }
 0x96c   :  { %3570 = vtanh.f32 %v1258_v5 }
 0x96d   :  { %3572 = vpow2.f32 %v3139_v30 }
 0x96e   :  { %3574 = vpow2.f32 %v3137_v24 }
 0x96f   :  { %3576 = vpow2.f32 %v3136_v36 }
 0x970   :  { %3578 = vpow2.f32 %v3140_v47  ;;  %v1326_v47 = vrot.slane %v4448_v57, 7  ;;  %v1327_v57 = vrot.slane %v4458_v33, 7  ;;  %v1329_v33 = vrot.slane %v4466_v20, 7 }
 0x971   :  { %v3557_v7 = vpop.eup %3556  ;;  %3580 = vpow2.f32 %v3138_v14 }
 0x972   :  { %1361 = vrot.lane.b32.xlu1 %v3557_v7, %s4017_s10  ;;  %3582 = vpow2.f32 %v3141_v17  ;;  %v1324_v17 = vrot.slane %v4442_v53, 7 }
 0x973   :  { %v3559_v28 = vpop.eup %3558  ;;  %3584 = vpow2.f32 %v3142_v27 }
 0x974   :  { %1357 = vrot.lane.b32.xlu0 %v3559_v28, %s4017_s10  ;;  %v3561_v61 = vpop.eup %3560  ;;  %3586 = vpow2.f32 %v3143_v43 }
 0x975   :  { %v3563_v44 = vpop.eup %3562 }
 0x976   :  { %1355 = vrot.lane.b32.xlu1 %v3561_v61, %s4017_s10  ;;  %v3565_v39 = vpop.eup %3564 }
 0x977   :  { %v3567_v42 = vpop.eup %3566 }
 0x978   :  { %1363 = vrot.lane.b32.xlu0 %v3563_v44, %s4017_s10  ;;  %v3569_v4 = vpop.eup %3568 }
 0x979   :  { %v3571_v6 = vpop.eup %3570 }
 0x97a   :  { %1359 = vrot.lane.b32.xlu1 %v3565_v39, %s4017_s10  ;;  %v3573_v59 = vpop.eup %3572 }
 0x97b   :  { %v3575_v21 = vpop.eup %3574  ;;  %v1286_v50 = vadd.f32 1.0, %v3573_v59  ;;  %v1323_v59 = vrot.slane %v4437_v51, 7 }
 0x97c   :  { %1365 = vrot.lane.b32.xlu0 %v3567_v42, %s4017_s10  ;;  %v3577_v41 = vpop.eup %3576  ;;  %v1284_v45 = vadd.f32 1.0, %v3575_v21 }
 0x97d   :  { %3588 = vrcp.f32 %v1286_v50  ;;  %v3579_v58 = vpop.eup %3578  ;;  %v1283_v25 = vadd.f32 1.0, %v3577_v41 }
 0x97e   :  { %1367 = vrot.lane.b32.xlu1 %v3569_v4, %s4017_s10  ;;  %v3581_v48 = vpop.eup %3580  ;;  %3590 = vrcp.f32 %v1284_v45  ;;  %v1287_v32 = vadd.f32 1.0, %v3579_v58 }
 0x97f   :  { %v3583_v29 = vpop.eup %3582  ;;  %3592 = vrcp.f32 %v1283_v25  ;;  %v1285_v52 = vadd.f32 1.0, %v3581_v48  ;;  %v1325_v25 = vrot.slane %v4432_v46, 7 }
 0x980   :  { %1369 = vrot.lane.b32.xlu0 %v3571_v6, %s4017_s10  ;;  %v3585_v34 = vpop.eup %3584  ;;  %3594 = vrcp.f32 %v1287_v32  ;;  %v1288_v3 = vadd.f32 1.0, %v3583_v29  ;;  %v1328_v32 = vrot.slane %v4453_v62, 7 }
 0x981   :  { %v3587_v19 = vpop.eup %3586  ;;  %3596 = vrcp.f32 %v1285_v52  ;;  %v1289_v40 = vadd.f32 1.0, %v3585_v34 }
 0x982   :  { %3598 = vrcp.f32 %v1288_v3  ;;  %v1290_v9 = vadd.f32 1.0, %v3587_v19 }
 0x983   :  { %3600 = vrcp.f32 %v1289_v40  ;;  %v1330_v40 = vrot.slane %v4462_v8, 7 }
 0x984   :  { %3602 = vrcp.f32 %v1290_v9 }
 0x98a   :  { %v4518_v2 = vpop.eup %3588 }
 0x98b   :  { %v4521_v49 = vpop.eup %3590  ;;  %v1342_v14 = vmul.f32 %v4518_v2, %v1326_v47 }
 0x98c   :  { %v4525_v22 = vpop.eup %3592  ;;  %v1340_v21 = vmul.f32 %v4521_v49, %v1324_v17 }
 0x98d   :  { %v4529_v15 = vpop.eup %3594  ;;  %v1339_v45 = vmul.f32 %v4525_v22, %v1323_v59 }
 0x98e   :  { %v4533_v5 = vpop.eup %3596  ;;  %v1343_v51 = vmul.f32 %v4529_v15, %v1327_v57 }
 0x98f   :  { %v4537_v61 = vpop.eup %3598  ;;  %v1341_v52 = vmul.f32 %v4533_v5, %v1325_v25 }
 0x990   :  { %v4541_v42 = vpop.eup %3600  ;;  %v1344_v46 = vmul.f32 %v4537_v61, %v1328_v32 }
 0x991   :  { %v4545_v30 = vpop.eup %3602  ;;  %v1345_v62 = vmul.f32 %v4541_v42, %v1329_v33 }
 0x992   :  { %v1346_v20 = vmul.f32 %v4545_v30, %v1330_v40 }
 0x9e4   :  { %v1362_v56 = vpop.permute.xlu1 %1361 }
 0x9e5   :  { %v1382_v11 = vmul.f32 %v4518_v2, %v1362_v56 }
 0x9e6   :  { %v1358_v54 = vpop.permute.xlu0 %1357 }
 0x9e7   :  { %1401 = vrot.lane.b32.xlu1 %v1382_v11, %s4025_s3  ;;  %v1380_v18 = vmul.f32 %v4521_v49, %v1358_v54 }
 0x9e8   :  { %v1356_v55 = vpop.permute.xlu1 %1355 }
 0x9e9   :  { %v1379_v10 = vmul.f32 %v4525_v22, %v1356_v55  ;;  %1397 = vrot.lane.b32.xlu0 %v1380_v18, %s4025_s3 }
 0x9ea   :  { %v1364_v26 = vpop.permute.xlu0 %1363 }
 0x9eb   :  { %1395 = vrot.lane.b32.xlu1 %v1379_v10, %s4025_s3  ;;  %v1383_v60 = vmul.f32 %v4529_v15, %v1364_v26 }
 0x9ec   :  { %v1360_v7 = vpop.permute.xlu1 %1359 }
 0x9ed   :  { %v1381_v28 = vmul.f32 %v4533_v5, %v1360_v7  ;;  %1403 = vrot.lane.b32.xlu0 %v1383_v60, %s4025_s3 }
 0x9ee   :  { %v1366_v44 = vpop.permute.xlu0 %1365 }
 0x9ef   :  { %v1384_v39 = vmul.f32 %v4537_v61, %v1366_v44  ;;  %1399 = vrot.lane.b32.xlu1 %v1381_v28, %s4025_s3 }
 0x9f0   :  { %v1368_v4 = vpop.permute.xlu1 %1367 }
 0x9f1   :  { %v1385_v6 = vmul.f32 %v4541_v42, %v1368_v4  ;;  %1405 = vrot.lane.b32.xlu0 %v1384_v39, %s4025_s3 }
 0x9f2   :  { %v1370_v24 = vpop.permute.xlu0 %1369 }
 0x9f3   :  { %v1386_v36 = vmul.f32 %v4545_v30, %v1370_v24  ;;  %1407 = vrot.lane.b32.xlu1 %v1385_v6, %s4025_s3 }
 0x9f5   :  { %1409 = vrot.lane.b32.xlu0 %v1386_v36, %s4025_s3 }
 0xa59   :  { %v1402_v27 = vpop.permute.xlu1 %1401 }
 0xa5a   :  { %v4553_v43 = vadd.f32 %v1402_v27, %v1342_v14 }
 0xa5b   :  { %v1398_v50 = vpop.permute.xlu0 %1397 }
 0xa5c   :  { %3604 = vtanh.f32 %v4553_v43  ;;  %v4558_v41 = vadd.f32 %v1398_v50, %v1340_v21 }
 0xa5d   :  { %v1396_v58 = vpop.permute.xlu1 %1395 }
 0xa5e   :  { %3606 = vtanh.f32 %v4558_v41  ;;  %v4563_v53 = vadd.f32 %v1396_v58, %v1339_v45 }
 0xa5f   :  { %v1404_v48 = vpop.permute.xlu0 %1403 }
 0xa60   :  { %3608 = vtanh.f32 %v4563_v53  ;;  %v4569_v29 = vadd.f32 %v1404_v48, %v1343_v51 }
 0xa61   :  { %v1400_v34 = vpop.permute.xlu1 %1399 }
 0xa62   :  { %3610 = vtanh.f32 %v4569_v29  ;;  %v4574_v3 = vadd.f32 %v1400_v34, %v1341_v52 }
 0xa63   :  { %v1406_v19 = vpop.permute.xlu0 %1405 }
 0xa64   :  { %3612 = vtanh.f32 %v4574_v3  ;;  %v4579_v9 = vadd.f32 %v1406_v19, %v1344_v46 }
 0xa65   :  { %v1408_v56 = vpop.permute.xlu1 %1407 }
 0xa66   :  { %3614 = vtanh.f32 %v4579_v9  ;;  %v4583_v11 = vadd.f32 %v1408_v56, %v1345_v62 }
 0xa67   :  { %v1410_v18 = vpop.permute.xlu0 %1409 }
 0xa68   :  { %3616 = vtanh.f32 %v4583_v11  ;;  %v4587_v55 = vadd.f32 %v1410_v18, %v1346_v20 }
 0xa69   :  { %v3605_v54 = vpop.eup %3604 }
 0xa6a   :  { %1449 = vrot.lane.b32.xlu1 %v3605_v54, %s4017_s10  ;;  %3618 = vtanh.f32 %v4587_v55 }
 0xa6b   :  { %v3607_v8 = vpop.eup %3606 }
 0xa6c   :  { %1445 = vrot.lane.b32.xlu0 %v3607_v8, %s4017_s10 }
 0xa6d   :  { %v3609_v10 = vpop.eup %3608 }
 0xa6e   :  { %1443 = vrot.lane.b32.xlu1 %v3609_v10, %s4017_s10 }
 0xa6f   :  { %v3611_v26 = vpop.eup %3610 }
 0xa70   :  { %1451 = vrot.lane.b32.xlu0 %v3611_v26, %s4017_s10 }
 0xa71   :  { %v3613_v60 = vpop.eup %3612 }
 0xa72   :  { %1447 = vrot.lane.b32.xlu1 %v3613_v60, %s4017_s10 }
 0xa73   :  { %v3615_v7 = vpop.eup %3614 }
 0xa74   :  { %1453 = vrot.lane.b32.xlu0 %v3615_v7, %s4017_s10 }
 0xa75   :  { %v3617_v28 = vpop.eup %3616 }
 0xa76   :  { %1455 = vrot.lane.b32.xlu1 %v3617_v28, %s4017_s10 }
 0xa77   :  { %v3619_v44 = vpop.eup %3618 }
 0xa78   :  { %1457 = vrot.lane.b32.xlu0 %v3619_v44, %s4017_s10 }
 0xadc   :  { %v1450_v39 = vpop.permute.xlu1 %1449 }
 0xadd   :  { %v1470_v59 = vmul.f32 %v4518_v2, %v1450_v39 }
 0xade   :  { %v1446_v4 = vpop.permute.xlu0 %1445 }
 0xadf   :  { %v1468_v6 = vmul.f32 %v4521_v49, %v1446_v4  ;;  %v1478_v48 = vpack.c.bf16 %v1470_v59, %v1470_v59 }
 0xae0   :  { %v1444_v24 = vpop.permute.xlu1 %1443 }
 0xae1   :  { %v1467_v36 = vmul.f32 %v4525_v22, %v1444_v24  ;;  %v1476_v47 = vpack.c.bf16 %v1468_v6, %v1468_v6  ;;  %v1494_v56 = vunpack.c.l.b16 %v1478_v48 }
 0xae2   :  { %v1452_v17 = vpop.permute.xlu0 %1451 }
 0xae3   :  { %v1475_v14 = vpack.c.bf16 %v1467_v36, %v1467_v36  ;;  %v1471_v27 = vmul.f32 %v4529_v15, %v1452_v17  ;;  %v1492_v58 = vunpack.c.l.b16 %v1476_v47 }
 0xae4   :  { %v1448_v50 = vpop.permute.xlu1 %1447 }
 0xae5   :  { %v1491_v21 = vunpack.c.l.b16 %v1475_v14  ;;  %v1479_v45 = vpack.c.bf16 %v1471_v27, %v1471_v27  ;;  %v1469_v57 = vmul.f32 %v4533_v5, %v1448_v50  ;;  %v1500_v46 = vrot.slane %v1492_v58, 2 }
 0xae6   :  { %v1454_v25 = vpop.permute.xlu0 %1453 }
 0xae7   :  { %v1477_v51 = vpack.c.bf16 %v1469_v57, %v1469_v57  ;;  %v1472_v49 = vmul.f32 %v4537_v61, %v1454_v25  ;;  %v1499_v32 = vrot.slane %v1491_v21, 3  ;;  %v1495_v22 = vunpack.c.l.b16 %v1479_v45 }
 0xae8   :  { %v1456_v52 = vpop.permute.xlu1 %1455 }
 0xae9   :  { %v1493_v34 = vunpack.c.l.b16 %v1477_v51  ;;  %v1480_v33 = vpack.c.bf16 %v1472_v49, %v1472_v49  ;;  %v1473_v15 = vmul.f32 %v4541_v42, %v1456_v52  ;;  %v1501_v20 = vsel %vm521_vm2, %v1500_v46, %v1499_v32 }
 0xaea   :  { %v1458_v2 = vpop.permute.xlu0 %1457  ;;  %v1505_v54 = vrot.slane %v1495_v22, 7 }
 0xaeb   :  { %v1502_v19 = vrot.slane %v1493_v34, 1  ;;  %v1496_v40 = vunpack.c.l.b16 %v1480_v33  ;;  %v1481_v62 = vpack.c.bf16 %v1473_v15, %v1473_v15  ;;  %v1474_v5 = vmul.f32 %v4545_v30, %v1458_v2 }
 0xaed   :  { %v1503_v61 = vsel %vm524_vm3, %v1502_v19, %v1501_v20  ;;  %v1507_v18 = vrot.slane %v1496_v40, 6  ;;  %v1497_v8 = vunpack.c.l.b16 %v1481_v62  ;;  %v1482_v10 = vpack.c.bf16 %v1474_v5, %v1474_v5 }
 0xaee   :  { %v1504_v26 = vsel %vm527_vm4, %v1494_v56, %v1503_v61 }
 0xaef   :  { %v1506_v42 = vsel %vm530_vm5, %v1505_v54, %v1504_v26  ;;  %v1509_v60 = vrot.slane %v1497_v8, 5  ;;  %v1498_v7 = vunpack.c.l.b16 %v1482_v10 }
 0xaf0   :  { %v1508_v28 = vsel %vm533_vm6, %v1507_v18, %v1506_v42 }
 0xaf1   :  { %v1510_v44 = vsel %vm536_vm7, %v1509_v60, %v1508_v28  ;;  %v1511_v30 = vrot.slane %v1498_v7, 4 }
 0xaf3   :  { %v1512_v39 = vsel %vm539_vm8, %v1511_v30, %v1510_v44 }
 0xaf4   :  { %v1513_v4 = vpack.c.b16 %v1512_v39, %v1512_v39 }
 0xaf6   :  { %1514 = vrot.lane.b32.xlu1 %v1513_v4, %s4025_s3 }
 0xb68   :  { %v1515_v6 = vpop.permute.xlu1 %1514 }
 0xb69   :  { %3283 = vmatmul.mubr.msk.bf16.vlgmr.msra.gmra.mxu0 %vm236_vm9, %v1515_v6 }
 0xb6a   :  { %3295 = vmatpush3.bf16.msra.mxu0 %v4373_v1  ;;  %3298 = vmatprep.mubr.msk.bf16.mxu0 %vm4023_vm0, %v4022_v0 }
 0xb6b   :  { %3296 = vmatprep.subr.bf16.mxu0 %v4022_v0 }
 0xb6e   :  { %3297 = vmatpush3.bf16.msra.mxu0 %v4498_v63 }
 0xb6f   :  { %3310 = vmatprep.subr.bf16.mxu0 %v4022_v0 }
 0xc29   :  { %v1553_v24 = vpop.f32.mrf.mxu0 }
 0xc2a   :  { %v1560_v36 = vrot.slane %v1553_v24, 4  ;;  %v1562_v59 = vrot.slane %v1553_v24, 6  ;;  %v1564_v21 = vrot.slane %v1553_v24, 1  ;;  %v1561_v50 = vrot.slane %v1553_v24, 5 }
 0xc2b   :  { %v3284_v47 = vpop.f32.mrf.mxu0  ;;  %v1579_v45 = vadd.f32 %v1553_v24, %v4145_v31  ;;  %v1565_v57 = vrot.slane %v1553_v24, 2  ;;  %v1563_v25 = vrot.slane %v1553_v24, 7  ;;  %v1566_v32 = vrot.slane %v1553_v24, 3 }
 0xc2c   :  { %v1575_v14 = vadd.f32 %v1560_v36, %v4133_v12  ;;  %v1577_v1 = vadd.f32 %v1562_v59, %v4135_v13  ;;  %v1580_v58 = vadd.f32 %v1564_v21, %v4152_v38  ;;  %v1576_v51 = vadd.f32 %v1561_v50, %v4140_v23 }
 0xc2d   :  { %v1556_v17 = vpop.f32.mrf.mxu0  ;;  %v1581_v48 = vadd.f32 %v1565_v57, %v4148_v35  ;;  %v1578_v22 = vadd.f32 %v1563_v25, %v4137_v16  ;;  %v1582_v52 = vadd.f32 %v1566_v32, %v4150_v37  ;;  %v3149_v56 = vmul.f32 -1.442695, %v1579_v45 }
 0xc2e   :  { %3620 = vtanh.f32 %v1575_v14  ;;  %v3145_v62 = vmul.f32 -1.442695, %v1575_v14  ;;  %v3147_v5 = vmul.f32 -1.442695, %v1577_v1  ;;  %v3150_v20 = vmul.f32 -1.442695, %v1580_v58 }
 0xc2f   :  { %v3285_v27 = vpop.f32.mrf.mxu0  ;;  %3622 = vtanh.f32 %v1577_v1  ;;  %v3146_v54 = vmul.f32 -1.442695, %v1576_v51  ;;  %v3151_v18 = vmul.f32 -1.442695, %v1581_v48  ;;  %v3148_v8 = vmul.f32 -1.442695, %v1578_v22 }
 0xc30   :  { %3624 = vtanh.f32 %v1579_v45  ;;  %v3152_v26 = vmul.f32 -1.442695, %v1582_v52 }
 0xc31   :  { %3626 = vtanh.f32 %v1580_v58 }
 0xc32   :  { %3628 = vtanh.f32 %v1576_v51 }
 0xc33   :  { %3630 = vtanh.f32 %v1581_v48 }
 0xc34   :  { %3632 = vtanh.f32 %v1578_v22 }
 0xc35   :  { %3634 = vtanh.f32 %v1582_v52 }
 0xc36   :  { %3636 = vpow2.f32 %v3145_v62 }
 0xc37   :  { %3638 = vpow2.f32 %v3147_v5 }
 0xc38   :  { %3640 = vpow2.f32 %v3149_v56  ;;  %v1647_v56 = vrot.slane %v4563_v53, 7 }
 0xc39   :  { %3642 = vpow2.f32 %v3150_v20 }
 0xc3a   :  { %3644 = vpow2.f32 %v3146_v54 }
 0xc3b   :  { %v3621_v49 = vpop.eup %3620  ;;  %3646 = vpow2.f32 %v3151_v18  ;;  %v1649_v18 = vrot.slane %v4574_v3, 7 }
 0xc3c   :  { %1679 = vrot.lane.b32.xlu0 %v3621_v49, %s4017_s10  ;;  %v3623_v34 = vpop.eup %3622  ;;  %3648 = vpow2.f32 %v3148_v8  ;;  %v1651_v8 = vrot.slane %v4569_v29, 7  ;;  %v1653_v29 = vrot.slane %v4583_v11, 7 }
 0xc3d   :  { %v3625_v33 = vpop.eup %3624 }
 0xc3e   :  { %1687 = vrot.lane.b32.xlu1 %v3625_v33, %s4017_s10  ;;  %v3627_v15 = vpop.eup %3626 }
 0xc3f   :  { %v3629_v46 = vpop.eup %3628 }
 0xc40   :  { %1683 = vrot.lane.b32.xlu0 %v3623_v34, %s4017_s10  ;;  %v3631_v2 = vpop.eup %3630 }
 0xc41   :  { %v3633_v19 = vpop.eup %3632 }
 0xc42   :  { %1681 = vrot.lane.b32.xlu1 %v3629_v46, %s4017_s10  ;;  %v3635_v40 = vpop.eup %3634 }
 0xc43   :  { %v3637_v61 = vpop.eup %3636 }
 0xc44   :  { %1689 = vrot.lane.b32.xlu0 %v3627_v15, %s4017_s10  ;;  %v1607_v10 = vadd.f32 1.0, %v3637_v61  ;;  %v3639_v42 = vpop.eup %3638 }
 0xc45   :  { %v3641_v60 = vpop.eup %3640  ;;  %v1609_v7 = vadd.f32 1.0, %v3639_v42  ;;  %v1652_v42 = vrot.slane %v4579_v9, 7 }
 0xc46   :  { %1685 = vrot.lane.b32.xlu1 %v3633_v19, %s4017_s10  ;;  %3650 = vrcp.f32 %v1607_v10  ;;  %v3643_v28 = vpop.eup %3642  ;;  %v1611_v44 = vadd.f32 1.0, %v3641_v60 }
 0xc47   :  { %3652 = vpow2.f32 %v3152_v26  ;;  %v3645_v30 = vpop.eup %3644  ;;  %v1612_v39 = vadd.f32 1.0, %v3643_v28  ;;  %v1648_v28 = vrot.slane %v4558_v41, 7 }
 0xc48   :  { %1691 = vrot.lane.b32.xlu0 %v3631_v2, %s4017_s10  ;;  %3654 = vrcp.f32 %v1609_v7  ;;  %v3647_v4 = vpop.eup %3646  ;;  %v1608_v24 = vadd.f32 1.0, %v3645_v30 }
 0xc49   :  { %v3649_v6 = vpop.eup %3648  ;;  %3656 = vrcp.f32 %v1611_v44  ;;  %v1613_v14 = vadd.f32 1.0, %v3647_v4 }
 0xc4a   :  { %1693 = vrot.lane.b32.xlu1 %v3635_v40, %s4017_s10  ;;  %3658 = vrcp.f32 %v1612_v39  ;;  %v1610_v27 = vadd.f32 1.0, %v3649_v6 }
 0xc4b   :  { %3660 = vrcp.f32 %v1608_v24  ;;  %v1650_v24 = vrot.slane %v4553_v43, 7 }
 0xc4c   :  { %3662 = vrcp.f32 %v1613_v14 }
 0xc4d   :  { %3664 = vrcp.f32 %v1610_v27 }
 0xc53   :  { %v4637_v36 = vpop.eup %3650 }
 0xc54   :  { %v3653_v59 = vpop.eup %3652  ;;  %v1663_v20 = vmul.f32 %v4637_v36, %v1647_v56 }
 0xc55   :  { %v1614_v21 = vadd.f32 1.0, %v3653_v59  ;;  %v4641_v1 = vpop.eup %3654  ;;  %v1654_v59 = vrot.slane %v4587_v55, 7 }
 0xc56   :  { %v4644_v57 = vpop.eup %3656  ;;  %v1665_v10 = vmul.f32 %v4641_v1, %v1649_v18 }
 0xc57   :  { %3666 = vrcp.f32 %v1614_v21  ;;  %v4648_v51 = vpop.eup %3658  ;;  %v1667_v60 = vmul.f32 %v4644_v57, %v1651_v8 }
 0xc58   :  { %v4652_v32 = vpop.eup %3660  ;;  %v1668_v3 = vmul.f32 %v4648_v51, %v1652_v42 }
 0xc59   :  { %v4656_v34 = vpop.eup %3662  ;;  %v1664_v9 = vmul.f32 %v4652_v32, %v1648_v28 }
 0xc5a   :  { %v4660_v46 = vpop.eup %3664 }
 0xc5b   :  { %v1666_v11 = vmul.f32 %v4660_v46, %v1650_v24 }
 0xc64   :  { %v4665_v40 = vpop.eup %3666 }
 0xc65   :  { %v1670_v43 = vmul.f32 %v4665_v40, %v1654_v59 }
 0xcae   :  { %v1680_v47 = vpop.permute.xlu0 %1679 }
 0xcaf   :  { %v1703_v17 = vmul.f32 %v4637_v36, %v1680_v47  ;;  %v1669_v47 = vmul.f32 %v4656_v34, %v1653_v29 }
 0xcb0   :  { %v1688_v58 = vpop.permute.xlu1 %1687 }
 0xcb1   :  { %1719 = vrot.lane.b32.xlu0 %v1703_v17, %s4025_s3  ;;  %v1707_v25 = vmul.f32 %v4644_v57, %v1688_v58 }
 0xcb2   :  { %v1684_v50 = vpop.permute.xlu0 %1683 }
 0xcb3   :  { %v1705_v45 = vmul.f32 %v4641_v1, %v1684_v50  ;;  %1727 = vrot.lane.b32.xlu1 %v1707_v25, %s4025_s3 }
 0xcb4   :  { %v1682_v22 = vpop.permute.xlu1 %1681 }
 0xcb5   :  { %1723 = vrot.lane.b32.xlu0 %v1705_v45, %s4025_s3  ;;  %v1704_v52 = vmul.f32 %v4652_v32, %v1682_v22 }
 0xcb6   :  { %v1690_v49 = vpop.permute.xlu0 %1689 }
 0xcb7   :  { %v1708_v48 = vmul.f32 %v4648_v51, %v1690_v49  ;;  %1721 = vrot.lane.b32.xlu1 %v1704_v52, %s4025_s3 }
 0xcb8   :  { %v1686_v2 = vpop.permute.xlu1 %1685 }
 0xcb9   :  { %1729 = vrot.lane.b32.xlu0 %v1708_v48, %s4025_s3  ;;  %v1706_v19 = vmul.f32 %v4660_v46, %v1686_v2 }
 0xcba   :  { %v1692_v33 = vpop.permute.xlu0 %1691 }
 0xcbb   :  { %v1709_v15 = vmul.f32 %v4656_v34, %v1692_v33  ;;  %1725 = vrot.lane.b32.xlu1 %v1706_v19, %s4025_s3 }
 0xcbc   :  { %v1694_v62 = vpop.permute.xlu1 %1693 }
 0xcbd   :  { %1731 = vrot.lane.b32.xlu0 %v1709_v15, %s4025_s3  ;;  %v1710_v5 = vmul.f32 %v4665_v40, %v1694_v62 }
 0xcbf   :  { %1733 = vrot.lane.b32.xlu1 %v1710_v5, %s4025_s3 }
 0xd23   :  { %v1720_v54 = vpop.permute.xlu0 %1719 }
 0xd24   :  { %v4671_v61 = vadd.f32 %v1720_v54, %v1663_v20 }
 0xd25   :  { %v1728_v53 = vpop.permute.xlu1 %1727 }
 0xd26   :  { %3668 = vtanh.f32 %v4671_v61  ;;  %v4682_v44 = vadd.f32 %v1728_v53, %v1667_v60 }
 0xd27   :  { %v1724_v26 = vpop.permute.xlu0 %1723 }
 0xd28   :  { %v4679_v7 = vadd.f32 %v1724_v26, %v1665_v10 }
 0xd29   :  { %v1722_v6 = vpop.permute.xlu1 %1721 }
 0xd2a   :  { %3670 = vtanh.f32 %v4679_v7  ;;  %v4692_v41 = vadd.f32 %v1722_v6, %v1664_v9 }
 0xd2b   :  { %v1730_v30 = vpop.permute.xlu0 %1729  ;;  %3672 = vtanh.f32 %v4682_v44 }
 0xd2c   :  { %v4689_v39 = vadd.f32 %v1730_v30, %v1668_v3 }
 0xd2d   :  { %v1726_v27 = vpop.permute.xlu1 %1725 }
 0xd2e   :  { %3674 = vtanh.f32 %v4689_v39  ;;  %v4702_v21 = vadd.f32 %v1726_v27, %v1666_v11 }
 0xd2f   :  { %v1732_v14 = vpop.permute.xlu0 %1731  ;;  %3676 = vtanh.f32 %v4692_v41 }
 0xd30   :  { %v4699_v17 = vadd.f32 %v1732_v14, %v1669_v47 }
 0xd31   :  { %v1734_v50 = vpop.permute.xlu1 %1733 }
 0xd32   :  { %3678 = vtanh.f32 %v4699_v17  ;;  %v4707_v45 = vadd.f32 %v1734_v50, %v1670_v43 }
 0xd33   :  { %v3669_v4 = vpop.eup %3668  ;;  %3680 = vtanh.f32 %v4702_v21 }
 0xd34   :  { %1767 = vrot.lane.b32.xlu0 %v3669_v4, %s4017_s10  ;;  %3682 = vtanh.f32 %v4707_v45 }
 0xd37   :  { %v3671_v58 = vpop.eup %3670 }
 0xd38   :  { %1771 = vrot.lane.b32.xlu0 %v3671_v58, %s4017_s10  ;;  %v3673_v25 = vpop.eup %3672 }
 0xd39   :  { %1775 = vrot.lane.b32.xlu1 %v3673_v25, %s4017_s10 }
 0xd3b   :  { %v3675_v55 = vpop.eup %3674 }
 0xd3c   :  { %1777 = vrot.lane.b32.xlu0 %v3675_v55, %s4017_s10  ;;  %v3677_v49 = vpop.eup %3676 }
 0xd3d   :  { %1769 = vrot.lane.b32.xlu1 %v3677_v49, %s4017_s10 }
 0xd3f   :  { %v3679_v48 = vpop.eup %3678 }
 0xd40   :  { %1779 = vrot.lane.b32.xlu0 %v3679_v48, %s4017_s10  ;;  %v3681_v22 = vpop.eup %3680 }
 0xd41   :  { %1773 = vrot.lane.b32.xlu1 %v3681_v22, %s4017_s10  ;;  %v3683_v52 = vpop.eup %3682 }
 0xd45   :  { %1781 = vrot.lane.b32.xlu1 %v3683_v52, %s4017_s10 }
 0xda6   :  { %v1768_v33 = vpop.permute.xlu0 %1767 }
 0xda7   :  { %v1791_v2 = vmul.f32 %v4637_v36, %v1768_v33 }
 0xda9   :  { %v1799_v20 = vpack.c.bf16 %v1791_v2, %v1791_v2  ;;  %v3886_v2 = vld [vmem:[#allocation7 + $0x8] sm:$0xff]  }
 0xdaa   :  { %v1772_v15 = vpop.permute.xlu0 %1771 }
 0xdab   :  { %v1793_v19 = vmul.f32 %v4641_v1, %v1772_v15  ;;  %v1776_v62 = vpop.permute.xlu1 %1775  ;;  %v1815_v42 = vunpack.c.l.b16 %v1799_v20 }
 0xdac   :  { %v1795_v36 = vmul.f32 %v4644_v57, %v1776_v62 }
 0xdad   :  { %v1801_v5 = vpack.c.bf16 %v1793_v19, %v1793_v19  ;;  %v1823_v4 = vrot.slane %v1815_v42, 4 }
 0xdae   :  { %v1778_v56 = vpop.permute.xlu0 %1777 }
 0xdaf   :  { %v1796_v54 = vmul.f32 %v4648_v51, %v1778_v56  ;;  %v1770_v18 = vpop.permute.xlu1 %1769  ;;  %v1817_v10 = vunpack.c.l.b16 %v1801_v5 }
 0xdb0   :  { %v1792_v8 = vmul.f32 %v4652_v32, %v1770_v18  ;;  %v1803_v32 = vpack.c.bf16 %v1795_v36, %v1795_v36 }
 0xdb1   :  { %v1804_v53 = vpack.c.bf16 %v1796_v54, %v1796_v54  ;;  %v1826_v9 = vrot.slane %v1817_v10, 2 }
 0xdb2   :  { %v1780_v26 = vpop.permute.xlu0 %1779  ;;  %v1800_v60 = vpack.c.bf16 %v1792_v8, %v1792_v8 }
 0xdb3   :  { %v1797_v28 = vmul.f32 %v4656_v34, %v1780_v26  ;;  %v1774_v3 = vpop.permute.xlu1 %1773  ;;  %v1820_v24 = vunpack.c.l.b16 %v1804_v53 }
 0xdb4   :  { %v1816_v1 = vunpack.c.l.b16 %v1800_v60  ;;  %v1794_v30 = vmul.f32 %v4660_v46, %v1774_v3  ;;  %v1819_v46 = vunpack.c.l.b16 %v1803_v32 }
 0xdb5   :  { %v1805_v29 = vpack.c.bf16 %v1797_v28, %v1797_v28  ;;  %v1831_v43 = vrot.slane %v1820_v24, 7 }
 0xdb6   :  { %v1824_v51 = vrot.slane %v1816_v1, 3  ;;  %v1802_v6 = vpack.c.bf16 %v1794_v30, %v1794_v30 }
 0xdb7   :  { %v1782_v47 = vpop.permute.xlu1 %1781  ;;  %v1821_v14 = vunpack.c.l.b16 %v1805_v29 }
 0xdb8   :  { %v1825_v11 = vsel %vm521_vm2, %v1824_v51, %v1823_v4  ;;  %v1818_v27 = vunpack.c.l.b16 %v1802_v6  ;;  %v1798_v34 = vmul.f32 %v4665_v40, %v1782_v47 }
 0xdb9   :  { %v1827_v57 = vsel %vm524_vm3, %v1826_v9, %v1825_v11  ;;  %v1833_v58 = vrot.slane %v1821_v14, 6 }
 0xdba   :  { %v1828_v59 = vrot.slane %v1818_v27, 1  ;;  %v1806_v50 = vpack.c.bf16 %v1798_v34, %v1798_v34 }
 0xdbc   :  { %v1829_v25 = vsel %vm527_vm4, %v1828_v59, %v1827_v57  ;;  %v1822_v55 = vunpack.c.l.b16 %v1806_v50 }
 0xdbd   :  { %v1830_v49 = vsel %vm530_vm5, %v1819_v46, %v1829_v25 }
 0xdbe   :  { %v1832_v48 = vsel %vm533_vm6, %v1831_v43, %v1830_v49  ;;  %v1835_v22 = vrot.slane %v1822_v55, 5 }
 0xdbf   :  { %v1834_v52 = vsel %vm536_vm7, %v1833_v58, %v1832_v48 }
 0xdc0   :  { %v1836_v33 = vsel %vm539_vm8, %v1835_v22, %v1834_v52 }
 0xdc1   :  { %v1837_v40 = vpack.c.b16 %v1836_v33, %v1836_v33 }
 0xdc3   :  { %1838 = vrot.lane.b32.xlu0 %v1837_v40, %s4025_s3 }
 0xe35   :  { %v1839_v15 = vpop.permute.xlu0 %1838 }
 0xe36   :  { %3291 = vmatmul.mubr.msk.bf16.vlgmr.msra.gmra.mxu1 %vm236_vm9, %v1839_v15 }
 0xe37   :  { %3303 = vmatpush3.bf16.msra.mxu1 %v3886_v2  ;;  %3306 = vmatprep.mubr.msk.bf16.mxu1 %vm4023_vm0, %v4022_v0 }
 0xe38   :  { %3304 = vmatprep.subr.bf16.mxu1 %v4022_v0 }
 0xe3b   :  { %3305 = vmatpush3.bf16.msra.mxu1 %v4498_v63 }
 0xe3c   :  { %3316 = vmatprep.subr.bf16.mxu1 %v4022_v0 }
 0xef6   :  { %v1877_v19 = vpop.f32.mrf.mxu1 }
 0xef7   :  { %v1884_v62 = vrot.slane %v1877_v19, 3  ;;  %v1885_v54 = vrot.slane %v1877_v19, 4  ;;  %v1886_v8 = vrot.slane %v1877_v19, 5  ;;  %v1887_v10 = vrot.slane %v1877_v19, 6 }
 0xef8   :  { %v3292_v5 = vpop.f32.mrf.mxu1  ;;  %v1888_v42 = vrot.slane %v1877_v19, 7  ;;  %v1889_v53 = vrot.slane %v1877_v19, 1  ;;  %v1890_v3 = vrot.slane %v1877_v19, 2  ;;  %v1904_v30 = vadd.f32 %v1877_v19, %v4152_v38 }
 0xef9   :  { %v1899_v56 = vadd.f32 %v1884_v62, %v4133_v12  ;;  %v1900_v26 = vadd.f32 %v1885_v54, %v4140_v23  ;;  %v1901_v60 = vadd.f32 %v1886_v8, %v4135_v13  ;;  %v1902_v63 = vadd.f32 %v1887_v10, %v4137_v16 }
 0xefa   :  { %v1880_v20 = vpop.f32.mrf.mxu1  ;;  %v1903_v28 = vadd.f32 %v1888_v42, %v4145_v31  ;;  %v1905_v1 = vadd.f32 %v1889_v53, %v4148_v35  ;;  %v1906_v29 = vadd.f32 %v1890_v3, %v4150_v37  ;;  %v3159_v50 = vmul.f32 -1.442695, %v1904_v30 }
 0xefb   :  { %3684 = vtanh.f32 %v1899_v56  ;;  %v3154_v14 = vmul.f32 -1.442695, %v1899_v56  ;;  %v3155_v11 = vmul.f32 -1.442695, %v1900_v26  ;;  %v3156_v27 = vmul.f32 -1.442695, %v1901_v60 }
 0xefc   :  { %v3293_v18 = vpop.f32.mrf.mxu1  ;;  %3686 = vtanh.f32 %v1900_v26  ;;  %v3157_v34 = vmul.f32 -1.442695, %v1902_v63  ;;  %v3158_v57 = vmul.f32 -1.442695, %v1903_v28  ;;  %v3160_v43 = vmul.f32 -1.442695, %v1905_v1 }
 0xefd   :  { %3688 = vtanh.f32 %v1901_v60  ;;  %v3161_v58 = vmul.f32 -1.442695, %v1906_v29 }
 0xefe   :  { %3690 = vtanh.f32 %v1902_v63 }
 0xeff   :  { %3692 = vtanh.f32 %v1903_v28 }
 0xf00   :  { %3694 = vtanh.f32 %v1905_v1 }
 0xf01   :  { %3696 = vtanh.f32 %v1904_v30 }
 0xf02   :  { %3698 = vtanh.f32 %v1906_v29 }
 0xf03   :  { %3700 = vpow2.f32 %v3154_v14 }
 0xf04   :  { %3702 = vpow2.f32 %v3155_v11  ;;  %v1971_v11 = vrot.slane %v4671_v61, 7 }
 0xf05   :  { %3704 = vpow2.f32 %v3156_v27 }
 0xf06   :  { %3706 = vpow2.f32 %v3157_v34 }
 0xf07   :  { %3708 = vpow2.f32 %v3158_v57 }
 0xf08   :  { %v3685_v36 = vpop.eup %3684  ;;  %3710 = vpow2.f32 %v3160_v43  ;;  %v1973_v43 = vrot.slane %v4679_v7, 7 }
 0xf09   :  { %2003 = vrot.lane.b32.xlu1 %v3685_v36, %s4017_s10  ;;  %v3687_v9 = vpop.eup %3686  ;;  %3712 = vpow2.f32 %v3159_v50 }
 0xf0a   :  { %v3689_v4 = vpop.eup %3688  ;;  %2005 = vrot.lane.b32.xlu0 %v3687_v9, %s4017_s10 }
 0xf0b   :  { %v3691_v51 = vpop.eup %3690 }
 0xf0c   :  { %v3693_v6 = vpop.eup %3692 }
 0xf0d   :  { %2007 = vrot.lane.b32.xlu1 %v3689_v4, %s4017_s10  ;;  %v3695_v24 = vpop.eup %3694 }
 0xf0e   :  { %2009 = vrot.lane.b32.xlu0 %v3691_v51, %s4017_s10  ;;  %v3697_v32 = vpop.eup %3696 }
 0xf0f   :  { %v3699_v47 = vpop.eup %3698 }
 0xf10   :  { %v3701_v59 = vpop.eup %3700 }
 0xf11   :  { %2011 = vrot.lane.b32.xlu1 %v3693_v6, %s4017_s10  ;;  %v1931_v46 = vadd.f32 1.0, %v3701_v59  ;;  %v3703_v25 = vpop.eup %3702  ;;  %v1972_v59 = vrot.slane %v4692_v41, 7 }
 0xf12   :  { %2015 = vrot.lane.b32.xlu0 %v3695_v24, %s4017_s10  ;;  %v3705_v55 = vpop.eup %3704  ;;  %v1932_v49 = vadd.f32 1.0, %v3703_v25  ;;  %v1974_v25 = vrot.slane %v4702_v21, 7 }
 0xf13   :  { %3714 = vrcp.f32 %v1931_v46  ;;  %v3707_v48 = vpop.eup %3706  ;;  %v1933_v22 = vadd.f32 1.0, %v3705_v55 }
 0xf14   :  { %3716 = vpow2.f32 %v3161_v58  ;;  %v3709_v52 = vpop.eup %3708  ;;  %v1934_v33 = vadd.f32 1.0, %v3707_v48 }
 0xf15   :  { %2013 = vrot.lane.b32.xlu1 %v3697_v32, %s4017_s10  ;;  %3718 = vrcp.f32 %v1932_v49  ;;  %v3711_v40 = vpop.eup %3710  ;;  %v1935_v15 = vadd.f32 1.0, %v3709_v52  ;;  %v1975_v49 = vrot.slane %v4682_v44, 7  ;;  %v1977_v52 = vrot.slane %v4699_v17, 7 }
 0xf16   :  { %2017 = vrot.lane.b32.xlu0 %v3699_v47, %s4017_s10  ;;  %3720 = vrcp.f32 %v1933_v22  ;;  %v3713_v2 = vpop.eup %3712  ;;  %v1937_v62 = vadd.f32 1.0, %v3711_v40  ;;  %v1976_v40 = vrot.slane %v4689_v39, 7  ;;  %v1978_v17 = vrot.slane %v4707_v45, 7 }
 0xf17   :  { %3722 = vrcp.f32 %v1934_v33  ;;  %v1936_v20 = vadd.f32 1.0, %v3713_v2 }
 0xf18   :  { %3724 = vrcp.f32 %v1935_v15 }
 0xf19   :  { %3726 = vrcp.f32 %v1937_v62 }
 0xf1a   :  { %3728 = vrcp.f32 %v1936_v20 }
 0xf20   :  { %v4755_v19 = vpop.eup %3714 }
 0xf21   :  { %v3717_v56 = vpop.eup %3716  ;;  %v1987_v27 = vmul.f32 %v4755_v19, %v1971_v11 }
 0xf22   :  { %v1938_v18 = vadd.f32 1.0, %v3717_v56  ;;  %v4759_v8 = vpop.eup %3718 }
 0xf23   :  { %v4761_v26 = vpop.eup %3720  ;;  %v1988_v50 = vmul.f32 %v4759_v8, %v1972_v59 }
 0xf24   :  { %3730 = vrcp.f32 %v1938_v18  ;;  %v4766_v63 = vpop.eup %3722  ;;  %v1989_v58 = vmul.f32 %v4761_v26, %v1973_v43 }
 0xf25   :  { %v4769_v36 = vpop.eup %3724  ;;  %v1990_v41 = vmul.f32 %v4766_v63, %v1974_v25 }
 0xf26   :  { %v4774_v29 = vpop.eup %3726  ;;  %v1991_v7 = vmul.f32 %v4769_v36, %v1975_v49 }
 0xf27   :  { %v4777_v4 = vpop.eup %3728  ;;  %v1993_v2 = vmul.f32 %v4774_v29, %v1977_v52 }
 0xf31   :  { %v4782_v32 = vpop.eup %3730 }
 0xf7b   :  { %v2004_v5 = vpop.permute.xlu1 %2003 }
 0xf7c   :  { %v2027_v54 = vmul.f32 %v4755_v19, %v2004_v5  ;;  %v2006_v10 = vpop.permute.xlu0 %2005  ;;  %v1992_v5 = vmul.f32 %v4777_v4, %v1976_v40 }
 0xf7d   :  { %v2028_v42 = vmul.f32 %v4759_v8, %v2006_v10 }
 0xf7e   :  { %2043 = vrot.lane.b32.xlu1 %v2027_v54, %s4025_s3  ;;  %v1994_v54 = vmul.f32 %v4782_v32, %v1978_v17 }
 0xf7f   :  { %v2008_v60 = vpop.permute.xlu1 %2007  ;;  %2045 = vrot.lane.b32.xlu0 %v2028_v42, %s4025_s3 }
 0xf80   :  { %v2029_v53 = vmul.f32 %v4761_v26, %v2008_v60  ;;  %v2010_v28 = vpop.permute.xlu0 %2009 }
 0xf81   :  { %v2030_v3 = vmul.f32 %v4766_v63, %v2010_v28 }
 0xf82   :  { %2047 = vrot.lane.b32.xlu1 %v2029_v53, %s4025_s3 }
 0xf83   :  { %v2012_v1 = vpop.permute.xlu1 %2011  ;;  %2049 = vrot.lane.b32.xlu0 %v2030_v3, %s4025_s3 }
 0xf84   :  { %v2031_v30 = vmul.f32 %v4769_v36, %v2012_v1  ;;  %v2016_v9 = vpop.permute.xlu0 %2015 }
 0xf85   :  { %v2033_v51 = vmul.f32 %v4774_v29, %v2016_v9 }
 0xf86   :  { %2051 = vrot.lane.b32.xlu1 %v2031_v30, %s4025_s3 }
 0xf87   :  { %v2014_v6 = vpop.permute.xlu1 %2013  ;;  %2055 = vrot.lane.b32.xlu0 %v2033_v51, %s4025_s3 }
 0xf88   :  { %v2032_v24 = vmul.f32 %v4777_v4, %v2014_v6  ;;  %v2018_v47 = vpop.permute.xlu0 %2017 }
 0xf89   :  { %v2034_v14 = vmul.f32 %v4782_v32, %v2018_v47 }
 0xf8a   :  { %2053 = vrot.lane.b32.xlu1 %v2032_v24, %s4025_s3 }
 0xf8b   :  { %2057 = vrot.lane.b32.xlu0 %v2034_v14, %s4025_s3 }
 0xff0   :  { %v2044_v34 = vpop.permute.xlu1 %2043 }
 0xff1   :  { %v4789_v57 = vadd.f32 %v2044_v34, %v1987_v27  ;;  %v2046_v46 = vpop.permute.xlu0 %2045 }
 0xff2   :  { %v4797_v55 = vadd.f32 %v2046_v46, %v1988_v50 }
 0xff3   :  { %3732 = vtanh.f32 %v4789_v57 }
 0xff4   :  { %v2048_v61 = vpop.permute.xlu1 %2047  ;;  %3734 = vtanh.f32 %v4797_v55 }
 0xff5   :  { %v4800_v48 = vadd.f32 %v2048_v61, %v1989_v58  ;;  %v2050_v22 = vpop.permute.xlu0 %2049 }
 0xff6   :  { %v4807_v33 = vadd.f32 %v2050_v22, %v1990_v41 }
 0xff7   :  { %3736 = vtanh.f32 %v4800_v48 }
 0xff8   :  { %v2052_v21 = vpop.permute.xlu1 %2051  ;;  %3738 = vtanh.f32 %v4807_v33 }
 0xff9   :  { %v4810_v15 = vadd.f32 %v2052_v21, %v1991_v7  ;;  %v2056_v62 = vpop.permute.xlu0 %2055 }
 0xffa   :  { %v4818_v56 = vadd.f32 %v2056_v62, %v1993_v2 }
 0xffb   :  { %3740 = vtanh.f32 %v4810_v15 }
 0xffc   :  { %v2054_v20 = vpop.permute.xlu1 %2053  ;;  %3742 = vtanh.f32 %v4818_v56 }
 0xffd   :  { %v4820_v39 = vadd.f32 %v2054_v20, %v1992_v5  ;;  %v2058_v18 = vpop.permute.xlu0 %2057 }
 0xffe   :  { %v4825_v10 = vadd.f32 %v2058_v18, %v1994_v54 }
 0xfff   :  { %3744 = vtanh.f32 %v4820_v39 }
0x1000   :  { %v3733_v44 = vpop.eup %3732  ;;  %3746 = vtanh.f32 %v4825_v10 }
0x1001   :  { %2091 = vrot.lane.b32.xlu1 %v3733_v44, %s4017_s10  ;;  %v3735_v42 = vpop.eup %3734 }
0x1002   :  { %2093 = vrot.lane.b32.xlu0 %v3735_v42, %s4017_s10 }
0x1004   :  { %v3737_v60 = vpop.eup %3736 }
0x1005   :  { %2095 = vrot.lane.b32.xlu1 %v3737_v60, %s4017_s10  ;;  %v3739_v45 = vpop.eup %3738 }
0x1006   :  { %2097 = vrot.lane.b32.xlu0 %v3739_v45, %s4017_s10 }
0x1008   :  { %v3741_v53 = vpop.eup %3740 }
0x1009   :  { %2099 = vrot.lane.b32.xlu1 %v3741_v53, %s4017_s10  ;;  %v3743_v28 = vpop.eup %3742 }
0x100a   :  { %2103 = vrot.lane.b32.xlu0 %v3743_v28, %s4017_s10 }
0x100c   :  { %v3745_v3 = vpop.eup %3744 }
0x100d   :  { %2101 = vrot.lane.b32.xlu1 %v3745_v3, %s4017_s10  ;;  %v3747_v1 = vpop.eup %3746 }
0x100e   :  { %2105 = vrot.lane.b32.xlu0 %v3747_v1, %s4017_s10 }
0x1073   :  { %v2092_v30 = vpop.permute.xlu1 %2091 }
0x1074   :  { %v2115_v9 = vmul.f32 %v4755_v19, %v2092_v30  ;;  %v2094_v6 = vpop.permute.xlu0 %2093 }
0x1075   :  { %v2116_v24 = vmul.f32 %v4759_v8, %v2094_v6 }
0x1076   :  { %v2123_v51 = vpack.c.bf16 %v2115_v9, %v2115_v9 }
0x1077   :  { %v2096_v14 = vpop.permute.xlu1 %2095  ;;  %v2124_v27 = vpack.c.bf16 %v2116_v24, %v2116_v24 }
0x1078   :  { %v2139_v47 = vunpack.c.l.b16 %v2123_v51  ;;  %v2117_v11 = vmul.f32 %v4761_v26, %v2096_v14  ;;  %v2098_v34 = vpop.permute.xlu0 %2097 }
0x1079   :  { %v2140_v43 = vunpack.c.l.b16 %v2124_v27  ;;  %v2118_v46 = vmul.f32 %v4766_v63, %v2098_v34 }
0x107a   :  { %v2125_v59 = vpack.c.bf16 %v2117_v11, %v2117_v11  ;;  %v2147_v50 = vrot.slane %v2139_v47, 5 }
0x107b   :  { %v2100_v58 = vpop.permute.xlu1 %2099  ;;  %v2148_v19 = vrot.slane %v2140_v43, 4  ;;  %v2126_v49 = vpack.c.bf16 %v2118_v46, %v2118_v46 }
0x107c   :  { %v2141_v25 = vunpack.c.l.b16 %v2125_v59  ;;  %v2119_v61 = vmul.f32 %v4769_v36, %v2100_v58  ;;  %v2104_v22 = vpop.permute.xlu0 %2103 }
0x107d   :  { %v2149_v7 = vsel %vm521_vm2, %v2148_v19, %v2147_v50  ;;  %v2142_v52 = vunpack.c.l.b16 %v2126_v49  ;;  %v2121_v26 = vmul.f32 %v4774_v29, %v2104_v22 }
0x107e   :  { %v2150_v41 = vrot.slane %v2141_v25, 3  ;;  %v2127_v8 = vpack.c.bf16 %v2119_v61, %v2119_v61 }
0x107f   :  { %v2102_v21 = vpop.permute.xlu1 %2101  ;;  %v2152_v2 = vrot.slane %v2142_v52, 2  ;;  %v2129_v62 = vpack.c.bf16 %v2121_v26, %v2121_v26 }
0x1080   :  { %v2151_v40 = vsel %vm524_vm3, %v2150_v41, %v2149_v7  ;;  %v2143_v44 = vunpack.c.l.b16 %v2127_v8  ;;  %v2120_v63 = vmul.f32 %v4777_v4, %v2102_v21  ;;  %v2106_v36 = vpop.permute.xlu0 %2105 }
0x1081   :  { %v2145_v20 = vunpack.c.l.b16 %v2129_v62  ;;  %v2153_v54 = vsel %vm527_vm4, %v2152_v2, %v2151_v40  ;;  %v2122_v18 = vmul.f32 %v4782_v32, %v2106_v36 }
0x1082   :  { %v2154_v5 = vrot.slane %v2143_v44, 1  ;;  %v2128_v17 = vpack.c.bf16 %v2120_v63, %v2120_v63 }
0x1083   :  { %v2130_v29 = vpack.c.bf16 %v2122_v18, %v2122_v18  ;;  %v2157_v45 = vrot.slane %v2145_v20, 7 }
0x1084   :  { %v2155_v42 = vsel %vm530_vm5, %v2154_v5, %v2153_v54  ;;  %v2144_v60 = vunpack.c.l.b16 %v2128_v17 }
0x1085   :  { %v2146_v28 = vunpack.c.l.b16 %v2130_v29 }
0x1086   :  { %v2156_v53 = vsel %vm533_vm6, %v2144_v60, %v2155_v42 }
0x1087   :  { %v2158_v4 = vsel %vm536_vm7, %v2157_v45, %v2156_v53  ;;  %v2159_v3 = vrot.slane %v2146_v28, 6 }
0x1089   :  { %v2160_v1 = vsel %vm539_vm8, %v2159_v3, %v2158_v4 }
0x108a   :  { %v2161_v30 = vpack.c.b16 %v2160_v1, %v2160_v1 }
0x108c   :  { %2162 = vrot.lane.b32.xlu1 %v2161_v30, %s4025_s3 }
0x10fe   :  { %v2163_v9 = vpop.permute.xlu1 %2162 }
0x10ff   :  { %3299 = vmatmul.mubr.msk.bf16.vlgmr.msra.gmra.mxu0 %vm236_vm9, %v2163_v9 }
0x1100   :  { %3312 = vmatprep.mubr.msk.bf16.mxu0 %vm4023_vm0, %v4022_v0 }
0x11bf   :  { %v2201_v32 = vpop.f32.mrf.mxu0 }
0x11c0   :  { %v2208_v51 = vrot.slane %v2201_v32, 2  ;;  %v2209_v14 = vrot.slane %v2201_v32, 3  ;;  %v2210_v27 = vrot.slane %v2201_v32, 4  ;;  %v2211_v34 = vrot.slane %v2201_v32, 5 }
0x11c1   :  { %v3300_v6 = vpop.f32.mrf.mxu0  ;;  %v2212_v43 = vrot.slane %v2201_v32, 6  ;;  %v2213_v46 = vrot.slane %v2201_v32, 7  ;;  %v2214_v25 = vrot.slane %v2201_v32, 1  ;;  %v2229_v22 = vadd.f32 %v2201_v32, %v4148_v35 }
0x11c2   :  { %v2223_v24 = vadd.f32 %v2208_v51, %v4133_v12  ;;  %v2224_v59 = vadd.f32 %v2209_v14, %v4140_v23  ;;  %v2225_v50 = vadd.f32 %v2210_v27, %v4135_v13  ;;  %v2226_v58 = vadd.f32 %v2211_v34, %v4137_v16 }
0x11c3   :  { %v2204_v47 = vpop.f32.mrf.mxu0  ;;  %v2227_v61 = vadd.f32 %v2212_v43, %v4145_v31  ;;  %v2228_v49 = vadd.f32 %v2213_v46, %v4152_v38  ;;  %v2230_v41 = vadd.f32 %v2214_v25, %v4150_v37  ;;  %v3169_v42 = vmul.f32 -1.442695, %v2229_v22 }
0x11c4   :  { %3748 = vtanh.f32 %v2223_v24  ;;  %v3163_v63 = vmul.f32 -1.442695, %v2223_v24  ;;  %v3164_v2 = vmul.f32 -1.442695, %v2224_v59  ;;  %v3165_v62 = vmul.f32 -1.442695, %v2225_v50 }
0x11c5   :  { %v3301_v11 = vpop.f32.mrf.mxu0  ;;  %3750 = vtanh.f32 %v2224_v59  ;;  %v3166_v5 = vmul.f32 -1.442695, %v2226_v58  ;;  %v3167_v36 = vmul.f32 -1.442695, %v2227_v61  ;;  %v3168_v20 = vmul.f32 -1.442695, %v2228_v49 }
0x11c6   :  { %3752 = vtanh.f32 %v2225_v50  ;;  %v3170_v54 = vmul.f32 -1.442695, %v2230_v41 }
0x11c7   :  { %3754 = vtanh.f32 %v2226_v58 }
0x11c8   :  { %3756 = vtanh.f32 %v2227_v61 }
0x11c9   :  { %3758 = vtanh.f32 %v2228_v49 }
0x11ca   :  { %3760 = vtanh.f32 %v2230_v41 }
0x11cb   :  { %3762 = vtanh.f32 %v2229_v22 }
0x11cc   :  { %3764 = vpow2.f32 %v3163_v63 }
0x11cd   :  { %3766 = vpow2.f32 %v3164_v2  ;;  %v2295_v2 = vrot.slane %v4789_v57, 7 }
0x11ce   :  { %3768 = vpow2.f32 %v3165_v62 }
0x11cf   :  { %3770 = vpow2.f32 %v3166_v5 }
0x11d0   :  { %3772 = vpow2.f32 %v3167_v36 }
0x11d1   :  { %v3749_v19 = vpop.eup %3748  ;;  %3774 = vpow2.f32 %v3168_v20  ;;  %v2297_v20 = vrot.slane %v4800_v48, 7 }
0x11d2   :  { %2327 = vrot.lane.b32.xlu0 %v3749_v19, %s4017_s10  ;;  %v3751_v8 = vpop.eup %3750  ;;  %3776 = vpow2.f32 %v3170_v54 }
0x11d3   :  { %v3753_v7 = vpop.eup %3752  ;;  %2329 = vrot.lane.b32.xlu1 %v3751_v8, %s4017_s10 }
0x11d4   :  { %v3755_v52 = vpop.eup %3754 }
0x11d5   :  { %v3757_v26 = vpop.eup %3756 }
0x11d6   :  { %2331 = vrot.lane.b32.xlu0 %v3753_v7, %s4017_s10  ;;  %v3759_v21 = vpop.eup %3758 }
0x11d7   :  { %2333 = vrot.lane.b32.xlu1 %v3755_v52, %s4017_s10  ;;  %v3761_v40 = vpop.eup %3760 }
0x11d8   :  { %v3763_v44 = vpop.eup %3762 }
0x11d9   :  { %v3765_v17 = vpop.eup %3764 }
0x11da   :  { %2335 = vrot.lane.b32.xlu0 %v3757_v26, %s4017_s10  ;;  %v2255_v18 = vadd.f32 1.0, %v3765_v17  ;;  %v3767_v60 = vpop.eup %3766  ;;  %v2296_v17 = vrot.slane %v4797_v55, 7 }
0x11db   :  { %2337 = vrot.lane.b32.xlu1 %v3759_v21, %s4017_s10  ;;  %v3769_v29 = vpop.eup %3768  ;;  %v2256_v45 = vadd.f32 1.0, %v3767_v60  ;;  %v2298_v60 = vrot.slane %v4807_v33, 7 }
0x11dc   :  { %3778 = vrcp.f32 %v2255_v18  ;;  %v3771_v53 = vpop.eup %3770  ;;  %v2257_v28 = vadd.f32 1.0, %v3769_v29 }
0x11dd   :  { %3780 = vpow2.f32 %v3169_v42  ;;  %v3773_v4 = vpop.eup %3772  ;;  %v2258_v3 = vadd.f32 1.0, %v3771_v53 }
0x11de   :  { %2341 = vrot.lane.b32.xlu0 %v3761_v40, %s4017_s10  ;;  %3782 = vrcp.f32 %v2256_v45  ;;  %v3775_v1 = vpop.eup %3774  ;;  %v2259_v30 = vadd.f32 1.0, %v3773_v4  ;;  %v2299_v45 = vrot.slane %v4810_v15, 7  ;;  %v2300_v4 = vrot.slane %v4820_v39, 7 }
0x11df   :  { %2339 = vrot.lane.b32.xlu1 %v3763_v44, %s4017_s10  ;;  %3784 = vrcp.f32 %v2257_v28  ;;  %v3777_v9 = vpop.eup %3776  ;;  %v2260_v51 = vadd.f32 1.0, %v3775_v1  ;;  %v2302_v1 = vrot.slane %v4825_v10, 7  ;;  %v2301_v39 = vrot.slane %v4818_v56, 7 }
0x11e0   :  { %3786 = vrcp.f32 %v2258_v3  ;;  %v2262_v47 = vadd.f32 1.0, %v3777_v9 }
0x11e1   :  { %3788 = vrcp.f32 %v2259_v30 }
0x11e2   :  { %3790 = vrcp.f32 %v2260_v51 }
0x11e3   :  { %3792 = vrcp.f32 %v2262_v47 }
0x11e9   :  { %v4870_v32 = vpop.eup %3778 }
0x11ea   :  { %v3781_v24 = vpop.eup %3780  ;;  %v2311_v62 = vmul.f32 %v4870_v32, %v2295_v2 }
0x11eb   :  { %v2261_v11 = vadd.f32 1.0, %v3781_v24  ;;  %v4874_v27 = vpop.eup %3782 }
0x11ec   :  { %v4876_v59 = vpop.eup %3784  ;;  %v2312_v54 = vmul.f32 %v4874_v27, %v2296_v17 }
0x11ed   :  { %3794 = vrcp.f32 %v2261_v11  ;;  %v4881_v58 = vpop.eup %3786  ;;  %v2313_v42 = vmul.f32 %v4876_v59, %v2297_v20 }
0x11ee   :  { %v4884_v61 = vpop.eup %3788  ;;  %v2314_v55 = vmul.f32 %v4881_v58, %v2298_v60 }
0x11ef   :  { %v4889_v22 = vpop.eup %3790  ;;  %v2315_v48 = vmul.f32 %v4884_v61, %v2299_v45 }
0x11f0   :  { %v4892_v7 = vpop.eup %3792  ;;  %v2316_v9 = vmul.f32 %v4889_v22, %v2300_v4 }
0x11fa   :  { %v4897_v40 = vpop.eup %3794 }
0x1244   :  { %v2328_v6 = vpop.permute.xlu0 %2327 }
0x1245   :  { %v2351_v14 = vmul.f32 %v4870_v32, %v2328_v6  ;;  %v2330_v34 = vpop.permute.xlu1 %2329  ;;  %v2318_v6 = vmul.f32 %v4892_v7, %v2302_v1 }
0x1246   :  { %v2352_v43 = vmul.f32 %v4874_v27, %v2330_v34 }
0x1247   :  { %2367 = vrot.lane.b32.xlu0 %v2351_v14, %s4025_s3  ;;  %v2317_v14 = vmul.f32 %v4897_v40, %v2301_v39  ;;  %v3353_v39 = vld [vmem:[#allocation2 + $0x4] ss:$0 sps:$4 sm:$0x88]  }
0x1248   :  { %v2332_v50 = vpop.permute.xlu0 %2331  ;;  %2369 = vrot.lane.b32.xlu1 %v2352_v43, %s4025_s3 }
0x1249   :  { %v2353_v46 = vmul.f32 %v4876_v59, %v2332_v50  ;;  %v2334_v25 = vpop.permute.xlu1 %2333 }
0x124a   :  { %v2354_v19 = vmul.f32 %v4881_v58, %v2334_v25 }
0x124b   :  { %2371 = vrot.lane.b32.xlu0 %v2353_v46, %s4025_s3 }
0x124c   :  { %v2336_v49 = vpop.permute.xlu0 %2335  ;;  %2373 = vrot.lane.b32.xlu1 %v2354_v19, %s4025_s3 }
0x124d   :  { %v2355_v41 = vmul.f32 %v4884_v61, %v2336_v49  ;;  %v2338_v8 = vpop.permute.xlu1 %2337 }
0x124e   :  { %v2356_v52 = vmul.f32 %v4889_v22, %v2338_v8 }
0x124f   :  { %2375 = vrot.lane.b32.xlu0 %v2355_v41, %s4025_s3 }
0x1250   :  { %v2342_v26 = vpop.permute.xlu0 %2341  ;;  %2377 = vrot.lane.b32.xlu1 %v2356_v52, %s4025_s3 }
0x1251   :  { %v2358_v21 = vmul.f32 %v4892_v7, %v2342_v26  ;;  %v2340_v44 = vpop.permute.xlu1 %2339 }
0x1252   :  { %v2357_v63 = vmul.f32 %v4897_v40, %v2340_v44 }
0x1253   :  { %2381 = vrot.lane.b32.xlu0 %v2358_v21, %s4025_s3 }
0x1254   :  { %2379 = vrot.lane.b32.xlu1 %v2357_v63, %s4025_s3 }
0x12b9   :  { %v2368_v5 = vpop.permute.xlu0 %2367 }
0x12ba   :  { %v4904_v36 = vadd.f32 %v2368_v5, %v2311_v62  ;;  %v2370_v18 = vpop.permute.xlu1 %2369 }
0x12bb   :  { %v4912_v29 = vadd.f32 %v2370_v18, %v2312_v54 }
0x12bc   :  { %3796 = vtanh.f32 %v4904_v36 }
0x12bd   :  { %v2372_v57 = vpop.permute.xlu0 %2371  ;;  %3798 = vtanh.f32 %v4912_v29 }
0x12be   :  { %v4915_v53 = vadd.f32 %v2372_v57, %v2313_v42  ;;  %v2374_v28 = vpop.permute.xlu1 %2373 }
0x12bf   :  { %v4922_v3 = vadd.f32 %v2374_v28, %v2314_v55 }
0x12c0   :  { %3800 = vtanh.f32 %v4915_v53 }
0x12c1   :  { %v2376_v33 = vpop.permute.xlu0 %2375  ;;  %3802 = vtanh.f32 %v4922_v3 }
0x12c2   :  { %v4925_v30 = vadd.f32 %v2376_v33, %v2315_v48  ;;  %v2378_v51 = vpop.permute.xlu1 %2377 }
0x12c3   :  { %v4933_v24 = vadd.f32 %v2378_v51, %v2316_v9  ;;  %v3351_v9 = vld [vmem:[#allocation8] sm:$0xff]   ;;  %v3352_v51 = vld [vmem:[#allocation2] ss:$0 sps:$4 sm:$0x88]  }
0x12c4   :  { %3804 = vtanh.f32 %v4925_v30  ;;  %3311 = vmatpush3.bf16.msra.mxu0 %v3351_v9 }
0x12c5   :  { %v2382_v47 = vpop.permute.xlu0 %2381  ;;  %3806 = vtanh.f32 %v4933_v24  ;;  %3324 = vmatprep.subr.bf16.mxu0 %v4022_v0 }
0x12c6   :  { %v4935_v10 = vadd.f32 %v2382_v47, %v2318_v6  ;;  %v2380_v11 = vpop.permute.xlu1 %2379 }
0x12c7   :  { %v4940_v34 = vadd.f32 %v2380_v11, %v2317_v14 }
0x12c8   :  { %3808 = vtanh.f32 %v4935_v10 }
0x12c9   :  { %v3797_v15 = vpop.eup %3796  ;;  %3810 = vtanh.f32 %v4940_v34 }
0x12ca   :  { %2415 = vrot.lane.b32.xlu0 %v3797_v15, %s4017_s10  ;;  %v3799_v43 = vpop.eup %3798 }
0x12cb   :  { %2417 = vrot.lane.b32.xlu1 %v3799_v43, %s4017_s10  ;;  %v3354_v43 = vld [vmem:[#allocation2 + $0x8] ss:$0 sps:$4 sm:$0x88]  }
0x12cd   :  { %v3801_v50 = vpop.eup %3800 }
0x12ce   :  { %2419 = vrot.lane.b32.xlu0 %v3801_v50, %s4017_s10  ;;  %v3803_v56 = vpop.eup %3802  ;;  %v2812_v50 = vunpack.c.l.b16 %v3352_v51 }
0x12cf   :  { %2421 = vrot.lane.b32.xlu1 %v3803_v56, %s4017_s10 }
0x12d1   :  { %v3805_v46 = vpop.eup %3804 }
0x12d2   :  { %2423 = vrot.lane.b32.xlu0 %v3805_v46, %s4017_s10  ;;  %v3807_v25 = vpop.eup %3806 }
0x12d3   :  { %2425 = vrot.lane.b32.xlu1 %v3807_v25, %s4017_s10  ;;  %v3355_v25 = vld [vmem:[#allocation2 + $0xc] ss:$0 sps:$4 sm:$0x88]  }
0x12d5   :  { %v3809_v19 = vpop.eup %3808 }
0x12d6   :  { %2429 = vrot.lane.b32.xlu0 %v3809_v19, %s4017_s10  ;;  %v3811_v49 = vpop.eup %3810  ;;  %v3356_v19 = vld [vmem:[#allocation2 + $0x10] ss:$0 sps:$4 sm:$0x88]  }
0x12d7   :  { %2427 = vrot.lane.b32.xlu1 %v3811_v49, %s4017_s10  ;;  %v2813_v49 = vunpack.c.l.b16 %v3353_v39 }
0x133c   :  { %v2416_v41 = vpop.permute.xlu0 %2415 }
0x133d   :  { %v2439_v8 = vmul.f32 %v4870_v32, %v2416_v41  ;;  %v2418_v26 = vpop.permute.xlu1 %2417 }
0x133e   :  { %v2440_v21 = vmul.f32 %v4874_v27, %v2418_v26  ;;  %v2814_v26 = vunpack.c.l.b16 %v3354_v43 }
0x133f   :  { %v2447_v52 = vpack.c.bf16 %v2439_v8, %v2439_v8  ;;  %v3357_v8 = vld [vmem:[#allocation2 + $0x14] ss:$0 sps:$4 sm:$0x88]  }
0x1340   :  { %v2420_v63 = vpop.permute.xlu0 %2419  ;;  %v2448_v62 = vpack.c.bf16 %v2440_v21, %v2440_v21 }
0x1341   :  { %v2463_v44 = vunpack.c.l.b16 %v2447_v52  ;;  %v2441_v2 = vmul.f32 %v4876_v59, %v2420_v63  ;;  %v2422_v5 = vpop.permute.xlu1 %2421  ;;  %v3358_v52 = vld [vmem:[#allocation2 + $0x18] ss:$0 sps:$4 sm:$0x88]   ;;  %v2815_v63 = vunpack.c.l.b16 %v3355_v25 }
0x1342   :  { %v2464_v20 = vunpack.c.l.b16 %v2448_v62  ;;  %v2442_v18 = vmul.f32 %v4881_v58, %v2422_v5  ;;  %v2817_v5 = vunpack.c.l.b16 %v3357_v8 }
0x1343   :  { %v2449_v17 = vpack.c.bf16 %v2441_v2, %v2441_v2  ;;  %v2471_v54 = vrot.slane %v2463_v44, 6  ;;  %v2816_v2 = vunpack.c.l.b16 %v3356_v19 }
0x1344   :  { %v2424_v42 = vpop.permute.xlu0 %2423  ;;  %v2472_v32 = vrot.slane %v2464_v20, 5  ;;  %v2450_v45 = vpack.c.bf16 %v2442_v18, %v2442_v18  ;;  %v2820_v20 = vrot.slane %v2812_v50, 7  ;;  %v3359_v18 = vld [vmem:[#allocation2 + $0x1c] ss:$0 sps:$4 sm:$0x88]  }
0x1345   :  { %v2465_v60 = vunpack.c.l.b16 %v2449_v17  ;;  %v2443_v57 = vmul.f32 %v4884_v61, %v2424_v42  ;;  %v2426_v28 = vpop.permute.xlu1 %2425  ;;  %v2818_v17 = vunpack.c.l.b16 %v3358_v52  ;;  %v2821_v42 = vrot.slane %v2813_v49, 6 }
0x1346   :  { %v2473_v48 = vsel %vm521_vm2, %v2472_v32, %v2471_v54  ;;  %v2466_v4 = vunpack.c.l.b16 %v2450_v45  ;;  %v2444_v59 = vmul.f32 %v4889_v22, %v2426_v28  ;;  %v2827_v32 = vrot.slane %v2816_v2, 3 }
0x1347   :  { %v2474_v55 = vrot.slane %v2465_v60, 4  ;;  %v2451_v27 = vpack.c.bf16 %v2443_v57, %v2443_v57  ;;  %v2823_v60 = vrot.slane %v2814_v26, 5  ;;  %v2825_v57 = vrot.slane %v2815_v63, 4 }
0x1348   :  { %v2430_v33 = vpop.permute.xlu0 %2429  ;;  %v2476_v6 = vrot.slane %v2466_v4, 3  ;;  %v2452_v61 = vpack.c.bf16 %v2444_v59, %v2444_v59  ;;  %v2829_v28 = vrot.slane %v2817_v5, 2  ;;  %v2831_v4 = vrot.slane %v2818_v17, 1 }
0x1349   :  { %v2475_v1 = vsel %vm524_vm3, %v2474_v55, %v2473_v48  ;;  %v2467_v15 = vunpack.c.l.b16 %v2451_v27  ;;  %v2446_v58 = vmul.f32 %v4892_v7, %v2430_v33  ;;  %v2428_v14 = vpop.permute.xlu1 %2427  ;;  %v2822_v55 = vsel %vm521_vm2, %v2821_v42, %v2820_v20 }
0x134a   :  { %v2468_v56 = vunpack.c.l.b16 %v2452_v61  ;;  %v2477_v22 = vsel %vm527_vm4, %v2476_v6, %v2475_v1  ;;  %v2445_v46 = vmul.f32 %v4897_v40, %v2428_v14  ;;  %v2824_v48 = vsel %vm524_vm3, %v2823_v60, %v2822_v55 }
0x134b   :  { %v2478_v47 = vrot.slane %v2467_v15, 2  ;;  %v2454_v11 = vpack.c.bf16 %v2446_v58, %v2446_v58  ;;  %v2819_v33 = vunpack.c.l.b16 %v3359_v18  ;;  %v2826_v1 = vsel %vm527_vm4, %v2825_v57, %v2824_v48 }
0x134c   :  { %v2480_v21 = vrot.slane %v2468_v56, 1  ;;  %v2453_v44 = vpack.c.bf16 %v2445_v46, %v2445_v46  ;;  %v2828_v15 = vsel %vm530_vm5, %v2827_v32, %v2826_v1 }
0x134d   :  { %v2479_v7 = vsel %vm530_vm5, %v2478_v47, %v2477_v22  ;;  %v2470_v41 = vunpack.c.l.b16 %v2454_v11  ;;  %v2830_v58 = vsel %vm533_vm6, %v2829_v28, %v2828_v15 }
0x134e   :  { %v2469_v40 = vunpack.c.l.b16 %v2453_v44  ;;  %v2481_v54 = vsel %vm533_vm6, %v2480_v21, %v2479_v7  ;;  %v2832_v9 = vsel %vm536_vm7, %v2831_v4, %v2830_v58 }
0x134f   :  { %v2483_v62 = vrot.slane %v2470_v41, 7  ;;  %v2833_v51 = vsel %vm539_vm8, %v2819_v33, %v2832_v9 }
0x1350   :  { %v2482_v45 = vsel %vm536_vm7, %v2469_v40, %v2481_v54  ;;  %v2834_v6 = vpack.c.b16 %v2833_v51, %v2833_v51 }
0x1351   :  { %v2484_v27 = vsel %vm539_vm8, %v2483_v62, %v2482_v45  ;;  %v3180_v62 = vld [vmem:[%s5095_s5] ss:$0 sm:$0xff] }
0x1352   :  { %v2485_v59 = vpack.c.b16 %v2484_v27, %v2484_v27  ;;  %3313 = vmatmul.mubr.msk.bf16.vlgmr.msra.gmra.mxu0 %vm142_vm1, %v2834_v6 }
0x1353   :  { %3328 = vmatprep.mubr.msk.bf16.mxu0 %vm4023_vm0, %v4022_v0 }
0x1354   :  { %2486 = vrot.lane.b32.xlu0 %v2485_v59, %s4025_s3 }
0x13c6   :  { %v2487_v61 = vpop.permute.xlu0 %2486 }
0x13c7   :  { %3307 = vmatmul.mubr.msk.bf16.vlgmr.msra.gmra.mxu1 %vm236_vm9, %v2487_v61 }
0x13c8   :  { %3320 = vmatprep.mubr.msk.bf16.mxu1 %vm4023_vm0, %v4022_v0 }
0x1412   :  { %v2878_v39 = vpop.f32.mrf.mxu0 }
0x1414   :  { %v3314_v47 = vpop.f32.mrf.mxu0 }
0x1416   :  { %v2881_v14 = vpop.f32.mrf.mxu0 }
0x1418   :  { %v3315_v11 = vpop.f32.mrf.mxu0 }
0x1487   :  { %v2525_v43 = vpop.f32.mrf.mxu1 }
0x1488   :  { %v2532_v50 = vrot.slane %v2525_v43, 1  ;;  %v2533_v25 = vrot.slane %v2525_v43, 2  ;;  %v2534_v49 = vrot.slane %v2525_v43, 3  ;;  %v2535_v7 = vrot.slane %v2525_v43, 4 }
0x1489   :  { %v3308_v56 = vpop.f32.mrf.mxu1  ;;  %v2536_v8 = vrot.slane %v2525_v43, 5  ;;  %v2537_v26 = vrot.slane %v2525_v43, 6  ;;  %v2538_v44 = vrot.slane %v2525_v43, 7 }
0x148a   :  { %v2547_v22 = vadd.f32 %v2532_v50, %v4133_v12  ;;  %v2548_v41 = vadd.f32 %v2533_v25, %v4140_v23  ;;  %v2549_v52 = vadd.f32 %v2534_v49, %v4135_v13  ;;  %v2550_v21 = vadd.f32 %v2535_v7, %v4137_v16 }
0x148b   :  { %v2528_v46 = vpop.f32.mrf.mxu1  ;;  %v2551_v63 = vadd.f32 %v2536_v8, %v4145_v31  ;;  %v2552_v2 = vadd.f32 %v2537_v26, %v4152_v38  ;;  %v2553_v23 = vadd.f32 %v2538_v44, %v4148_v35  ;;  %v2879_v13 = vadd.f32 %v3180_v62, %v2878_v39 }
0x148c   :  { %3812 = vtanh.f32 %v2547_v22  ;;  %v2554_v16 = vadd.f32 %v2525_v43, %v4150_v37  ;;  %v3172_v54 = vmul.f32 -1.442695, %v2547_v22  ;;  %v3173_v18 = vmul.f32 -1.442695, %v2548_v41 }
0x148d   :  { %v3309_v19 = vpop.f32.mrf.mxu1  ;;  %3814 = vtanh.f32 %v2548_v41  ;;  %v3174_v42 = vmul.f32 -1.442695, %v2549_v52  ;;  %v3175_v60 = vmul.f32 -1.442695, %v2550_v21  ;;  %v3176_v57 = vmul.f32 -1.442695, %v2551_v63 }
0x148e   :  { %3816 = vtanh.f32 %v2549_v52  ;;  %v3177_v45 = vmul.f32 -1.442695, %v2552_v2  ;;  %v3178_v55 = vmul.f32 -1.442695, %v2553_v23  ;;  %v3179_v27 = vmul.f32 -1.442695, %v2554_v16 }
0x148f   :  { %3818 = vtanh.f32 %v2550_v21  ;;  %v3191_v48 = vmul.f32 -1.442695, %v2879_v13 }
0x1490   :  { %3820 = vtanh.f32 %v2551_v63 }
0x1491   :  { %3822 = vtanh.f32 %v2552_v2 }
0x1492   :  { %3824 = vtanh.f32 %v2553_v23 }
0x1493   :  { %3826 = vtanh.f32 %v2879_v13 }
0x1494   :  { %3828 = vtanh.f32 %v2554_v16 }
0x1495   :  { %3830 = vpow2.f32 %v3172_v54 }
0x1496   :  { %3832 = vpow2.f32 %v3173_v18 }
0x1497   :  { %3834 = vpow2.f32 %v3174_v42 }
0x1498   :  { %3836 = vpow2.f32 %v3175_v60  ;;  %v2620_v60 = vrot.slane %v4912_v29, 7 }
0x1499   :  { %v3813_v12 = vpop.eup %3812  ;;  %3838 = vpow2.f32 %v3176_v57  ;;  %v2621_v57 = vrot.slane %v4915_v53, 7  ;;  %v2624_v53 = vrot.slane %v4933_v24, 7 }
0x149a   :  { %2651 = vrot.lane.b32.xlu1 %v3813_v12, %s4017_s10  ;;  %v3815_v31 = vpop.eup %3814  ;;  %3840 = vpow2.f32 %v3177_v45 }
0x149b   :  { %v3817_v5 = vpop.eup %3816  ;;  %2653 = vrot.lane.b32.xlu0 %v3815_v31, %s4017_s10  ;;  %3842 = vpow2.f32 %v3178_v55 }
0x149c   :  { %v3819_v38 = vpop.eup %3818 }
0x149d   :  { %v3821_v17 = vpop.eup %3820 }
0x149e   :  { %2655 = vrot.lane.b32.xlu1 %v3817_v5, %s4017_s10  ;;  %v3823_v35 = vpop.eup %3822 }
0x149f   :  { %2657 = vrot.lane.b32.xlu0 %v3819_v38, %s4017_s10  ;;  %v3825_v20 = vpop.eup %3824 }
0x14a0   :  { %v3827_v37 = vpop.eup %3826 }
0x14a1   :  { %v3829_v40 = vpop.eup %3828 }
0x14a2   :  { %2659 = vrot.lane.b32.xlu1 %v3821_v17, %s4017_s10  ;;  %v3831_v32 = vpop.eup %3830 }
0x14a3   :  { %2661 = vrot.lane.b32.xlu0 %v3823_v35, %s4017_s10  ;;  %v2579_v28 = vadd.f32 1.0, %v3831_v32  ;;  %v3833_v4 = vpop.eup %3832 }
0x14a4   :  { %v3835_v59 = vpop.eup %3834  ;;  %v2580_v33 = vadd.f32 1.0, %v3833_v4 }
0x14a5   :  { %3844 = vrcp.f32 %v2579_v28  ;;  %v3837_v1 = vpop.eup %3836  ;;  %v2581_v15 = vadd.f32 1.0, %v3835_v59  ;;  %v2622_v28 = vrot.slane %v4922_v3, 7 }
0x14a6   :  { %2663 = vrot.lane.b32.xlu1 %v3825_v20, %s4017_s10  ;;  %3846 = vpow2.f32 %v3179_v27  ;;  %v3839_v58 = vpop.eup %3838  ;;  %v2582_v9 = vadd.f32 1.0, %v3837_v1 }
0x14a7   :  { %2665 = vrot.lane.b32.xlu0 %v3829_v40, %s4017_s10  ;;  %3848 = vpow2.f32 %v3191_v48  ;;  %v3841_v51 = vpop.eup %3840  ;;  %v2583_v6 = vadd.f32 1.0, %v3839_v58  ;;  %v2619_v40 = vrot.slane %v4904_v36, 7  ;;  %v2623_v36 = vrot.slane %v4925_v30, 7 }
0x14a8   :  { %3850 = vrcp.f32 %v2580_v33  ;;  %v3843_v61 = vpop.eup %3842  ;;  %v2584_v47 = vadd.f32 1.0, %v3841_v51  ;;  %v2625_v58 = vrot.slane %v4940_v34, 7 }
0x14a9   :  { %3852 = vrcp.f32 %v2581_v15  ;;  %v2585_v43 = vadd.f32 1.0, %v3843_v61  ;;  %v2626_v61 = vrot.slane %v4935_v10, 7 }
0x14aa   :  { %2893 = vrot.lane.b32.xlu1 %v3827_v37, %s4017_s10  ;;  %3854 = vrcp.f32 %v2582_v9 }
0x14ab   :  { %3856 = vrcp.f32 %v2583_v6 }
0x14ac   :  { %3858 = vrcp.f32 %v2584_v47 }
0x14ad   :  { %3860 = vrcp.f32 %v2585_v43 }
0x14b2   :  { %v5000_v39 = vpop.eup %3844 }
0x14b3   :  { %v3847_v11 = vpop.eup %3846  ;;  %v2635_v54 = vmul.f32 %v5000_v39, %v2619_v40 }
0x14b4   :  { %v3849_v56 = vpop.eup %3848  ;;  %v2586_v22 = vadd.f32 1.0, %v3847_v11 }
0x14b5   :  { %v2887_v46 = vadd.f32 1.0, %v3849_v56  ;;  %v5004_v25 = vpop.eup %3850 }
0x14b6   :  { %3862 = vrcp.f32 %v2586_v22  ;;  %v5006_v49 = vpop.eup %3852  ;;  %v2636_v32 = vmul.f32 %v5004_v25, %v2620_v60 }
0x14b7   :  { %3864 = vrcp.f32 %v2887_v46  ;;  %v5011_v52 = vpop.eup %3854  ;;  %v2637_v55 = vmul.f32 %v5006_v49, %v2621_v57 }
0x14b8   :  { %v5014_v21 = vpop.eup %3856  ;;  %v2638_v59 = vmul.f32 %v5011_v52, %v2622_v28 }
0x14b9   :  { %v5019_v2 = vpop.eup %3858  ;;  %v2639_v29 = vmul.f32 %v5014_v21, %v2623_v36 }
0x14ba   :  { %v5022_v23 = vpop.eup %3860  ;;  %v2640_v51 = vmul.f32 %v5019_v2, %v2624_v53 }
0x14bb   :  { %v2641_v6 = vmul.f32 %v5022_v23, %v2625_v58 }
0x14c3   :  { %v5027_v5 = vpop.eup %3862 }
0x14c4   :  { %v5030_v17 = vpop.eup %3864  ;;  %v2642_v11 = vmul.f32 %v5027_v5, %v2626_v61 }
0x14c5   :  { %v2891_v43 = vmul.f32 0.0, %v5030_v17 }
0x150c   :  { %v2652_v14 = vpop.permute.xlu1 %2651 }
0x150d   :  { %v2675_v50 = vmul.f32 %v5000_v39, %v2652_v14  ;;  %v2654_v19 = vpop.permute.xlu0 %2653 }
0x150e   :  { %v2676_v7 = vmul.f32 %v5004_v25, %v2654_v19 }
0x150f   :  { %2691 = vrot.lane.b32.xlu0 %v2675_v50, %s4025_s3 }
0x1510   :  { %v2656_v41 = vpop.permute.xlu1 %2655  ;;  %2693 = vrot.lane.b32.xlu1 %v2676_v7, %s4025_s3 }
0x1511   :  { %v2677_v8 = vmul.f32 %v5006_v49, %v2656_v41  ;;  %v2658_v26 = vpop.permute.xlu0 %2657 }
0x1512   :  { %v2678_v44 = vmul.f32 %v5011_v52, %v2658_v26  ;;  %v3360_v26 = vld [vmem:[#allocation10 + $0x18] sm:$0xff]  }
0x1513   :  { %2695 = vrot.lane.b32.xlu0 %v2677_v8, %s4025_s3  ;;  %3317 = vmatpush3.bf16.msra.mxu1 %v3360_v26 }
0x1514   :  { %v2660_v63 = vpop.permute.xlu1 %2659  ;;  %2697 = vrot.lane.b32.xlu1 %v2678_v44, %s4025_s3  ;;  %v3361_v44 = vld [vmem:[#allocation10 + $0x8] sm:$0xff]   ;;  %3318 = vmatprep.subr.bf16.mxu1 %v4022_v0 }
0x1515   :  { %v2679_v12 = vmul.f32 %v5014_v21, %v2660_v63  ;;  %v2662_v62 = vpop.permute.xlu0 %2661  ;;  %3325 = vmatpush3.bf16.msra.mxu0 %v3361_v44  ;;  %v3362_v63 = vld [vmem:[#allocation10 + $0x10] sm:$0xff]  }
0x1516   :  { %v2680_v13 = vmul.f32 %v5019_v2, %v2662_v62  ;;  %3326 = vmatprep.subr.bf16.mxu0 %v4022_v0 }
0x1517   :  { %2699 = vrot.lane.b32.xlu0 %v2679_v12, %s4025_s3  ;;  %3319 = vmatpush3.bf16.msra.mxu1 %v3362_v63 }
0x1518   :  { %v2664_v16 = vpop.permute.xlu1 %2663  ;;  %2701 = vrot.lane.b32.xlu1 %v2680_v13, %s4025_s3 }
0x1519   :  { %v2681_v31 = vmul.f32 %v5022_v23, %v2664_v16  ;;  %v2666_v38 = vpop.permute.xlu0 %2665 }
0x151a   :  { %v2682_v35 = vmul.f32 %v5027_v5, %v2666_v38 }
0x151b   :  { %2703 = vrot.lane.b32.xlu0 %v2681_v31, %s4025_s3 }
0x151c   :  { %v2894_v20 = vpop.permute.xlu1 %2893  ;;  %2705 = vrot.lane.b32.xlu1 %v2682_v35, %s4025_s3 }
0x151d   :  { %v2896_v37 = vmul.f32 %v5030_v17, %v2894_v20 }
0x151f   :  { %2898 = vrot.lane.b32.xlu0 %v2896_v37, %s4025_s3 }
0x1581   :  { %v2692_v18 = vpop.permute.xlu0 %2691 }
0x1582   :  { %v2715_v42 = vadd.f32 %v2692_v18, %v2635_v54  ;;  %v2694_v45 = vpop.permute.xlu1 %2693 }
0x1583   :  { %v2716_v27 = vadd.f32 %v2694_v45, %v2636_v32  ;;  %v3363_v45 = vld [vmem:[#allocation10] sm:$0xff]  }
0x1584   :  { %3866 = vtanh.f32 %v2715_v42  ;;  %3327 = vmatpush3.bf16.msra.mxu0 %v3363_v45 }
0x1585   :  { %v2696_v48 = vpop.permute.xlu0 %2695  ;;  %3868 = vtanh.f32 %v2716_v27 }
0x1586   :  { %v2717_v4 = vadd.f32 %v2696_v48, %v2637_v55  ;;  %v2698_v33 = vpop.permute.xlu1 %2697 }
0x1587   :  { %v2718_v1 = vadd.f32 %v2698_v33, %v2638_v59 }
0x1588   :  { %3870 = vtanh.f32 %v2717_v4 }
0x1589   :  { %v2700_v15 = vpop.permute.xlu0 %2699  ;;  %3872 = vtanh.f32 %v2718_v1 }
0x158a   :  { %v2719_v9 = vadd.f32 %v2700_v15, %v2639_v29  ;;  %v2702_v30 = vpop.permute.xlu1 %2701 }
0x158b   :  { %v2720_v47 = vadd.f32 %v2702_v30, %v2640_v51 }
0x158c   :  { %3874 = vtanh.f32 %v2719_v9 }
0x158d   :  { %v2704_v14 = vpop.permute.xlu0 %2703  ;;  %3876 = vtanh.f32 %v2720_v47 }
0x158e   :  { %v2721_v24 = vadd.f32 %v2704_v14, %v2641_v6  ;;  %v2706_v34 = vpop.permute.xlu1 %2705 }
0x158f   :  { %v2722_v50 = vadd.f32 %v2706_v34, %v2642_v11 }
0x1590   :  { %3878 = vtanh.f32 %v2721_v24 }
0x1591   :  { %v3867_v3 = vpop.eup %3866  ;;  %v2899_v56 = vpop.permute.xlu0 %2898  ;;  %3880 = vtanh.f32 %v2722_v50 }
0x1592   :  { %2739 = vrot.lane.b32.xlu1 %v3867_v3, %s4017_s10  ;;  %v2901_v22 = vadd.f32 %v2899_v56, %v2891_v43  ;;  %v3869_v46 = vpop.eup %3868 }
0x1593   :  { %2741 = vrot.lane.b32.xlu0 %v3869_v46, %s4017_s10 }
0x1594   :  { %3882 = vtanh.f32 %v2901_v22 }
0x1595   :  { %v3871_v19 = vpop.eup %3870 }
0x1596   :  { %2743 = vrot.lane.b32.xlu1 %v3871_v19, %s4017_s10  ;;  %v3873_v10 = vpop.eup %3872 }
0x1597   :  { %2745 = vrot.lane.b32.xlu0 %v3873_v10, %s4017_s10 }
0x1599   :  { %v3875_v7 = vpop.eup %3874 }
0x159a   :  { %2747 = vrot.lane.b32.xlu1 %v3875_v7, %s4017_s10  ;;  %v3877_v41 = vpop.eup %3876 }
0x159b   :  { %2749 = vrot.lane.b32.xlu0 %v3877_v41, %s4017_s10  ;;  %v3198_v41 = vld [vmem:[%s5097_s7] ss:$0 sm:$0xff] }
0x159d   :  { %v3879_v8 = vpop.eup %3878 }
0x159e   :  { %2751 = vrot.lane.b32.xlu1 %v3879_v8, %s4017_s10  ;;  %v3881_v12 = vpop.eup %3880 }
0x159f   :  { %2753 = vrot.lane.b32.xlu0 %v3881_v12, %s4017_s10 }
0x15a1   :  { %v3883_v62 = vpop.eup %3882 }
0x15a2   :  { %2904 = vrot.lane.b32.xlu1 %v3883_v62, %s4017_s10  ;;  %s4026_s10 = smov [#allocation11]  }
0x15a3   :  { %s3086_s11 = sshll.u32 %s4026_s10, 4  ;;  %s3087_s11 = int_to_ptr.vmem [resolvable:$true] %s3086_s11 }
0x15a4   :  { %s3987_s12 = scalar_lea.vmem %s3087_s11, 128  ;;  %p3992_p12 = scmp.lt.s32.totalorder %s3087_s11, %s3087_s11 }
0x15a5   :  { %p3988_p11 = scmp.ne.s32.totalorder %s3087_s11, %s3987_s12  ;;  %p3993_p13 = scmp.lt.s32.totalorder %s3987_s12, %s3987_s12 }
0x15a7   :  { %p3994_p0 = por %p3993_p13, %p3992_p12 }
0x15a9   :  { %p3995_p1 = pnand %p3994_p0, %p3988_p11 }
0x1604   :  { %v2740_v13 = vpop.permute.xlu1 %2739 }
0x1605   :  { %v2763_v16 = vmul.f32 %v5000_v39, %v2740_v13  ;;  %v2742_v38 = vpop.permute.xlu0 %2741 }
0x1606   :  { %v2764_v35 = vmul.f32 %v5004_v25, %v2742_v38 }
0x1607   :  { %v2908_v31 = vpack.c.bf16 %v2763_v16, %v2763_v16 }
0x1608   :  { %v2744_v37 = vpop.permute.xlu1 %2743  ;;  %v2909_v54 = vpack.c.bf16 %v2764_v35, %v2764_v35 }
0x1609   :  { %v2991_v20 = vunpack.c.l.b16 %v2908_v31  ;;  %v2765_v40 = vmul.f32 %v5006_v49, %v2744_v37  ;;  %v2746_v18 = vpop.permute.xlu0 %2745 }
0x160a   :  { %v2992_v42 = vunpack.c.l.b16 %v2909_v54  ;;  %v2766_v57 = vmul.f32 %v5011_v52, %v2746_v18 }
0x160b   :  { %v2910_v0 = vpack.c.bf16 %v2765_v40, %v2765_v40  ;;  %v2999_v60 = vrot.slane %v2991_v20, 7 }
0x160c   :  { %v2748_v32 = vpop.permute.xlu1 %2747  ;;  %v3000_v28 = vrot.slane %v2992_v42, 6  ;;  %v2911_v27 = vpack.c.bf16 %v2766_v57, %v2766_v57 }
0x160d   :  { %v2993_v55 = vunpack.c.l.b16 %v2910_v0  ;;  %v2767_v39 = vmul.f32 %v5014_v21, %v2748_v32  ;;  %v2750_v48 = vpop.permute.xlu0 %2749 }
0x160e   :  { %v3001_v49 = vsel %vm521_vm2, %v3000_v28, %v2999_v60  ;;  %v2994_v4 = vunpack.c.l.b16 %v2911_v27  ;;  %v2768_v59 = vmul.f32 %v5019_v2, %v2750_v48 }
0x160f   :  { %v3002_v25 = vrot.slane %v2993_v55, 5  ;;  %v2912_v36 = vpack.c.bf16 %v2767_v39, %v2767_v39 }
0x1610   :  { %v2752_v33 = vpop.permute.xlu1 %2751  ;;  %v3004_v1 = vrot.slane %v2994_v4, 4  ;;  %v2913_v15 = vpack.c.bf16 %v2768_v59, %v2768_v59 }
0x1611   :  { %v3003_v29 = vsel %vm524_vm3, %v3002_v25, %v3001_v49  ;;  %v2995_v52 = vunpack.c.l.b16 %v2912_v36  ;;  %v2769_v53 = vmul.f32 %v5022_v23, %v2752_v33  ;;  %v2754_v58 = vpop.permute.xlu0 %2753 }
0x1612   :  { %v2996_v3 = vunpack.c.l.b16 %v2913_v15  ;;  %v3005_v51 = vsel %vm527_vm4, %v3004_v1, %v3003_v29  ;;  %v2770_v30 = vmul.f32 %v5027_v5, %v2754_v58 }
0x1613   :  { %v3006_v21 = vrot.slane %v2995_v52, 3  ;;  %v2914_v9 = vpack.c.bf16 %v2769_v53, %v2769_v53 }
0x1614   :  { %v2905_v6 = vpop.permute.xlu1 %2904  ;;  %v3008_v14 = vrot.slane %v2996_v3, 2  ;;  %v2915_v24 = vpack.c.bf16 %v2770_v30, %v2770_v30 }
0x1615   :  { %v3007_v61 = vsel %vm530_vm5, %v3006_v21, %v3005_v51  ;;  %v2997_v2 = vunpack.c.l.b16 %v2914_v9  ;;  %v2907_v47 = vmul.f32 %v5030_v17, %v2905_v6 }
0x1616   :  { %v2998_v34 = vunpack.c.l.b16 %v2915_v24  ;;  %v3009_v43 = vsel %vm533_vm6, %v3008_v14, %v3007_v61 }
0x1617   :  { %v3010_v11 = vrot.slane %v2997_v2, 1  ;;  %v2920_v23 = vpack.c.bf16 %v2907_v47, %v2907_v47 }
0x1619   :  { %v3011_v50 = vsel %vm536_vm7, %v3010_v11, %v3009_v43  ;;  %2926 = vrot.lane.b32.xlu0 %v2920_v23, %s4025_s3 }
0x161a   :  { %v3012_v56 = vsel %vm539_vm8, %v2998_v34, %v3011_v50 }
0x161b   :  { %v3013_v5 = vpack.c.b16 %v3012_v56, %v3012_v56 }
0x161d   :  { %3014 = vrot.lane.b32.xlu1 %v3013_v5, %s4025_s3 }
0x168b   :  { %v2927_v22 = vpop.permute.xlu0 %2926 }
0x168c   :  { %3321 = vmatmul.mubr.msk.bf16.vlgmr.msra.gmra.mxu1 %vm236_vm9, %v2927_v22 }
0x168f   :  { %v3015_v17 = vpop.permute.xlu1 %3014 }
0x1690   :  { %3329 = vmatmul.mubr.msk.bf16.vlgmr.msra.gmra.mxu0 %vm236_vm9, %v3015_v17 }
0x174c   :  { %v2977_v46 = vpop.f32.mrf.mxu1 }
0x174e   :  { %v3322_v19 = vpop.f32.mrf.mxu1 }
0x1750   :  { %v2980_v10 = vpop.f32.mrf.mxu1  ;;  %v3065_v7 = vpop.f32.mrf.mxu0 }
0x1751   :  { %v3066_v8 = vadd.f32 %v3065_v7, %v2977_v46 }
0x1752   :  { %v3323_v26 = vpop.f32.mrf.mxu1  ;;  %v3330_v44 = vpop.f32.mrf.mxu0 }
0x1753   :  { %v3078_v63 = vadd.f32 %v3198_v41, %v3066_v8 }
0x1754   :  { %v3068_v12 = vpop.f32.mrf.mxu0 }
0x1755   :  { %3079 = vst [vmem:[#allocation11] sm:$0xff] %v3078_v63 }
0x1756   :  { %v3331_v62 = vpop.f32.mrf.mxu0 }
0x1757   :  { %3998 = shalt.err (!%p3995_p1)
}
0x1758   :  { %3089 = dma.vmem_to_hbm [thread:$0]  %s3087_s11, 128, %s5098_s8, [#allocation4]  }
0x1759   :  { %4013 = dma.done.wait [#allocation4], 128  }
0x175a   :  { %4014 = vsyncadd [#allocation4], 4294967168 }
0x175b   :  { %3093 = vsyncpa [#allocation3], 1 }
0x175c   :  { %3094 = vsyncpa [#allocation6], 1 }
0x175d   :  { %3095 = vsyncpa [#allocation9], 1 }
0x175e   :  { %3096 = vsyncpa [#allocation4], 1 }

</bundles_post_ra>
